<compile_context>
chip_gen: v6e
topology: v6e:2x2x1
jax: 0.10.0
libtpu: 0.0.40
codegen_flags: <defaults>
</compile_context>

<pallas_src>
import functools
import math

import jax
import jax.numpy as jnp
from jax import lax
from jax.experimental import pallas as pl
from jax.experimental.pallas import tpu as pltpu


def _round_up(n, m):
    return ((n + m - 1) // m) * m


# ----------------------------------------------------------------------------
# Fused Pallas kernel: all LSTM layers + FC head over one T-chunk
# ----------------------------------------------------------------------------
def _fused_lstm_kernel(*refs, num_layers, hidden_pad):
    """Ref layout (positional):
        refs[0]                      x_ref      (Tc, Bp, Din0_p)   f32 input chunk
        refs[1 : 1+3L]               per layer: wih (Din_p, 4Hp), whh (Hp, 4Hp), b (1, 4Hp)
        refs[1+3L], refs[2+3L]       fcw (Hp, Op), fcb (1, Op)
        refs[3+3L]                   o_ref      (Tc, Bp, Op)       f32 output chunk
        refs[4+3L : ]                scratch: h_sc (L,Bp,Hp), c_sc (L,Bp,Hp),
                                              gx_sc (Tc,Bp,4Hp), slab_sc (Tc,Bp,Hp)
    Gate order follows PyTorch: i, f, g, o.  Each gate's H real columns sit at a
    128-aligned offset inside Hp, so all gate slices are lane-aligned vreg selects.
    """
    Hp = hidden_pad
    L = num_layers

    x_ref = refs[0]
    w_refs = refs[1:1 + 3 * L]
    fcw_ref = refs[1 + 3 * L]
    fcb_ref = refs[2 + 3 * L]
    o_ref = refs[3 + 3 * L]
    h_sc, c_sc, gx_sc, slab_sc = refs[4 + 3 * L:]

    Tc, Bp, _ = x_ref.shape

    # Zero carries on the first chunk (matches the module's zero hidden/cell init).
    @pl.when(pl.program_id(0) == 0)
    def _():
        h_sc[...] = jnp.zeros_like(h_sc)
        c_sc[...] = jnp.zeros_like(c_sc)

    for l in range(L):
        wih = w_refs[3 * l][...]
        whh = w_refs[3 * l + 1][...]
        b = w_refs[3 * l + 2][...]

        # Hoisted input projection (+ bias, added once) for the whole chunk:
        # one tall (Tc*Bp, Din) @ (Din, 4Hp) MXU matmul instead of Tc tiny ones.
        if l == 0:
            d_in = x_ref.shape[2]
            x2 = x_ref[...].reshape(Tc * Bp, d_in)
        else:
            x2 = slab_sc[...].reshape(Tc * Bp, Hp)
        gx = jnp.dot(x2.astype(wih.dtype), wih,
                     preferred_element_type=jnp.float32) + b
        gx_sc[...] = gx.reshape(Tc, Bp, 4 * Hp)

        def step(t, carry):
            h, c = carry
            gates = gx_sc[t] + jnp.dot(h.astype(whh.dtype), whh,
                                       preferred_element_type=jnp.float32)
            i_g = jax.nn.sigmoid(gates[:, 0 * Hp:1 * Hp])
            f_g = jax.nn.sigmoid(gates[:, 1 * Hp:2 * Hp])
            g_g = jnp.tanh(gates[:, 2 * Hp:3 * Hp])
            o_g = jax.nn.sigmoid(gates[:, 3 * Hp:4 * Hp])
            c_new = f_g * c + i_g * g_g
            h_new = o_g * jnp.tanh(c_new)
            slab_sc[t] = h_new          # inter-layer h slab stays in VMEM
            return h_new, c_new

        # Bounded unroll: steps are serially dependent, so unroll>8 buys nothing.
        h_last, c_last = lax.fori_loop(0, Tc, step, (h_sc[l], c_sc[l]),
                                       unroll=8)
        h_sc[l] = h_last
        c_sc[l] = c_last

    # Fused FC head: one tall matmul over the last layer's h slab (no HBM round trip).
    fcw = fcw_ref[...]
    Op = o_ref.shape[-1]
    h_slab = slab_sc[...].reshape(Tc * Bp, Hp).astype(fcw.dtype)
    y = jnp.dot(h_slab, fcw, preferred_element_type=jnp.float32) + fcb_ref[...]
    o_ref[...] = y.reshape(Tc, Bp, Op).astype(o_ref.dtype)


# ----------------------------------------------------------------------------
# Wrapper
# ----------------------------------------------------------------------------
def _vmem_bytes_estimate(tc, Bp, Din0_p, Hp, Op, layer_in_dims, w_bytes):
    f32 = 4
    est = 2 * tc * Bp * Din0_p * f32              # x block (double-buffered)
    est += 2 * tc * Bp * Op * f32                 # output block (double-buffered)
    for d_in_p in layer_in_dims:                  # weights + biases (double-buffered)
        est += 2 * (d_in_p + Hp) * 4 * Hp * w_bytes + 2 * 4 * Hp * f32
    est += 2 * (Hp * Op * w_bytes + Op * f32)     # fc weight / bias
    est += 2 * len(layer_in_dims) * Bp * Hp * f32  # h / c carries
    est += tc * Bp * 4 * Hp * f32                 # gx scratch
    est += tc * Bp * Hp * f32                     # h slab scratch
    return est


def lstm_forward(x, packed, *, output_size, t_chunk=32):
    """x: (B, T, input_size) -> (B, T, output_size). Mirrors LSTM.forward."""
    B, T, Din = x.shape
    layers = packed["layers"]
    num_layers = len(layers)
    Din0_p = layers[0][0].shape[0]
    Hp = layers[0][1].shape[0]
    G4 = 4 * Hp
    Op = packed["fc_w"].shape[1]

    Bp = _round_up(B, 8)
    tc = max(1, min(t_chunk, T))                  # limit tail padding waste
    Tp = _round_up(T, tc)

    h = jnp.transpose(x, (1, 0, 2))                               # time-major (T, B, Din)
    h = jnp.pad(h, ((0, Tp - T), (0, Bp - B), (0, Din0_p - Din)))  # pad T / batch / lanes

    in_specs = [pl.BlockSpec((tc, Bp, Din0_p), lambda t: (t, 0, 0))]
    operands = [h]
    layer_in_dims = []
    for (wih_p, whh_p, b_p) in layers:
        d_in_p = wih_p.shape[0]
        layer_in_dims.append(d_in_p)
        in_specs += [
            pl.BlockSpec((d_in_p, G4), lambda t: (0, 0)),
            pl.BlockSpec((Hp, G4), lambda t: (0, 0)),
            pl.BlockSpec((1, G4), lambda t: (0, 0)),
        ]
        operands += [wih_p, whh_p, b_p]
    in_specs += [pl.BlockSpec((Hp, Op), lambda t: (0, 0)),
                 pl.BlockSpec((1, Op), lambda t: (0, 0))]
    operands += [packed["fc_w"], packed["fc_b"]]

    out_spec = pl.BlockSpec((tc, Bp, Op), lambda t: (t, 0, 0))

    scratch = [
        pltpu.VMEM((num_layers, Bp, Hp), jnp.float32),   # h carries (per layer)
        pltpu.VMEM((num_layers, Bp, Hp), jnp.float32),   # c carries (per layer)
        pltpu.VMEM((tc, Bp, G4), jnp.float32),           # hoisted gate pre-activations
        pltpu.VMEM((tc, Bp, Hp), jnp.float32),           # inter-layer h slab
    ]

    w_bytes = layers[0][0].dtype.itemsize
    est = _vmem_bytes_estimate(tc, Bp, Din0_p, Hp, Op, layer_in_dims, w_bytes)
    vmem_limit = int(min(max(est * 1.5 + (4 << 20), 32 << 20), 64 << 20))

    kernel = functools.partial(_fused_lstm_kernel,
                               num_layers=num_layers, hidden_pad=Hp)

    y = pl.pallas_call(
        kernel,
        out_shape=jax.ShapeDtypeStruct((Tp, Bp, Op), jnp.float32),
        grid=(Tp // tc,),
        in_specs=in_specs,
        out_specs=out_spec,
        scratch_shapes=scratch,
        compiler_params=pltpu.CompilerParams(
            dimension_semantics=("arbitrary",),   # time axis is sequential (h/c carry)
            vmem_limit_bytes=vmem_limit),
    )(*operands)

    y = y[:T, :B, :output_size]                   # drop all padding
    return jnp.transpose(y, (1, 0, 2))            # back to (B, T, O)


# ----------------------------------------------------------------------------
# Parameter init (PyTorch-style) + packing into the padded kernel layout
# ----------------------------------------------------------------------------
def init_raw_params(key, input_size, hidden_size, output_size, num_layers):
    stdv = 1.0 / math.sqrt(hidden_size)
    layers = []
    for layer in range(num_layers):
        d_in = input_size if layer == 0 else hidden_size
        key, k1, k2, k3, k4 = jax.random.split(key, 5)
        w_ih = jax.random.uniform(k1, (4 * hidden_size, d_in), jnp.float32, -stdv, stdv)
        w_hh = jax.random.uniform(k2, (4 * hidden_size, hidden_size), jnp.float32, -stdv, stdv)
        b_ih = jax.random.uniform(k3, (4 * hidden_size,), jnp.float32, -stdv, stdv)
        b_hh = jax.random.uniform(k4, (4 * hidden_size,), jnp.float32, -stdv, stdv)
        layers.append((w_ih, w_hh, b_ih, b_hh))
    key, k5, k6 = jax.random.split(key, 3)
    fc_w = jax.random.uniform(k5, (output_size, hidden_size), jnp.float32, -stdv, stdv)
    fc_b = jax.random.uniform(k6, (output_size,), jnp.float32, -stdv, stdv)
    return {"layers": layers, "fc_w": fc_w, "fc_b": fc_b}


def _pad_gate_cols(w_t, H, Hp):
    """(rows, 4H) -> (rows, 4Hp): place each gate's H columns at a 128-aligned offset."""
    rows = w_t.shape[0]
    out = jnp.zeros((rows, 4 * Hp), w_t.dtype)
    for g in range(4):
        out = out.at[:, g * Hp:g * Hp + H].set(w_t[:, g * H:(g + 1) * H])
    return out


def pack_params(raw, input_size, hidden_size, output_size,
                compute_dtype=jnp.bfloat16):
    """Transpose + pad params into the lane/sublane-aligned kernel layout.

    compute_dtype: dtype of the MXU operands (weights; matmul LHS is cast in-kernel).
    Default bfloat16 for peak MXU throughput; accumulation, biases and all gate
    elementwise math stay float32.  Use float32 for bit-tight parity with PyTorch.
    """
    H = hidden_size
    Hp = _round_up(H, 128)
    Din0_p = _round_up(input_size, 128)

    layers = []
    for li, (w_ih, w_hh, b_ih, b_hh) in enumerate(raw["layers"]):
        d_in = input_size if li == 0 else H
        d_in_p = Din0_p if li == 0 else Hp
        wih_t = jnp.zeros((d_in_p, 4 * H), jnp.float32).at[:d_in].set(w_ih.T)
        whh_t = jnp.zeros((Hp, 4 * H), jnp.float32).at[:H].set(w_hh.T)
        wih_p = _pad_gate_cols(wih_t, H, Hp).astype(compute_dtype)
        whh_p = _pad_gate_cols(whh_t, H, Hp).astype(compute_dtype)
        b_p = _pad_gate_cols((b_ih + b_hh).reshape(1, 4 * H), H, Hp)  # f32 bias
        layers.append((wih_p, whh_p, b_p))

    Op = _round_up(output_size, 128)
    fc_w_p = (jnp.zeros((Hp, Op), jnp.float32)
              .at[:H, :output_size].set(raw["fc_w"].T).astype(compute_dtype))
    fc_b_p = jnp.zeros((1, Op), jnp.float32).at[0, :output_size].set(raw["fc_b"])
    return {"layers": layers, "fc_w": fc_w_p, "fc_b": fc_b_p}


# ----------------------------------------------------------------------------
# Pure-JAX reference (same math, no Pallas, no padding) for a correctness check
# ----------------------------------------------------------------------------
def lstm_forward_ref(x, raw):
    B, T, _ = x.shape
    h_seq = jnp.transpose(x, (1, 0, 2))
    for (w_ih, w_hh, b_ih, b_hh) in raw["layers"]:
        H = w_hh.shape[1]
        wih_t, whh_t = w_ih.T, w_hh.T
        b = (b_ih + b_hh)[None, :]
        h = jnp.zeros((B, H), jnp.float32)
        c = jnp.zeros((B, H), jnp.float32)
        outs = []
        for t in range(T):
            gates = h_seq[t] @ wih_t + h @ whh_t + b
            i_g = jax.nn.sigmoid(gates[:, 0 * H:1 * H])
            f_g = jax.nn.sigmoid(gates[:, 1 * H:2 * H])
            g_g = jnp.tanh(gates[:, 2 * H:3 * H])
            o_g = jax.nn.sigmoid(gates[:, 3 * H:4 * H])
            c = f_g * c + i_g * g_g
            h = o_g * jnp.tanh(c)
            outs.append(h)
        h_seq = jnp.stack(outs, axis=0)
    y = h_seq @ raw["fc_w"].T + raw["fc_b"]
    return jnp.transpose(y, (1, 0, 2))


# ----------------------------------------------------------------------------
if __name__ == "__main__":
    input_size, hidden_size, output_size = 16, 32, 8
    num_layers, batch_size, seq_len = 2, 2, 8

    key = jax.random.PRNGKey(0)
    key, xk = jax.random.split(key)
    x = jax.random.normal(xk, (batch_size, seq_len, input_size), jnp.float32)

    raw = init_raw_params(key, input_size, hidden_size, output_size, num_layers)
    ref = lstm_forward_ref(x, raw)

    fwd = jax.jit(functools.partial(lstm_forward, output_size=output_size))

    # 1) float32 MXU operands: tight numerical check against the pure-JAX reference.
    packed_f32 = pack_params(raw, input_size, hidden_size, output_size,
                             compute_dtype=jnp.float32)
    out_f32 = jax.block_until_ready(fwd(x, packed_f32))
    assert out_f32.shape == (batch_size, seq_len, output_size), out_f32.shape
    err_f32 = float(jnp.max(jnp.abs(out_f32 - ref)))
    assert jnp.allclose(out_f32, ref, rtol=1e-3, atol=1e-3), err_f32

    # 2) bfloat16 MXU operands (default perf path): loose check.
    packed_bf16 = pack_params(raw, input_size, hidden_size, output_size)
    out_bf16 = jax.block_until_ready(fwd(x, packed_bf16))
    err_bf16 = float(jnp.max(jnp.abs(out_bf16 - ref)))
    assert err_bf16 < 1e-1, err_bf16

    print("KERNEL_OK")
</pallas_src>

<mosaic_0001>
module attributes {stable_mosaic.version = 11 : i64} {
  func.func @_fused_lstm_kernel(%arg0: i32, %arg1: memref<8x8x128xf32, #tpu.memory_space<vmem>>, %arg2: memref<128x512xf32, #tpu.memory_space<vmem>>, %arg3: memref<128x512xf32, #tpu.memory_space<vmem>>, %arg4: memref<1x512xf32, #tpu.memory_space<vmem>>, %arg5: memref<128x512xf32, #tpu.memory_space<vmem>>, %arg6: memref<128x512xf32, #tpu.memory_space<vmem>>, %arg7: memref<1x512xf32, #tpu.memory_space<vmem>>, %arg8: memref<128x128xf32, #tpu.memory_space<vmem>>, %arg9: memref<1x128xf32, #tpu.memory_space<vmem>>, %arg10: memref<8x8x128xf32, #tpu.memory_space<vmem>>, %arg11: memref<2x8x128xf32, #tpu.memory_space<vmem>>, %arg12: memref<2x8x128xf32, #tpu.memory_space<vmem>>, %arg13: memref<8x8x512xf32, #tpu.memory_space<vmem>>, %arg14: memref<8x8x128xf32, #tpu.memory_space<vmem>>) attributes {dimension_semantics = [#tpu.dimension_semantics<arbitrary>], iteration_bounds = array<i64: 1>, scalar_prefetch = 0 : i64, scratch_operands = 4 : i64, tpu.core_type = #tpu.core_type<tc>, window_params = [{transform_indices = @transform_0, window_bounds = array<i64: 8, 8, 128>}, {pipeline_mode = #tpu.pipeline_mode<synchronous>, transform_indices = @transform_1, window_bounds = array<i64: 128, 512>}, {pipeline_mode = #tpu.pipeline_mode<synchronous>, transform_indices = @transform_2, window_bounds = array<i64: 128, 512>}, {pipeline_mode = #tpu.pipeline_mode<synchronous>, transform_indices = @transform_3, window_bounds = array<i64: 1, 512>}, {pipeline_mode = #tpu.pipeline_mode<synchronous>, transform_indices = @transform_4, window_bounds = array<i64: 128, 512>}, {pipeline_mode = #tpu.pipeline_mode<synchronous>, transform_indices = @transform_5, window_bounds = array<i64: 128, 512>}, {pipeline_mode = #tpu.pipeline_mode<synchronous>, transform_indices = @transform_6, window_bounds = array<i64: 1, 512>}, {pipeline_mode = #tpu.pipeline_mode<synchronous>, transform_indices = @transform_7, window_bounds = array<i64: 128, 128>}, {pipeline_mode = #tpu.pipeline_mode<synchronous>, transform_indices = @transform_8, window_bounds = array<i64: 1, 128>}, {transform_indices = @transform_9, window_bounds = array<i64: 8, 8, 128>}]} {
    %c0_i32 = arith.constant 0 : i32
    %0 = arith.cmpi eq, %arg0, %c0_i32 : i32
    %1 = arith.extui %0 : i1 to i32
    %c0_i32_0 = arith.constant 0 : i32
    %2 = arith.cmpi ne, %1, %c0_i32_0 : i32
    scf.if %2 {
      %cst_197 = arith.constant 0.000000e+00 : f32
      %596 = vector.broadcast %cst_197 : f32 to vector<2x8x128xf32>
      %c0_198 = arith.constant 0 : index
      %c0_199 = arith.constant 0 : index
      %c0_200 = arith.constant 0 : index
      %597 = vector.load %arg11[%c0_198, %c0_199, %c0_200] : memref<2x8x128xf32, #tpu.memory_space<vmem>>, vector<2x8x128xf32>
      tpu.vector_store %arg11[%c0_198, %c0_199, %c0_200], %596 {strides = array<i32>} : memref<2x8x128xf32, #tpu.memory_space<vmem>>, vector<2x8x128xf32>,
      %cst_201 = arith.constant 0.000000e+00 : f32
      %598 = vector.broadcast %cst_201 : f32 to vector<2x8x128xf32>
      %c0_202 = arith.constant 0 : index
      %c0_203 = arith.constant 0 : index
      %c0_204 = arith.constant 0 : index
      %599 = vector.load %arg12[%c0_202, %c0_203, %c0_204] : memref<2x8x128xf32, #tpu.memory_space<vmem>>, vector<2x8x128xf32>
      tpu.vector_store %arg12[%c0_202, %c0_203, %c0_204], %598 {strides = array<i32>} : memref<2x8x128xf32, #tpu.memory_space<vmem>>, vector<2x8x128xf32>,
    } else {
    }
    %c0 = arith.constant 0 : index
    %c0_1 = arith.constant 0 : index
    %3 = vector.load %arg2[%c0, %c0_1] : memref<128x512xf32, #tpu.memory_space<vmem>>, vector<128x512xf32>
    %c0_2 = arith.constant 0 : index
    %c0_3 = arith.constant 0 : index
    %4 = vector.load %arg3[%c0_2, %c0_3] : memref<128x512xf32, #tpu.memory_space<vmem>>, vector<128x512xf32>
    %c0_4 = arith.constant 0 : index
    %c0_5 = arith.constant 0 : index
    %5 = vector.load %arg4[%c0_4, %c0_5] : memref<1x512xf32, #tpu.memory_space<vmem>>, vector<1x512xf32>
    %c0_6 = arith.constant 0 : index
    %c0_7 = arith.constant 0 : index
    %c0_8 = arith.constant 0 : index
    %6 = vector.load %arg1[%c0_6, %c0_7, %c0_8] : memref<8x8x128xf32, #tpu.memory_space<vmem>>, vector<8x8x128xf32>
    %7 = vector.shape_cast %6 : vector<8x8x128xf32> to vector<64x128xf32>
    %cst = arith.constant dense<0.000000e+00> : vector<64x512xf32>
    %8 = tpu.matmul %7, %3, %cst {dimension_numbers = #tpu.dot_dimension_numbers<[1], [0], [0], [1], [0, 0, 1, 1], [], []>} : vector<64x128xf32>, vector<128x512xf32>, vector<64x512xf32> -> vector<64x512xf32>
    %9 = vector.broadcast %5 : vector<1x512xf32> to vector<64x512xf32>
    %10 = arith.addf %8, %9 : vector<64x512xf32>
    %11 = vector.shape_cast %10 : vector<64x512xf32> to vector<8x8x512xf32>
    %c0_9 = arith.constant 0 : index
    %c0_10 = arith.constant 0 : index
    %c0_11 = arith.constant 0 : index
    %12 = vector.load %arg13[%c0_9, %c0_10, %c0_11] : memref<8x8x512xf32, #tpu.memory_space<vmem>>, vector<8x8x512xf32>
    tpu.vector_store %arg13[%c0_9, %c0_10, %c0_11], %11 {strides = array<i32>} : memref<8x8x512xf32, #tpu.memory_space<vmem>>, vector<8x8x512xf32>,
    %c0_12 = arith.constant 0 : index
    %c0_13 = arith.constant 0 : index
    %c0_14 = arith.constant 0 : index
    %13 = vector.load %arg11[%c0_12, %c0_13, %c0_14] : memref<2x8x128xf32, #tpu.memory_space<vmem>>, vector<1x8x128xf32>
    %14 = vector.shape_cast %13 : vector<1x8x128xf32> to vector<8x128xf32>
    %c0_15 = arith.constant 0 : index
    %c0_16 = arith.constant 0 : index
    %c0_17 = arith.constant 0 : index
    %15 = vector.load %arg12[%c0_15, %c0_16, %c0_17] : memref<2x8x128xf32, #tpu.memory_space<vmem>>, vector<1x8x128xf32>
    %16 = vector.shape_cast %15 : vector<1x8x128xf32> to vector<8x128xf32>
    %c0_i32_18 = arith.constant 0 : i32
    %17 = arith.index_cast %c0_i32_18 : i32 to index
    %c0_19 = arith.constant 0 : index
    %c0_20 = arith.constant 0 : index
    %18 = vector.load %arg13[%17, %c0_19, %c0_20] : memref<8x8x512xf32, #tpu.memory_space<vmem>>, vector<1x8x512xf32>
    %19 = vector.shape_cast %18 : vector<1x8x512xf32> to vector<8x512xf32>
    %cst_21 = arith.constant dense<0.000000e+00> : vector<8x512xf32>
    %20 = tpu.matmul %14, %4, %cst_21 {dimension_numbers = #tpu.dot_dimension_numbers<[1], [0], [0], [1], [0, 0, 1, 1], [], []>} : vector<8x128xf32>, vector<128x512xf32>, vector<8x512xf32> -> vector<8x512xf32>
    %21 = arith.addf %19, %20 : vector<8x512xf32>
    %22 = vector.extract_strided_slice %21 {offsets = [0, 0], sizes = [8, 128], strides = [1, 1]} : vector<8x512xf32> to vector<8x128xf32>
    %23 = arith.negf %22 : vector<8x128xf32>
    %24 = math.exp %23 : vector<8x128xf32>
    %cst_22 = arith.constant 1.000000e+00 : f32
    %25 = vector.broadcast %cst_22 : f32 to vector<8x128xf32>
    %26 = arith.addf %25, %24 : vector<8x128xf32>
    %27 = arith.divf %25, %26 : vector<8x128xf32>
    %28 = vector.extract_strided_slice %21 {offsets = [0, 128], sizes = [8, 128], strides = [1, 1]} : vector<8x512xf32> to vector<8x128xf32>
    %29 = arith.negf %28 : vector<8x128xf32>
    %30 = math.exp %29 : vector<8x128xf32>
    %cst_23 = arith.constant 1.000000e+00 : f32
    %31 = vector.broadcast %cst_23 : f32 to vector<8x128xf32>
    %32 = arith.addf %31, %30 : vector<8x128xf32>
    %33 = arith.divf %31, %32 : vector<8x128xf32>
    %34 = vector.extract_strided_slice %21 {offsets = [0, 256], sizes = [8, 128], strides = [1, 1]} : vector<8x512xf32> to vector<8x128xf32>
    %35 = math.tanh %34 : vector<8x128xf32>
    %36 = vector.extract_strided_slice %21 {offsets = [0, 384], sizes = [8, 128], strides = [1, 1]} : vector<8x512xf32> to vector<8x128xf32>
    %37 = arith.negf %36 : vector<8x128xf32>
    %38 = math.exp %37 : vector<8x128xf32>
    %cst_24 = arith.constant 1.000000e+00 : f32
    %39 = vector.broadcast %cst_24 : f32 to vector<8x128xf32>
    %40 = arith.addf %39, %38 : vector<8x128xf32>
    %41 = arith.divf %39, %40 : vector<8x128xf32>
    %42 = arith.mulf %33, %16 : vector<8x128xf32>
    %43 = arith.mulf %27, %35 : vector<8x128xf32>
    %44 = arith.addf %42, %43 : vector<8x128xf32>
    %45 = math.tanh %44 : vector<8x128xf32>
    %46 = arith.mulf %41, %45 : vector<8x128xf32>
    %47 = arith.index_cast %c0_i32_18 : i32 to index
    %c0_25 = arith.constant 0 : index
    %c0_26 = arith.constant 0 : index
    %48 = vector.load %arg14[%47, %c0_25, %c0_26] : memref<8x8x128xf32, #tpu.memory_space<vmem>>, vector<1x8x128xf32>
    %49 = vector.shape_cast %48 : vector<1x8x128xf32> to vector<8x128xf32>
    %50 = vector.shape_cast %46 : vector<8x128xf32> to vector<1x8x128xf32>
    tpu.vector_store %arg14[%47, %c0_25, %c0_26], %50 {strides = array<i32>} : memref<8x8x128xf32, #tpu.memory_space<vmem>>, vector<1x8x128xf32>,
    %c1_i32 = arith.constant 1 : i32
    %51 = arith.index_cast %c1_i32 : i32 to index
    %c0_27 = arith.constant 0 : index
    %c0_28 = arith.constant 0 : index
    %52 = vector.load %arg13[%51, %c0_27, %c0_28] : memref<8x8x512xf32, #tpu.memory_space<vmem>>, vector<1x8x512xf32>
    %53 = vector.shape_cast %52 : vector<1x8x512xf32> to vector<8x512xf32>
    %cst_29 = arith.constant dense<0.000000e+00> : vector<8x512xf32>
    %54 = tpu.matmul %46, %4, %cst_29 {dimension_numbers = #tpu.dot_dimension_numbers<[1], [0], [0], [1], [0, 0, 1, 1], [], []>} : vector<8x128xf32>, vector<128x512xf32>, vector<8x512xf32> -> vector<8x512xf32>
    %55 = arith.addf %53, %54 : vector<8x512xf32>
    %56 = vector.extract_strided_slice %55 {offsets = [0, 0], sizes = [8, 128], strides = [1, 1]} : vector<8x512xf32> to vector<8x128xf32>
    %57 = arith.negf %56 : vector<8x128xf32>
    %58 = math.exp %57 : vector<8x128xf32>
    %cst_30 = arith.constant 1.000000e+00 : f32
    %59 = vector.broadcast %cst_30 : f32 to vector<8x128xf32>
    %60 = arith.addf %59, %58 : vector<8x128xf32>
    %61 = arith.divf %59, %60 : vector<8x128xf32>
    %62 = vector.extract_strided_slice %55 {offsets = [0, 128], sizes = [8, 128], strides = [1, 1]} : vector<8x512xf32> to vector<8x128xf32>
    %63 = arith.negf %62 : vector<8x128xf32>
    %64 = math.exp %63 : vector<8x128xf32>
    %cst_31 = arith.constant 1.000000e+00 : f32
    %65 = vector.broadcast %cst_31 : f32 to vector<8x128xf32>
    %66 = arith.addf %65, %64 : vector<8x128xf32>
    %67 = arith.divf %65, %66 : vector<8x128xf32>
    %68 = vector.extract_strided_slice %55 {offsets = [0, 256], sizes = [8, 128], strides = [1, 1]} : vector<8x512xf32> to vector<8x128xf32>
    %69 = math.tanh %68 : vector<8x128xf32>
    %70 = vector.extract_strided_slice %55 {offsets = [0, 384], sizes = [8, 128], strides = [1, 1]} : vector<8x512xf32> to vector<8x128xf32>
    %71 = arith.negf %70 : vector<8x128xf32>
    %72 = math.exp %71 : vector<8x128xf32>
    %cst_32 = arith.constant 1.000000e+00 : f32
    %73 = vector.broadcast %cst_32 : f32 to vector<8x128xf32>
    %74 = arith.addf %73, %72 : vector<8x128xf32>
    %75 = arith.divf %73, %74 : vector<8x128xf32>
    %76 = arith.mulf %67, %44 : vector<8x128xf32>
    %77 = arith.mulf %61, %69 : vector<8x128xf32>
    %78 = arith.addf %76, %77 : vector<8x128xf32>
    %79 = math.tanh %78 : vector<8x128xf32>
    %80 = arith.mulf %75, %79 : vector<8x128xf32>
    %81 = arith.index_cast %c1_i32 : i32 to index
    %c0_33 = arith.constant 0 : index
    %c0_34 = arith.constant 0 : index
    %82 = vector.load %arg14[%81, %c0_33, %c0_34] : memref<8x8x128xf32, #tpu.memory_space<vmem>>, vector<1x8x128xf32>
    %83 = vector.shape_cast %82 : vector<1x8x128xf32> to vector<8x128xf32>
    %84 = vector.shape_cast %80 : vector<8x128xf32> to vector<1x8x128xf32>
    tpu.vector_store %arg14[%81, %c0_33, %c0_34], %84 {strides = array<i32>} : memref<8x8x128xf32, #tpu.memory_space<vmem>>, vector<1x8x128xf32>,
    %c2_i32 = arith.constant 2 : i32
    %85 = arith.index_cast %c2_i32 : i32 to index
    %c0_35 = arith.constant 0 : index
    %c0_36 = arith.constant 0 : index
    %86 = vector.load %arg13[%85, %c0_35, %c0_36] : memref<8x8x512xf32, #tpu.memory_space<vmem>>, vector<1x8x512xf32>
    %87 = vector.shape_cast %86 : vector<1x8x512xf32> to vector<8x512xf32>
    %cst_37 = arith.constant dense<0.000000e+00> : vector<8x512xf32>
    %88 = tpu.matmul %80, %4, %cst_37 {dimension_numbers = #tpu.dot_dimension_numbers<[1], [0], [0], [1], [0, 0, 1, 1], [], []>} : vector<8x128xf32>, vector<128x512xf32>, vector<8x512xf32> -> vector<8x512xf32>
    %89 = arith.addf %87, %88 : vector<8x512xf32>
    %90 = vector.extract_strided_slice %89 {offsets = [0, 0], sizes = [8, 128], strides = [1, 1]} : vector<8x512xf32> to vector<8x128xf32>
    %91 = arith.negf %90 : vector<8x128xf32>
    %92 = math.exp %91 : vector<8x128xf32>
    %cst_38 = arith.constant 1.000000e+00 : f32
    %93 = vector.broadcast %cst_38 : f32 to vector<8x128xf32>
    %94 = arith.addf %93, %92 : vector<8x128xf32>
    %95 = arith.divf %93, %94 : vector<8x128xf32>
    %96 = vector.extract_strided_slice %89 {offsets = [0, 128], sizes = [8, 128], strides = [1, 1]} : vector<8x512xf32> to vector<8x128xf32>
    %97 = arith.negf %96 : vector<8x128xf32>
    %98 = math.exp %97 : vector<8x128xf32>
    %cst_39 = arith.constant 1.000000e+00 : f32
    %99 = vector.broadcast %cst_39 : f32 to vector<8x128xf32>
    %100 = arith.addf %99, %98 : vector<8x128xf32>
    %101 = arith.divf %99, %100 : vector<8x128xf32>
    %102 = vector.extract_strided_slice %89 {offsets = [0, 256], sizes = [8, 128], strides = [1, 1]} : vector<8x512xf32> to vector<8x128xf32>
    %103 = math.tanh %102 : vector<8x128xf32>
    %104 = vector.extract_strided_slice %89 {offsets = [0, 384], sizes = [8, 128], strides = [1, 1]} : vector<8x512xf32> to vector<8x128xf32>
    %105 = arith.negf %104 : vector<8x128xf32>
    %106 = math.exp %105 : vector<8x128xf32>
    %cst_40 = arith.constant 1.000000e+00 : f32
    %107 = vector.broadcast %cst_40 : f32 to vector<8x128xf32>
    %108 = arith.addf %107, %106 : vector<8x128xf32>
    %109 = arith.divf %107, %108 : vector<8x128xf32>
    %110 = arith.mulf %101, %78 : vector<8x128xf32>
    %111 = arith.mulf %95, %103 : vector<8x128xf32>
    %112 = arith.addf %110, %111 : vector<8x128xf32>
    %113 = math.tanh %112 : vector<8x128xf32>
    %114 = arith.mulf %109, %113 : vector<8x128xf32>
    %115 = arith.index_cast %c2_i32 : i32 to index
    %c0_41 = arith.constant 0 : index
    %c0_42 = arith.constant 0 : index
    %116 = vector.load %arg14[%115, %c0_41, %c0_42] : memref<8x8x128xf32, #tpu.memory_space<vmem>>, vector<1x8x128xf32>
    %117 = vector.shape_cast %116 : vector<1x8x128xf32> to vector<8x128xf32>
    %118 = vector.shape_cast %114 : vector<8x128xf32> to vector<1x8x128xf32>
    tpu.vector_store %arg14[%115, %c0_41, %c0_42], %118 {strides = array<i32>} : memref<8x8x128xf32, #tpu.memory_space<vmem>>, vector<1x8x128xf32>,
    %c3_i32 = arith.constant 3 : i32
    %119 = arith.index_cast %c3_i32 : i32 to index
    %c0_43 = arith.constant 0 : index
    %c0_44 = arith.constant 0 : index
    %120 = vector.load %arg13[%119, %c0_43, %c0_44] : memref<8x8x512xf32, #tpu.memory_space<vmem>>, vector<1x8x512xf32>
    %121 = vector.shape_cast %120 : vector<1x8x512xf32> to vector<8x512xf32>
    %cst_45 = arith.constant dense<0.000000e+00> : vector<8x512xf32>
    %122 = tpu.matmul %114, %4, %cst_45 {dimension_numbers = #tpu.dot_dimension_numbers<[1], [0], [0], [1], [0, 0, 1, 1], [], []>} : vector<8x128xf32>, vector<128x512xf32>, vector<8x512xf32> -> vector<8x512xf32>
    %123 = arith.addf %121, %122 : vector<8x512xf32>
    %124 = vector.extract_strided_slice %123 {offsets = [0, 0], sizes = [8, 128], strides = [1, 1]} : vector<8x512xf32> to vector<8x128xf32>
    %125 = arith.negf %124 : vector<8x128xf32>
    %126 = math.exp %125 : vector<8x128xf32>
    %cst_46 = arith.constant 1.000000e+00 : f32
    %127 = vector.broadcast %cst_46 : f32 to vector<8x128xf32>
    %128 = arith.addf %127, %126 : vector<8x128xf32>
    %129 = arith.divf %127, %128 : vector<8x128xf32>
    %130 = vector.extract_strided_slice %123 {offsets = [0, 128], sizes = [8, 128], strides = [1, 1]} : vector<8x512xf32> to vector<8x128xf32>
    %131 = arith.negf %130 : vector<8x128xf32>
    %132 = math.exp %131 : vector<8x128xf32>
    %cst_47 = arith.constant 1.000000e+00 : f32
    %133 = vector.broadcast %cst_47 : f32 to vector<8x128xf32>
    %134 = arith.addf %133, %132 : vector<8x128xf32>
    %135 = arith.divf %133, %134 : vector<8x128xf32>
    %136 = vector.extract_strided_slice %123 {offsets = [0, 256], sizes = [8, 128], strides = [1, 1]} : vector<8x512xf32> to vector<8x128xf32>
    %137 = math.tanh %136 : vector<8x128xf32>
    %138 = vector.extract_strided_slice %123 {offsets = [0, 384], sizes = [8, 128], strides = [1, 1]} : vector<8x512xf32> to vector<8x128xf32>
    %139 = arith.negf %138 : vector<8x128xf32>
    %140 = math.exp %139 : vector<8x128xf32>
    %cst_48 = arith.constant 1.000000e+00 : f32
    %141 = vector.broadcast %cst_48 : f32 to vector<8x128xf32>
    %142 = arith.addf %141, %140 : vector<8x128xf32>
    %143 = arith.divf %141, %142 : vector<8x128xf32>
    %144 = arith.mulf %135, %112 : vector<8x128xf32>
    %145 = arith.mulf %129, %137 : vector<8x128xf32>
    %146 = arith.addf %144, %145 : vector<8x128xf32>
    %147 = math.tanh %146 : vector<8x128xf32>
    %148 = arith.mulf %143, %147 : vector<8x128xf32>
    %149 = arith.index_cast %c3_i32 : i32 to index
    %c0_49 = arith.constant 0 : index
    %c0_50 = arith.constant 0 : index
    %150 = vector.load %arg14[%149, %c0_49, %c0_50] : memref<8x8x128xf32, #tpu.memory_space<vmem>>, vector<1x8x128xf32>
    %151 = vector.shape_cast %150 : vector<1x8x128xf32> to vector<8x128xf32>
    %152 = vector.shape_cast %148 : vector<8x128xf32> to vector<1x8x128xf32>
    tpu.vector_store %arg14[%149, %c0_49, %c0_50], %152 {strides = array<i32>} : memref<8x8x128xf32, #tpu.memory_space<vmem>>, vector<1x8x128xf32>,
    %c4_i32 = arith.constant 4 : i32
    %153 = arith.index_cast %c4_i32 : i32 to index
    %c0_51 = arith.constant 0 : index
    %c0_52 = arith.constant 0 : index
    %154 = vector.load %arg13[%153, %c0_51, %c0_52] : memref<8x8x512xf32, #tpu.memory_space<vmem>>, vector<1x8x512xf32>
    %155 = vector.shape_cast %154 : vector<1x8x512xf32> to vector<8x512xf32>
    %cst_53 = arith.constant dense<0.000000e+00> : vector<8x512xf32>
    %156 = tpu.matmul %148, %4, %cst_53 {dimension_numbers = #tpu.dot_dimension_numbers<[1], [0], [0], [1], [0, 0, 1, 1], [], []>} : vector<8x128xf32>, vector<128x512xf32>, vector<8x512xf32> -> vector<8x512xf32>
    %157 = arith.addf %155, %156 : vector<8x512xf32>
    %158 = vector.extract_strided_slice %157 {offsets = [0, 0], sizes = [8, 128], strides = [1, 1]} : vector<8x512xf32> to vector<8x128xf32>
    %159 = arith.negf %158 : vector<8x128xf32>
    %160 = math.exp %159 : vector<8x128xf32>
    %cst_54 = arith.constant 1.000000e+00 : f32
    %161 = vector.broadcast %cst_54 : f32 to vector<8x128xf32>
    %162 = arith.addf %161, %160 : vector<8x128xf32>
    %163 = arith.divf %161, %162 : vector<8x128xf32>
    %164 = vector.extract_strided_slice %157 {offsets = [0, 128], sizes = [8, 128], strides = [1, 1]} : vector<8x512xf32> to vector<8x128xf32>
    %165 = arith.negf %164 : vector<8x128xf32>
    %166 = math.exp %165 : vector<8x128xf32>
    %cst_55 = arith.constant 1.000000e+00 : f32
    %167 = vector.broadcast %cst_55 : f32 to vector<8x128xf32>
    %168 = arith.addf %167, %166 : vector<8x128xf32>
    %169 = arith.divf %167, %168 : vector<8x128xf32>
    %170 = vector.extract_strided_slice %157 {offsets = [0, 256], sizes = [8, 128], strides = [1, 1]} : vector<8x512xf32> to vector<8x128xf32>
    %171 = math.tanh %170 : vector<8x128xf32>
    %172 = vector.extract_strided_slice %157 {offsets = [0, 384], sizes = [8, 128], strides = [1, 1]} : vector<8x512xf32> to vector<8x128xf32>
    %173 = arith.negf %172 : vector<8x128xf32>
    %174 = math.exp %173 : vector<8x128xf32>
    %cst_56 = arith.constant 1.000000e+00 : f32
    %175 = vector.broadcast %cst_56 : f32 to vector<8x128xf32>
    %176 = arith.addf %175, %174 : vector<8x128xf32>
    %177 = arith.divf %175, %176 : vector<8x128xf32>
    %178 = arith.mulf %169, %146 : vector<8x128xf32>
    %179 = arith.mulf %163, %171 : vector<8x128xf32>
    %180 = arith.addf %178, %179 : vector<8x128xf32>
    %181 = math.tanh %180 : vector<8x128xf32>
    %182 = arith.mulf %177, %181 : vector<8x128xf32>
    %183 = arith.index_cast %c4_i32 : i32 to index
    %c0_57 = arith.constant 0 : index
    %c0_58 = arith.constant 0 : index
    %184 = vector.load %arg14[%183, %c0_57, %c0_58] : memref<8x8x128xf32, #tpu.memory_space<vmem>>, vector<1x8x128xf32>
    %185 = vector.shape_cast %184 : vector<1x8x128xf32> to vector<8x128xf32>
    %186 = vector.shape_cast %182 : vector<8x128xf32> to vector<1x8x128xf32>
    tpu.vector_store %arg14[%183, %c0_57, %c0_58], %186 {strides = array<i32>} : memref<8x8x128xf32, #tpu.memory_space<vmem>>, vector<1x8x128xf32>,
    %c5_i32 = arith.constant 5 : i32
    %187 = arith.index_cast %c5_i32 : i32 to index
    %c0_59 = arith.constant 0 : index
    %c0_60 = arith.constant 0 : index
    %188 = vector.load %arg13[%187, %c0_59, %c0_60] : memref<8x8x512xf32, #tpu.memory_space<vmem>>, vector<1x8x512xf32>
    %189 = vector.shape_cast %188 : vector<1x8x512xf32> to vector<8x512xf32>
    %cst_61 = arith.constant dense<0.000000e+00> : vector<8x512xf32>
    %190 = tpu.matmul %182, %4, %cst_61 {dimension_numbers = #tpu.dot_dimension_numbers<[1], [0], [0], [1], [0, 0, 1, 1], [], []>} : vector<8x128xf32>, vector<128x512xf32>, vector<8x512xf32> -> vector<8x512xf32>
    %191 = arith.addf %189, %190 : vector<8x512xf32>
    %192 = vector.extract_strided_slice %191 {offsets = [0, 0], sizes = [8, 128], strides = [1, 1]} : vector<8x512xf32> to vector<8x128xf32>
    %193 = arith.negf %192 : vector<8x128xf32>
    %194 = math.exp %193 : vector<8x128xf32>
    %cst_62 = arith.constant 1.000000e+00 : f32
    %195 = vector.broadcast %cst_62 : f32 to vector<8x128xf32>
    %196 = arith.addf %195, %194 : vector<8x128xf32>
    %197 = arith.divf %195, %196 : vector<8x128xf32>
    %198 = vector.extract_strided_slice %191 {offsets = [0, 128], sizes = [8, 128], strides = [1, 1]} : vector<8x512xf32> to vector<8x128xf32>
    %199 = arith.negf %198 : vector<8x128xf32>
    %200 = math.exp %199 : vector<8x128xf32>
    %cst_63 = arith.constant 1.000000e+00 : f32
    %201 = vector.broadcast %cst_63 : f32 to vector<8x128xf32>
    %202 = arith.addf %201, %200 : vector<8x128xf32>
    %203 = arith.divf %201, %202 : vector<8x128xf32>
    %204 = vector.extract_strided_slice %191 {offsets = [0, 256], sizes = [8, 128], strides = [1, 1]} : vector<8x512xf32> to vector<8x128xf32>
    %205 = math.tanh %204 : vector<8x128xf32>
    %206 = vector.extract_strided_slice %191 {offsets = [0, 384], sizes = [8, 128], strides = [1, 1]} : vector<8x512xf32> to vector<8x128xf32>
    %207 = arith.negf %206 : vector<8x128xf32>
    %208 = math.exp %207 : vector<8x128xf32>
    %cst_64 = arith.constant 1.000000e+00 : f32
    %209 = vector.broadcast %cst_64 : f32 to vector<8x128xf32>
    %210 = arith.addf %209, %208 : vector<8x128xf32>
    %211 = arith.divf %209, %210 : vector<8x128xf32>
    %212 = arith.mulf %203, %180 : vector<8x128xf32>
    %213 = arith.mulf %197, %205 : vector<8x128xf32>
    %214 = arith.addf %212, %213 : vector<8x128xf32>
    %215 = math.tanh %214 : vector<8x128xf32>
    %216 = arith.mulf %211, %215 : vector<8x128xf32>
    %217 = arith.index_cast %c5_i32 : i32 to index
    %c0_65 = arith.constant 0 : index
    %c0_66 = arith.constant 0 : index
    %218 = vector.load %arg14[%217, %c0_65, %c0_66] : memref<8x8x128xf32, #tpu.memory_space<vmem>>, vector<1x8x128xf32>
    %219 = vector.shape_cast %218 : vector<1x8x128xf32> to vector<8x128xf32>
    %220 = vector.shape_cast %216 : vector<8x128xf32> to vector<1x8x128xf32>
    tpu.vector_store %arg14[%217, %c0_65, %c0_66], %220 {strides = array<i32>} : memref<8x8x128xf32, #tpu.memory_space<vmem>>, vector<1x8x128xf32>,
    %c6_i32 = arith.constant 6 : i32
    %221 = arith.index_cast %c6_i32 : i32 to index
    %c0_67 = arith.constant 0 : index
    %c0_68 = arith.constant 0 : index
    %222 = vector.load %arg13[%221, %c0_67, %c0_68] : memref<8x8x512xf32, #tpu.memory_space<vmem>>, vector<1x8x512xf32>
    %223 = vector.shape_cast %222 : vector<1x8x512xf32> to vector<8x512xf32>
    %cst_69 = arith.constant dense<0.000000e+00> : vector<8x512xf32>
    %224 = tpu.matmul %216, %4, %cst_69 {dimension_numbers = #tpu.dot_dimension_numbers<[1], [0], [0], [1], [0, 0, 1, 1], [], []>} : vector<8x128xf32>, vector<128x512xf32>, vector<8x512xf32> -> vector<8x512xf32>
    %225 = arith.addf %223, %224 : vector<8x512xf32>
    %226 = vector.extract_strided_slice %225 {offsets = [0, 0], sizes = [8, 128], strides = [1, 1]} : vector<8x512xf32> to vector<8x128xf32>
    %227 = arith.negf %226 : vector<8x128xf32>
    %228 = math.exp %227 : vector<8x128xf32>
    %cst_70 = arith.constant 1.000000e+00 : f32
    %229 = vector.broadcast %cst_70 : f32 to vector<8x128xf32>
    %230 = arith.addf %229, %228 : vector<8x128xf32>
    %231 = arith.divf %229, %230 : vector<8x128xf32>
    %232 = vector.extract_strided_slice %225 {offsets = [0, 128], sizes = [8, 128], strides = [1, 1]} : vector<8x512xf32> to vector<8x128xf32>
    %233 = arith.negf %232 : vector<8x128xf32>
    %234 = math.exp %233 : vector<8x128xf32>
    %cst_71 = arith.constant 1.000000e+00 : f32
    %235 = vector.broadcast %cst_71 : f32 to vector<8x128xf32>
    %236 = arith.addf %235, %234 : vector<8x128xf32>
    %237 = arith.divf %235, %236 : vector<8x128xf32>
    %238 = vector.extract_strided_slice %225 {offsets = [0, 256], sizes = [8, 128], strides = [1, 1]} : vector<8x512xf32> to vector<8x128xf32>
    %239 = math.tanh %238 : vector<8x128xf32>
    %240 = vector.extract_strided_slice %225 {offsets = [0, 384], sizes = [8, 128], strides = [1, 1]} : vector<8x512xf32> to vector<8x128xf32>
    %241 = arith.negf %240 : vector<8x128xf32>
    %242 = math.exp %241 : vector<8x128xf32>
    %cst_72 = arith.constant 1.000000e+00 : f32
    %243 = vector.broadcast %cst_72 : f32 to vector<8x128xf32>
    %244 = arith.addf %243, %242 : vector<8x128xf32>
    %245 = arith.divf %243, %244 : vector<8x128xf32>
    %246 = arith.mulf %237, %214 : vector<8x128xf32>
    %247 = arith.mulf %231, %239 : vector<8x128xf32>
    %248 = arith.addf %246, %247 : vector<8x128xf32>
    %249 = math.tanh %248 : vector<8x128xf32>
    %250 = arith.mulf %245, %249 : vector<8x128xf32>
    %251 = arith.index_cast %c6_i32 : i32 to index
    %c0_73 = arith.constant 0 : index
    %c0_74 = arith.constant 0 : index
    %252 = vector.load %arg14[%251, %c0_73, %c0_74] : memref<8x8x128xf32, #tpu.memory_space<vmem>>, vector<1x8x128xf32>
    %253 = vector.shape_cast %252 : vector<1x8x128xf32> to vector<8x128xf32>
    %254 = vector.shape_cast %250 : vector<8x128xf32> to vector<1x8x128xf32>
    tpu.vector_store %arg14[%251, %c0_73, %c0_74], %254 {strides = array<i32>} : memref<8x8x128xf32, #tpu.memory_space<vmem>>, vector<1x8x128xf32>,
    %c7_i32 = arith.constant 7 : i32
    %255 = arith.index_cast %c7_i32 : i32 to index
    %c0_75 = arith.constant 0 : index
    %c0_76 = arith.constant 0 : index
    %256 = vector.load %arg13[%255, %c0_75, %c0_76] : memref<8x8x512xf32, #tpu.memory_space<vmem>>, vector<1x8x512xf32>
    %257 = vector.shape_cast %256 : vector<1x8x512xf32> to vector<8x512xf32>
    %cst_77 = arith.constant dense<0.000000e+00> : vector<8x512xf32>
    %258 = tpu.matmul %250, %4, %cst_77 {dimension_numbers = #tpu.dot_dimension_numbers<[1], [0], [0], [1], [0, 0, 1, 1], [], []>} : vector<8x128xf32>, vector<128x512xf32>, vector<8x512xf32> -> vector<8x512xf32>
    %259 = arith.addf %257, %258 : vector<8x512xf32>
    %260 = vector.extract_strided_slice %259 {offsets = [0, 0], sizes = [8, 128], strides = [1, 1]} : vector<8x512xf32> to vector<8x128xf32>
    %261 = arith.negf %260 : vector<8x128xf32>
    %262 = math.exp %261 : vector<8x128xf32>
    %cst_78 = arith.constant 1.000000e+00 : f32
    %263 = vector.broadcast %cst_78 : f32 to vector<8x128xf32>
    %264 = arith.addf %263, %262 : vector<8x128xf32>
    %265 = arith.divf %263, %264 : vector<8x128xf32>
    %266 = vector.extract_strided_slice %259 {offsets = [0, 128], sizes = [8, 128], strides = [1, 1]} : vector<8x512xf32> to vector<8x128xf32>
    %267 = arith.negf %266 : vector<8x128xf32>
    %268 = math.exp %267 : vector<8x128xf32>
    %cst_79 = arith.constant 1.000000e+00 : f32
    %269 = vector.broadcast %cst_79 : f32 to vector<8x128xf32>
    %270 = arith.addf %269, %268 : vector<8x128xf32>
    %271 = arith.divf %269, %270 : vector<8x128xf32>
    %272 = vector.extract_strided_slice %259 {offsets = [0, 256], sizes = [8, 128], strides = [1, 1]} : vector<8x512xf32> to vector<8x128xf32>
    %273 = math.tanh %272 : vector<8x128xf32>
    %274 = vector.extract_strided_slice %259 {offsets = [0, 384], sizes = [8, 128], strides = [1, 1]} : vector<8x512xf32> to vector<8x128xf32>
    %275 = arith.negf %274 : vector<8x128xf32>
    %276 = math.exp %275 : vector<8x128xf32>
    %cst_80 = arith.constant 1.000000e+00 : f32
    %277 = vector.broadcast %cst_80 : f32 to vector<8x128xf32>
    %278 = arith.addf %277, %276 : vector<8x128xf32>
    %279 = arith.divf %277, %278 : vector<8x128xf32>
    %280 = arith.mulf %271, %248 : vector<8x128xf32>
    %281 = arith.mulf %265, %273 : vector<8x128xf32>
    %282 = arith.addf %280, %281 : vector<8x128xf32>
    %283 = math.tanh %282 : vector<8x128xf32>
    %284 = arith.mulf %279, %283 : vector<8x128xf32>
    %285 = arith.index_cast %c7_i32 : i32 to index
    %c0_81 = arith.constant 0 : index
    %c0_82 = arith.constant 0 : index
    %286 = vector.load %arg14[%285, %c0_81, %c0_82] : memref<8x8x128xf32, #tpu.memory_space<vmem>>, vector<1x8x128xf32>
    %287 = vector.shape_cast %286 : vector<1x8x128xf32> to vector<8x128xf32>
    %288 = vector.shape_cast %284 : vector<8x128xf32> to vector<1x8x128xf32>
    tpu.vector_store %arg14[%285, %c0_81, %c0_82], %288 {strides = array<i32>} : memref<8x8x128xf32, #tpu.memory_space<vmem>>, vector<1x8x128xf32>,
    %c8_i32 = arith.constant 8 : i32
    %c0_83 = arith.constant 0 : index
    %c0_84 = arith.constant 0 : index
    %c0_85 = arith.constant 0 : index
    %289 = vector.load %arg11[%c0_83, %c0_84, %c0_85] : memref<2x8x128xf32, #tpu.memory_space<vmem>>, vector<1x8x128xf32>
    %290 = vector.shape_cast %289 : vector<1x8x128xf32> to vector<8x128xf32>
    %291 = vector.shape_cast %284 : vector<8x128xf32> to vector<1x8x128xf32>
    tpu.vector_store %arg11[%c0_83, %c0_84, %c0_85], %291 {strides = array<i32>} : memref<2x8x128xf32, #tpu.memory_space<vmem>>, vector<1x8x128xf32>,
    %c0_86 = arith.constant 0 : index
    %c0_87 = arith.constant 0 : index
    %c0_88 = arith.constant 0 : index
    %292 = vector.load %arg12[%c0_86, %c0_87, %c0_88] : memref<2x8x128xf32, #tpu.memory_space<vmem>>, vector<1x8x128xf32>
    %293 = vector.shape_cast %292 : vector<1x8x128xf32> to vector<8x128xf32>
    %294 = vector.shape_cast %282 : vector<8x128xf32> to vector<1x8x128xf32>
    tpu.vector_store %arg12[%c0_86, %c0_87, %c0_88], %294 {strides = array<i32>} : memref<2x8x128xf32, #tpu.memory_space<vmem>>, vector<1x8x128xf32>,
    %c0_89 = arith.constant 0 : index
    %c0_90 = arith.constant 0 : index
    %295 = vector.load %arg5[%c0_89, %c0_90] : memref<128x512xf32, #tpu.memory_space<vmem>>, vector<128x512xf32>
    %c0_91 = arith.constant 0 : index
    %c0_92 = arith.constant 0 : index
    %296 = vector.load %arg6[%c0_91, %c0_92] : memref<128x512xf32, #tpu.memory_space<vmem>>, vector<128x512xf32>
    %c0_93 = arith.constant 0 : index
    %c0_94 = arith.constant 0 : index
    %297 = vector.load %arg7[%c0_93, %c0_94] : memref<1x512xf32, #tpu.memory_space<vmem>>, vector<1x512xf32>
    %c0_95 = arith.constant 0 : index
    %c0_96 = arith.constant 0 : index
    %c0_97 = arith.constant 0 : index
    %298 = vector.load %arg14[%c0_95, %c0_96, %c0_97] : memref<8x8x128xf32, #tpu.memory_space<vmem>>, vector<8x8x128xf32>
    %299 = vector.shape_cast %298 : vector<8x8x128xf32> to vector<64x128xf32>
    %cst_98 = arith.constant dense<0.000000e+00> : vector<64x512xf32>
    %300 = tpu.matmul %299, %295, %cst_98 {dimension_numbers = #tpu.dot_dimension_numbers<[1], [0], [0], [1], [0, 0, 1, 1], [], []>} : vector<64x128xf32>, vector<128x512xf32>, vector<64x512xf32> -> vector<64x512xf32>
    %301 = vector.broadcast %297 : vector<1x512xf32> to vector<64x512xf32>
    %302 = arith.addf %300, %301 : vector<64x512xf32>
    %303 = vector.shape_cast %302 : vector<64x512xf32> to vector<8x8x512xf32>
    %c0_99 = arith.constant 0 : index
    %c0_100 = arith.constant 0 : index
    %c0_101 = arith.constant 0 : index
    %304 = vector.load %arg13[%c0_99, %c0_100, %c0_101] : memref<8x8x512xf32, #tpu.memory_space<vmem>>, vector<8x8x512xf32>
    tpu.vector_store %arg13[%c0_99, %c0_100, %c0_101], %303 {strides = array<i32>} : memref<8x8x512xf32, #tpu.memory_space<vmem>>, vector<8x8x512xf32>,
    %c1 = arith.constant 1 : index
    %c0_102 = arith.constant 0 : index
    %c0_103 = arith.constant 0 : index
    %305 = vector.load %arg11[%c1, %c0_102, %c0_103] : memref<2x8x128xf32, #tpu.memory_space<vmem>>, vector<1x8x128xf32>
    %306 = vector.shape_cast %305 : vector<1x8x128xf32> to vector<8x128xf32>
    %c1_104 = arith.constant 1 : index
    %c0_105 = arith.constant 0 : index
    %c0_106 = arith.constant 0 : index
    %307 = vector.load %arg12[%c1_104, %c0_105, %c0_106] : memref<2x8x128xf32, #tpu.memory_space<vmem>>, vector<1x8x128xf32>
    %308 = vector.shape_cast %307 : vector<1x8x128xf32> to vector<8x128xf32>
    %c0_i32_107 = arith.constant 0 : i32
    %309 = arith.index_cast %c0_i32_107 : i32 to index
    %c0_108 = arith.constant 0 : index
    %c0_109 = arith.constant 0 : index
    %310 = vector.load %arg13[%309, %c0_108, %c0_109] : memref<8x8x512xf32, #tpu.memory_space<vmem>>, vector<1x8x512xf32>
    %311 = vector.shape_cast %310 : vector<1x8x512xf32> to vector<8x512xf32>
    %cst_110 = arith.constant dense<0.000000e+00> : vector<8x512xf32>
    %312 = tpu.matmul %306, %296, %cst_110 {dimension_numbers = #tpu.dot_dimension_numbers<[1], [0], [0], [1], [0, 0, 1, 1], [], []>} : vector<8x128xf32>, vector<128x512xf32>, vector<8x512xf32> -> vector<8x512xf32>
    %313 = arith.addf %311, %312 : vector<8x512xf32>
    %314 = vector.extract_strided_slice %313 {offsets = [0, 0], sizes = [8, 128], strides = [1, 1]} : vector<8x512xf32> to vector<8x128xf32>
    %315 = arith.negf %314 : vector<8x128xf32>
    %316 = math.exp %315 : vector<8x128xf32>
    %cst_111 = arith.constant 1.000000e+00 : f32
    %317 = vector.broadcast %cst_111 : f32 to vector<8x128xf32>
    %318 = arith.addf %317, %316 : vector<8x128xf32>
    %319 = arith.divf %317, %318 : vector<8x128xf32>
    %320 = vector.extract_strided_slice %313 {offsets = [0, 128], sizes = [8, 128], strides = [1, 1]} : vector<8x512xf32> to vector<8x128xf32>
    %321 = arith.negf %320 : vector<8x128xf32>
    %322 = math.exp %321 : vector<8x128xf32>
    %cst_112 = arith.constant 1.000000e+00 : f32
    %323 = vector.broadcast %cst_112 : f32 to vector<8x128xf32>
    %324 = arith.addf %323, %322 : vector<8x128xf32>
    %325 = arith.divf %323, %324 : vector<8x128xf32>
    %326 = vector.extract_strided_slice %313 {offsets = [0, 256], sizes = [8, 128], strides = [1, 1]} : vector<8x512xf32> to vector<8x128xf32>
    %327 = math.tanh %326 : vector<8x128xf32>
    %328 = vector.extract_strided_slice %313 {offsets = [0, 384], sizes = [8, 128], strides = [1, 1]} : vector<8x512xf32> to vector<8x128xf32>
    %329 = arith.negf %328 : vector<8x128xf32>
    %330 = math.exp %329 : vector<8x128xf32>
    %cst_113 = arith.constant 1.000000e+00 : f32
    %331 = vector.broadcast %cst_113 : f32 to vector<8x128xf32>
    %332 = arith.addf %331, %330 : vector<8x128xf32>
    %333 = arith.divf %331, %332 : vector<8x128xf32>
    %334 = arith.mulf %325, %308 : vector<8x128xf32>
    %335 = arith.mulf %319, %327 : vector<8x128xf32>
    %336 = arith.addf %334, %335 : vector<8x128xf32>
    %337 = math.tanh %336 : vector<8x128xf32>
    %338 = arith.mulf %333, %337 : vector<8x128xf32>
    %339 = arith.index_cast %c0_i32_107 : i32 to index
    %c0_114 = arith.constant 0 : index
    %c0_115 = arith.constant 0 : index
    %340 = vector.load %arg14[%339, %c0_114, %c0_115] : memref<8x8x128xf32, #tpu.memory_space<vmem>>, vector<1x8x128xf32>
    %341 = vector.shape_cast %340 : vector<1x8x128xf32> to vector<8x128xf32>
    %342 = vector.shape_cast %338 : vector<8x128xf32> to vector<1x8x128xf32>
    tpu.vector_store %arg14[%339, %c0_114, %c0_115], %342 {strides = array<i32>} : memref<8x8x128xf32, #tpu.memory_space<vmem>>, vector<1x8x128xf32>,
    %c1_i32_116 = arith.constant 1 : i32
    %343 = arith.index_cast %c1_i32_116 : i32 to index
    %c0_117 = arith.constant 0 : index
    %c0_118 = arith.constant 0 : index
    %344 = vector.load %arg13[%343, %c0_117, %c0_118] : memref<8x8x512xf32, #tpu.memory_space<vmem>>, vector<1x8x512xf32>
    %345 = vector.shape_cast %344 : vector<1x8x512xf32> to vector<8x512xf32>
    %cst_119 = arith.constant dense<0.000000e+00> : vector<8x512xf32>
    %346 = tpu.matmul %338, %296, %cst_119 {dimension_numbers = #tpu.dot_dimension_numbers<[1], [0], [0], [1], [0, 0, 1, 1], [], []>} : vector<8x128xf32>, vector<128x512xf32>, vector<8x512xf32> -> vector<8x512xf32>
    %347 = arith.addf %345, %346 : vector<8x512xf32>
    %348 = vector.extract_strided_slice %347 {offsets = [0, 0], sizes = [8, 128], strides = [1, 1]} : vector<8x512xf32> to vector<8x128xf32>
    %349 = arith.negf %348 : vector<8x128xf32>
    %350 = math.exp %349 : vector<8x128xf32>
    %cst_120 = arith.constant 1.000000e+00 : f32
    %351 = vector.broadcast %cst_120 : f32 to vector<8x128xf32>
    %352 = arith.addf %351, %350 : vector<8x128xf32>
    %353 = arith.divf %351, %352 : vector<8x128xf32>
    %354 = vector.extract_strided_slice %347 {offsets = [0, 128], sizes = [8, 128], strides = [1, 1]} : vector<8x512xf32> to vector<8x128xf32>
    %355 = arith.negf %354 : vector<8x128xf32>
    %356 = math.exp %355 : vector<8x128xf32>
    %cst_121 = arith.constant 1.000000e+00 : f32
    %357 = vector.broadcast %cst_121 : f32 to vector<8x128xf32>
    %358 = arith.addf %357, %356 : vector<8x128xf32>
    %359 = arith.divf %357, %358 : vector<8x128xf32>
    %360 = vector.extract_strided_slice %347 {offsets = [0, 256], sizes = [8, 128], strides = [1, 1]} : vector<8x512xf32> to vector<8x128xf32>
    %361 = math.tanh %360 : vector<8x128xf32>
    %362 = vector.extract_strided_slice %347 {offsets = [0, 384], sizes = [8, 128], strides = [1, 1]} : vector<8x512xf32> to vector<8x128xf32>
    %363 = arith.negf %362 : vector<8x128xf32>
    %364 = math.exp %363 : vector<8x128xf32>
    %cst_122 = arith.constant 1.000000e+00 : f32
    %365 = vector.broadcast %cst_122 : f32 to vector<8x128xf32>
    %366 = arith.addf %365, %364 : vector<8x128xf32>
    %367 = arith.divf %365, %366 : vector<8x128xf32>
    %368 = arith.mulf %359, %336 : vector<8x128xf32>
    %369 = arith.mulf %353, %361 : vector<8x128xf32>
    %370 = arith.addf %368, %369 : vector<8x128xf32>
    %371 = math.tanh %370 : vector<8x128xf32>
    %372 = arith.mulf %367, %371 : vector<8x128xf32>
    %373 = arith.index_cast %c1_i32_116 : i32 to index
    %c0_123 = arith.constant 0 : index
    %c0_124 = arith.constant 0 : index
    %374 = vector.load %arg14[%373, %c0_123, %c0_124] : memref<8x8x128xf32, #tpu.memory_space<vmem>>, vector<1x8x128xf32>
    %375 = vector.shape_cast %374 : vector<1x8x128xf32> to vector<8x128xf32>
    %376 = vector.shape_cast %372 : vector<8x128xf32> to vector<1x8x128xf32>
    tpu.vector_store %arg14[%373, %c0_123, %c0_124], %376 {strides = array<i32>} : memref<8x8x128xf32, #tpu.memory_space<vmem>>, vector<1x8x128xf32>,
    %c2_i32_125 = arith.constant 2 : i32
    %377 = arith.index_cast %c2_i32_125 : i32 to index
    %c0_126 = arith.constant 0 : index
    %c0_127 = arith.constant 0 : index
    %378 = vector.load %arg13[%377, %c0_126, %c0_127] : memref<8x8x512xf32, #tpu.memory_space<vmem>>, vector<1x8x512xf32>
    %379 = vector.shape_cast %378 : vector<1x8x512xf32> to vector<8x512xf32>
    %cst_128 = arith.constant dense<0.000000e+00> : vector<8x512xf32>
    %380 = tpu.matmul %372, %296, %cst_128 {dimension_numbers = #tpu.dot_dimension_numbers<[1], [0], [0], [1], [0, 0, 1, 1], [], []>} : vector<8x128xf32>, vector<128x512xf32>, vector<8x512xf32> -> vector<8x512xf32>
    %381 = arith.addf %379, %380 : vector<8x512xf32>
    %382 = vector.extract_strided_slice %381 {offsets = [0, 0], sizes = [8, 128], strides = [1, 1]} : vector<8x512xf32> to vector<8x128xf32>
    %383 = arith.negf %382 : vector<8x128xf32>
    %384 = math.exp %383 : vector<8x128xf32>
    %cst_129 = arith.constant 1.000000e+00 : f32
    %385 = vector.broadcast %cst_129 : f32 to vector<8x128xf32>
    %386 = arith.addf %385, %384 : vector<8x128xf32>
    %387 = arith.divf %385, %386 : vector<8x128xf32>
    %388 = vector.extract_strided_slice %381 {offsets = [0, 128], sizes = [8, 128], strides = [1, 1]} : vector<8x512xf32> to vector<8x128xf32>
    %389 = arith.negf %388 : vector<8x128xf32>
    %390 = math.exp %389 : vector<8x128xf32>
    %cst_130 = arith.constant 1.000000e+00 : f32
    %391 = vector.broadcast %cst_130 : f32 to vector<8x128xf32>
    %392 = arith.addf %391, %390 : vector<8x128xf32>
    %393 = arith.divf %391, %392 : vector<8x128xf32>
    %394 = vector.extract_strided_slice %381 {offsets = [0, 256], sizes = [8, 128], strides = [1, 1]} : vector<8x512xf32> to vector<8x128xf32>
    %395 = math.tanh %394 : vector<8x128xf32>
    %396 = vector.extract_strided_slice %381 {offsets = [0, 384], sizes = [8, 128], strides = [1, 1]} : vector<8x512xf32> to vector<8x128xf32>
    %397 = arith.negf %396 : vector<8x128xf32>
    %398 = math.exp %397 : vector<8x128xf32>
    %cst_131 = arith.constant 1.000000e+00 : f32
    %399 = vector.broadcast %cst_131 : f32 to vector<8x128xf32>
    %400 = arith.addf %399, %398 : vector<8x128xf32>
    %401 = arith.divf %399, %400 : vector<8x128xf32>
    %402 = arith.mulf %393, %370 : vector<8x128xf32>
    %403 = arith.mulf %387, %395 : vector<8x128xf32>
    %404 = arith.addf %402, %403 : vector<8x128xf32>
    %405 = math.tanh %404 : vector<8x128xf32>
    %406 = arith.mulf %401, %405 : vector<8x128xf32>
    %407 = arith.index_cast %c2_i32_125 : i32 to index
    %c0_132 = arith.constant 0 : index
    %c0_133 = arith.constant 0 : index
    %408 = vector.load %arg14[%407, %c0_132, %c0_133] : memref<8x8x128xf32, #tpu.memory_space<vmem>>, vector<1x8x128xf32>
    %409 = vector.shape_cast %408 : vector<1x8x128xf32> to vector<8x128xf32>
    %410 = vector.shape_cast %406 : vector<8x128xf32> to vector<1x8x128xf32>
    tpu.vector_store %arg14[%407, %c0_132, %c0_133], %410 {strides = array<i32>} : memref<8x8x128xf32, #tpu.memory_space<vmem>>, vector<1x8x128xf32>,
    %c3_i32_134 = arith.constant 3 : i32
    %411 = arith.index_cast %c3_i32_134 : i32 to index
    %c0_135 = arith.constant 0 : index
    %c0_136 = arith.constant 0 : index
    %412 = vector.load %arg13[%411, %c0_135, %c0_136] : memref<8x8x512xf32, #tpu.memory_space<vmem>>, vector<1x8x512xf32>
    %413 = vector.shape_cast %412 : vector<1x8x512xf32> to vector<8x512xf32>
    %cst_137 = arith.constant dense<0.000000e+00> : vector<8x512xf32>
    %414 = tpu.matmul %406, %296, %cst_137 {dimension_numbers = #tpu.dot_dimension_numbers<[1], [0], [0], [1], [0, 0, 1, 1], [], []>} : vector<8x128xf32>, vector<128x512xf32>, vector<8x512xf32> -> vector<8x512xf32>
    %415 = arith.addf %413, %414 : vector<8x512xf32>
    %416 = vector.extract_strided_slice %415 {offsets = [0, 0], sizes = [8, 128], strides = [1, 1]} : vector<8x512xf32> to vector<8x128xf32>
    %417 = arith.negf %416 : vector<8x128xf32>
    %418 = math.exp %417 : vector<8x128xf32>
    %cst_138 = arith.constant 1.000000e+00 : f32
    %419 = vector.broadcast %cst_138 : f32 to vector<8x128xf32>
    %420 = arith.addf %419, %418 : vector<8x128xf32>
    %421 = arith.divf %419, %420 : vector<8x128xf32>
    %422 = vector.extract_strided_slice %415 {offsets = [0, 128], sizes = [8, 128], strides = [1, 1]} : vector<8x512xf32> to vector<8x128xf32>
    %423 = arith.negf %422 : vector<8x128xf32>
    %424 = math.exp %423 : vector<8x128xf32>
    %cst_139 = arith.constant 1.000000e+00 : f32
    %425 = vector.broadcast %cst_139 : f32 to vector<8x128xf32>
    %426 = arith.addf %425, %424 : vector<8x128xf32>
    %427 = arith.divf %425, %426 : vector<8x128xf32>
    %428 = vector.extract_strided_slice %415 {offsets = [0, 256], sizes = [8, 128], strides = [1, 1]} : vector<8x512xf32> to vector<8x128xf32>
    %429 = math.tanh %428 : vector<8x128xf32>
    %430 = vector.extract_strided_slice %415 {offsets = [0, 384], sizes = [8, 128], strides = [1, 1]} : vector<8x512xf32> to vector<8x128xf32>
    %431 = arith.negf %430 : vector<8x128xf32>
    %432 = math.exp %431 : vector<8x128xf32>
    %cst_140 = arith.constant 1.000000e+00 : f32
    %433 = vector.broadcast %cst_140 : f32 to vector<8x128xf32>
    %434 = arith.addf %433, %432 : vector<8x128xf32>
    %435 = arith.divf %433, %434 : vector<8x128xf32>
    %436 = arith.mulf %427, %404 : vector<8x128xf32>
    %437 = arith.mulf %421, %429 : vector<8x128xf32>
    %438 = arith.addf %436, %437 : vector<8x128xf32>
    %439 = math.tanh %438 : vector<8x128xf32>
    %440 = arith.mulf %435, %439 : vector<8x128xf32>
    %441 = arith.index_cast %c3_i32_134 : i32 to index
    %c0_141 = arith.constant 0 : index
    %c0_142 = arith.constant 0 : index
    %442 = vector.load %arg14[%441, %c0_141, %c0_142] : memref<8x8x128xf32, #tpu.memory_space<vmem>>, vector<1x8x128xf32>
    %443 = vector.shape_cast %442 : vector<1x8x128xf32> to vector<8x128xf32>
    %444 = vector.shape_cast %440 : vector<8x128xf32> to vector<1x8x128xf32>
    tpu.vector_store %arg14[%441, %c0_141, %c0_142], %444 {strides = array<i32>} : memref<8x8x128xf32, #tpu.memory_space<vmem>>, vector<1x8x128xf32>,
    %c4_i32_143 = arith.constant 4 : i32
    %445 = arith.index_cast %c4_i32_143 : i32 to index
    %c0_144 = arith.constant 0 : index
    %c0_145 = arith.constant 0 : index
    %446 = vector.load %arg13[%445, %c0_144, %c0_145] : memref<8x8x512xf32, #tpu.memory_space<vmem>>, vector<1x8x512xf32>
    %447 = vector.shape_cast %446 : vector<1x8x512xf32> to vector<8x512xf32>
    %cst_146 = arith.constant dense<0.000000e+00> : vector<8x512xf32>
    %448 = tpu.matmul %440, %296, %cst_146 {dimension_numbers = #tpu.dot_dimension_numbers<[1], [0], [0], [1], [0, 0, 1, 1], [], []>} : vector<8x128xf32>, vector<128x512xf32>, vector<8x512xf32> -> vector<8x512xf32>
    %449 = arith.addf %447, %448 : vector<8x512xf32>
    %450 = vector.extract_strided_slice %449 {offsets = [0, 0], sizes = [8, 128], strides = [1, 1]} : vector<8x512xf32> to vector<8x128xf32>
    %451 = arith.negf %450 : vector<8x128xf32>
    %452 = math.exp %451 : vector<8x128xf32>
    %cst_147 = arith.constant 1.000000e+00 : f32
    %453 = vector.broadcast %cst_147 : f32 to vector<8x128xf32>
    %454 = arith.addf %453, %452 : vector<8x128xf32>
    %455 = arith.divf %453, %454 : vector<8x128xf32>
    %456 = vector.extract_strided_slice %449 {offsets = [0, 128], sizes = [8, 128], strides = [1, 1]} : vector<8x512xf32> to vector<8x128xf32>
    %457 = arith.negf %456 : vector<8x128xf32>
    %458 = math.exp %457 : vector<8x128xf32>
    %cst_148 = arith.constant 1.000000e+00 : f32
    %459 = vector.broadcast %cst_148 : f32 to vector<8x128xf32>
    %460 = arith.addf %459, %458 : vector<8x128xf32>
    %461 = arith.divf %459, %460 : vector<8x128xf32>
    %462 = vector.extract_strided_slice %449 {offsets = [0, 256], sizes = [8, 128], strides = [1, 1]} : vector<8x512xf32> to vector<8x128xf32>
    %463 = math.tanh %462 : vector<8x128xf32>
    %464 = vector.extract_strided_slice %449 {offsets = [0, 384], sizes = [8, 128], strides = [1, 1]} : vector<8x512xf32> to vector<8x128xf32>
    %465 = arith.negf %464 : vector<8x128xf32>
    %466 = math.exp %465 : vector<8x128xf32>
    %cst_149 = arith.constant 1.000000e+00 : f32
    %467 = vector.broadcast %cst_149 : f32 to vector<8x128xf32>
    %468 = arith.addf %467, %466 : vector<8x128xf32>
    %469 = arith.divf %467, %468 : vector<8x128xf32>
    %470 = arith.mulf %461, %438 : vector<8x128xf32>
    %471 = arith.mulf %455, %463 : vector<8x128xf32>
    %472 = arith.addf %470, %471 : vector<8x128xf32>
    %473 = math.tanh %472 : vector<8x128xf32>
    %474 = arith.mulf %469, %473 : vector<8x128xf32>
    %475 = arith.index_cast %c4_i32_143 : i32 to index
    %c0_150 = arith.constant 0 : index
    %c0_151 = arith.constant 0 : index
    %476 = vector.load %arg14[%475, %c0_150, %c0_151] : memref<8x8x128xf32, #tpu.memory_space<vmem>>, vector<1x8x128xf32>
    %477 = vector.shape_cast %476 : vector<1x8x128xf32> to vector<8x128xf32>
    %478 = vector.shape_cast %474 : vector<8x128xf32> to vector<1x8x128xf32>
    tpu.vector_store %arg14[%475, %c0_150, %c0_151], %478 {strides = array<i32>} : memref<8x8x128xf32, #tpu.memory_space<vmem>>, vector<1x8x128xf32>,
    %c5_i32_152 = arith.constant 5 : i32
    %479 = arith.index_cast %c5_i32_152 : i32 to index
    %c0_153 = arith.constant 0 : index
    %c0_154 = arith.constant 0 : index
    %480 = vector.load %arg13[%479, %c0_153, %c0_154] : memref<8x8x512xf32, #tpu.memory_space<vmem>>, vector<1x8x512xf32>
    %481 = vector.shape_cast %480 : vector<1x8x512xf32> to vector<8x512xf32>
    %cst_155 = arith.constant dense<0.000000e+00> : vector<8x512xf32>
    %482 = tpu.matmul %474, %296, %cst_155 {dimension_numbers = #tpu.dot_dimension_numbers<[1], [0], [0], [1], [0, 0, 1, 1], [], []>} : vector<8x128xf32>, vector<128x512xf32>, vector<8x512xf32> -> vector<8x512xf32>
    %483 = arith.addf %481, %482 : vector<8x512xf32>
    %484 = vector.extract_strided_slice %483 {offsets = [0, 0], sizes = [8, 128], strides = [1, 1]} : vector<8x512xf32> to vector<8x128xf32>
    %485 = arith.negf %484 : vector<8x128xf32>
    %486 = math.exp %485 : vector<8x128xf32>
    %cst_156 = arith.constant 1.000000e+00 : f32
    %487 = vector.broadcast %cst_156 : f32 to vector<8x128xf32>
    %488 = arith.addf %487, %486 : vector<8x128xf32>
    %489 = arith.divf %487, %488 : vector<8x128xf32>
    %490 = vector.extract_strided_slice %483 {offsets = [0, 128], sizes = [8, 128], strides = [1, 1]} : vector<8x512xf32> to vector<8x128xf32>
    %491 = arith.negf %490 : vector<8x128xf32>
    %492 = math.exp %491 : vector<8x128xf32>
    %cst_157 = arith.constant 1.000000e+00 : f32
    %493 = vector.broadcast %cst_157 : f32 to vector<8x128xf32>
    %494 = arith.addf %493, %492 : vector<8x128xf32>
    %495 = arith.divf %493, %494 : vector<8x128xf32>
    %496 = vector.extract_strided_slice %483 {offsets = [0, 256], sizes = [8, 128], strides = [1, 1]} : vector<8x512xf32> to vector<8x128xf32>
    %497 = math.tanh %496 : vector<8x128xf32>
    %498 = vector.extract_strided_slice %483 {offsets = [0, 384], sizes = [8, 128], strides = [1, 1]} : vector<8x512xf32> to vector<8x128xf32>
    %499 = arith.negf %498 : vector<8x128xf32>
    %500 = math.exp %499 : vector<8x128xf32>
    %cst_158 = arith.constant 1.000000e+00 : f32
    %501 = vector.broadcast %cst_158 : f32 to vector<8x128xf32>
    %502 = arith.addf %501, %500 : vector<8x128xf32>
    %503 = arith.divf %501, %502 : vector<8x128xf32>
    %504 = arith.mulf %495, %472 : vector<8x128xf32>
    %505 = arith.mulf %489, %497 : vector<8x128xf32>
    %506 = arith.addf %504, %505 : vector<8x128xf32>
    %507 = math.tanh %506 : vector<8x128xf32>
    %508 = arith.mulf %503, %507 : vector<8x128xf32>
    %509 = arith.index_cast %c5_i32_152 : i32 to index
    %c0_159 = arith.constant 0 : index
    %c0_160 = arith.constant 0 : index
    %510 = vector.load %arg14[%509, %c0_159, %c0_160] : memref<8x8x128xf32, #tpu.memory_space<vmem>>, vector<1x8x128xf32>
    %511 = vector.shape_cast %510 : vector<1x8x128xf32> to vector<8x128xf32>
    %512 = vector.shape_cast %508 : vector<8x128xf32> to vector<1x8x128xf32>
    tpu.vector_store %arg14[%509, %c0_159, %c0_160], %512 {strides = array<i32>} : memref<8x8x128xf32, #tpu.memory_space<vmem>>, vector<1x8x128xf32>,
    %c6_i32_161 = arith.constant 6 : i32
    %513 = arith.index_cast %c6_i32_161 : i32 to index
    %c0_162 = arith.constant 0 : index
    %c0_163 = arith.constant 0 : index
    %514 = vector.load %arg13[%513, %c0_162, %c0_163] : memref<8x8x512xf32, #tpu.memory_space<vmem>>, vector<1x8x512xf32>
    %515 = vector.shape_cast %514 : vector<1x8x512xf32> to vector<8x512xf32>
    %cst_164 = arith.constant dense<0.000000e+00> : vector<8x512xf32>
    %516 = tpu.matmul %508, %296, %cst_164 {dimension_numbers = #tpu.dot_dimension_numbers<[1], [0], [0], [1], [0, 0, 1, 1], [], []>} : vector<8x128xf32>, vector<128x512xf32>, vector<8x512xf32> -> vector<8x512xf32>
    %517 = arith.addf %515, %516 : vector<8x512xf32>
    %518 = vector.extract_strided_slice %517 {offsets = [0, 0], sizes = [8, 128], strides = [1, 1]} : vector<8x512xf32> to vector<8x128xf32>
    %519 = arith.negf %518 : vector<8x128xf32>
    %520 = math.exp %519 : vector<8x128xf32>
    %cst_165 = arith.constant 1.000000e+00 : f32
    %521 = vector.broadcast %cst_165 : f32 to vector<8x128xf32>
    %522 = arith.addf %521, %520 : vector<8x128xf32>
    %523 = arith.divf %521, %522 : vector<8x128xf32>
    %524 = vector.extract_strided_slice %517 {offsets = [0, 128], sizes = [8, 128], strides = [1, 1]} : vector<8x512xf32> to vector<8x128xf32>
    %525 = arith.negf %524 : vector<8x128xf32>
    %526 = math.exp %525 : vector<8x128xf32>
    %cst_166 = arith.constant 1.000000e+00 : f32
    %527 = vector.broadcast %cst_166 : f32 to vector<8x128xf32>
    %528 = arith.addf %527, %526 : vector<8x128xf32>
    %529 = arith.divf %527, %528 : vector<8x128xf32>
    %530 = vector.extract_strided_slice %517 {offsets = [0, 256], sizes = [8, 128], strides = [1, 1]} : vector<8x512xf32> to vector<8x128xf32>
    %531 = math.tanh %530 : vector<8x128xf32>
    %532 = vector.extract_strided_slice %517 {offsets = [0, 384], sizes = [8, 128], strides = [1, 1]} : vector<8x512xf32> to vector<8x128xf32>
    %533 = arith.negf %532 : vector<8x128xf32>
    %534 = math.exp %533 : vector<8x128xf32>
    %cst_167 = arith.constant 1.000000e+00 : f32
    %535 = vector.broadcast %cst_167 : f32 to vector<8x128xf32>
    %536 = arith.addf %535, %534 : vector<8x128xf32>
    %537 = arith.divf %535, %536 : vector<8x128xf32>
    %538 = arith.mulf %529, %506 : vector<8x128xf32>
    %539 = arith.mulf %523, %531 : vector<8x128xf32>
    %540 = arith.addf %538, %539 : vector<8x128xf32>
    %541 = math.tanh %540 : vector<8x128xf32>
    %542 = arith.mulf %537, %541 : vector<8x128xf32>
    %543 = arith.index_cast %c6_i32_161 : i32 to index
    %c0_168 = arith.constant 0 : index
    %c0_169 = arith.constant 0 : index
    %544 = vector.load %arg14[%543, %c0_168, %c0_169] : memref<8x8x128xf32, #tpu.memory_space<vmem>>, vector<1x8x128xf32>
    %545 = vector.shape_cast %544 : vector<1x8x128xf32> to vector<8x128xf32>
    %546 = vector.shape_cast %542 : vector<8x128xf32> to vector<1x8x128xf32>
    tpu.vector_store %arg14[%543, %c0_168, %c0_169], %546 {strides = array<i32>} : memref<8x8x128xf32, #tpu.memory_space<vmem>>, vector<1x8x128xf32>,
    %c7_i32_170 = arith.constant 7 : i32
    %547 = arith.index_cast %c7_i32_170 : i32 to index
    %c0_171 = arith.constant 0 : index
    %c0_172 = arith.constant 0 : index
    %548 = vector.load %arg13[%547, %c0_171, %c0_172] : memref<8x8x512xf32, #tpu.memory_space<vmem>>, vector<1x8x512xf32>
    %549 = vector.shape_cast %548 : vector<1x8x512xf32> to vector<8x512xf32>
    %cst_173 = arith.constant dense<0.000000e+00> : vector<8x512xf32>
    %550 = tpu.matmul %542, %296, %cst_173 {dimension_numbers = #tpu.dot_dimension_numbers<[1], [0], [0], [1], [0, 0, 1, 1], [], []>} : vector<8x128xf32>, vector<128x512xf32>, vector<8x512xf32> -> vector<8x512xf32>
    %551 = arith.addf %549, %550 : vector<8x512xf32>
    %552 = vector.extract_strided_slice %551 {offsets = [0, 0], sizes = [8, 128], strides = [1, 1]} : vector<8x512xf32> to vector<8x128xf32>
    %553 = arith.negf %552 : vector<8x128xf32>
    %554 = math.exp %553 : vector<8x128xf32>
    %cst_174 = arith.constant 1.000000e+00 : f32
    %555 = vector.broadcast %cst_174 : f32 to vector<8x128xf32>
    %556 = arith.addf %555, %554 : vector<8x128xf32>
    %557 = arith.divf %555, %556 : vector<8x128xf32>
    %558 = vector.extract_strided_slice %551 {offsets = [0, 128], sizes = [8, 128], strides = [1, 1]} : vector<8x512xf32> to vector<8x128xf32>
    %559 = arith.negf %558 : vector<8x128xf32>
    %560 = math.exp %559 : vector<8x128xf32>
    %cst_175 = arith.constant 1.000000e+00 : f32
    %561 = vector.broadcast %cst_175 : f32 to vector<8x128xf32>
    %562 = arith.addf %561, %560 : vector<8x128xf32>
    %563 = arith.divf %561, %562 : vector<8x128xf32>
    %564 = vector.extract_strided_slice %551 {offsets = [0, 256], sizes = [8, 128], strides = [1, 1]} : vector<8x512xf32> to vector<8x128xf32>
    %565 = math.tanh %564 : vector<8x128xf32>
    %566 = vector.extract_strided_slice %551 {offsets = [0, 384], sizes = [8, 128], strides = [1, 1]} : vector<8x512xf32> to vector<8x128xf32>
    %567 = arith.negf %566 : vector<8x128xf32>
    %568 = math.exp %567 : vector<8x128xf32>
    %cst_176 = arith.constant 1.000000e+00 : f32
    %569 = vector.broadcast %cst_176 : f32 to vector<8x128xf32>
    %570 = arith.addf %569, %568 : vector<8x128xf32>
    %571 = arith.divf %569, %570 : vector<8x128xf32>
    %572 = arith.mulf %563, %540 : vector<8x128xf32>
    %573 = arith.mulf %557, %565 : vector<8x128xf32>
    %574 = arith.addf %572, %573 : vector<8x128xf32>
    %575 = math.tanh %574 : vector<8x128xf32>
    %576 = arith.mulf %571, %575 : vector<8x128xf32>
    %577 = arith.index_cast %c7_i32_170 : i32 to index
    %c0_177 = arith.constant 0 : index
    %c0_178 = arith.constant 0 : index
    %578 = vector.load %arg14[%577, %c0_177, %c0_178] : memref<8x8x128xf32, #tpu.memory_space<vmem>>, vector<1x8x128xf32>
    %579 = vector.shape_cast %578 : vector<1x8x128xf32> to vector<8x128xf32>
    %580 = vector.shape_cast %576 : vector<8x128xf32> to vector<1x8x128xf32>
    tpu.vector_store %arg14[%577, %c0_177, %c0_178], %580 {strides = array<i32>} : memref<8x8x128xf32, #tpu.memory_space<vmem>>, vector<1x8x128xf32>,
    %c8_i32_179 = arith.constant 8 : i32
    %c1_180 = arith.constant 1 : index
    %c0_181 = arith.constant 0 : index
    %c0_182 = arith.constant 0 : index
    %581 = vector.load %arg11[%c1_180, %c0_181, %c0_182] : memref<2x8x128xf32, #tpu.memory_space<vmem>>, vector<1x8x128xf32>
    %582 = vector.shape_cast %581 : vector<1x8x128xf32> to vector<8x128xf32>
    %583 = vector.shape_cast %576 : vector<8x128xf32> to vector<1x8x128xf32>
    tpu.vector_store %arg11[%c1_180, %c0_181, %c0_182], %583 {strides = array<i32>} : memref<2x8x128xf32, #tpu.memory_space<vmem>>, vector<1x8x128xf32>,
    %c1_183 = arith.constant 1 : index
    %c0_184 = arith.constant 0 : index
    %c0_185 = arith.constant 0 : index
    %584 = vector.load %arg12[%c1_183, %c0_184, %c0_185] : memref<2x8x128xf32, #tpu.memory_space<vmem>>, vector<1x8x128xf32>
    %585 = vector.shape_cast %584 : vector<1x8x128xf32> to vector<8x128xf32>
    %586 = vector.shape_cast %574 : vector<8x128xf32> to vector<1x8x128xf32>
    tpu.vector_store %arg12[%c1_183, %c0_184, %c0_185], %586 {strides = array<i32>} : memref<2x8x128xf32, #tpu.memory_space<vmem>>, vector<1x8x128xf32>,
    %c0_186 = arith.constant 0 : index
    %c0_187 = arith.constant 0 : index
    %587 = vector.load %arg8[%c0_186, %c0_187] : memref<128x128xf32, #tpu.memory_space<vmem>>, vector<128x128xf32>
    %c0_188 = arith.constant 0 : index
    %c0_189 = arith.constant 0 : index
    %c0_190 = arith.constant 0 : index
    %588 = vector.load %arg14[%c0_188, %c0_189, %c0_190] : memref<8x8x128xf32, #tpu.memory_space<vmem>>, vector<8x8x128xf32>
    %589 = vector.shape_cast %588 : vector<8x8x128xf32> to vector<64x128xf32>
    %cst_191 = arith.constant dense<0.000000e+00> : vector<64x128xf32>
    %590 = tpu.matmul %589, %587, %cst_191 {dimension_numbers = #tpu.dot_dimension_numbers<[1], [0], [0], [1], [0, 0, 1, 1], [], []>} : vector<64x128xf32>, vector<128x128xf32>, vector<64x128xf32> -> vector<64x128xf32>
    %c0_192 = arith.constant 0 : index
    %c0_193 = arith.constant 0 : index
    %591 = vector.load %arg9[%c0_192, %c0_193] : memref<1x128xf32, #tpu.memory_space<vmem>>, vector<1x128xf32>
    %592 = vector.broadcast %591 : vector<1x128xf32> to vector<64x128xf32>
    %593 = arith.addf %590, %592 : vector<64x128xf32>
    %594 = vector.shape_cast %593 : vector<64x128xf32> to vector<8x8x128xf32>
    %c0_194 = arith.constant 0 : index
    %c0_195 = arith.constant 0 : index
    %c0_196 = arith.constant 0 : index
    %595 = vector.load %arg10[%c0_194, %c0_195, %c0_196] : memref<8x8x128xf32, #tpu.memory_space<vmem>>, vector<8x8x128xf32>
    tpu.vector_store %arg10[%c0_194, %c0_195, %c0_196], %594 {strides = array<i32>} : memref<8x8x128xf32, #tpu.memory_space<vmem>>, vector<8x8x128xf32>,
    return
  }
  func.func @transform_0(%arg0: i32) -> (i32, i32, i32) {
    %c0_i32 = arith.constant 0 : i32
    %c0_i32_0 = arith.constant 0 : i32
    %c0_i32_1 = arith.constant 0 : i32
    return %arg0, %c0_i32, %c0_i32_0 : i32, i32, i32
  }
  func.func @transform_1(%arg0: i32) -> (i32, i32) {
    %c0_i32 = arith.constant 0 : i32
    %c0_i32_0 = arith.constant 0 : i32
    %c0_i32_1 = arith.constant 0 : i32
    return %c0_i32, %c0_i32_0 : i32, i32
  }
  func.func @transform_2(%arg0: i32) -> (i32, i32) {
    %c0_i32 = arith.constant 0 : i32
    %c0_i32_0 = arith.constant 0 : i32
    %c0_i32_1 = arith.constant 0 : i32
    return %c0_i32, %c0_i32_0 : i32, i32
  }
  func.func @transform_3(%arg0: i32) -> (i32, i32) {
    %c0_i32 = arith.constant 0 : i32
    %c0_i32_0 = arith.constant 0 : i32
    %c0_i32_1 = arith.constant 0 : i32
    return %c0_i32, %c0_i32_0 : i32, i32
  }
  func.func @transform_4(%arg0: i32) -> (i32, i32) {
    %c0_i32 = arith.constant 0 : i32
    %c0_i32_0 = arith.constant 0 : i32
    %c0_i32_1 = arith.constant 0 : i32
    return %c0_i32, %c0_i32_0 : i32, i32
  }
  func.func @transform_5(%arg0: i32) -> (i32, i32) {
    %c0_i32 = arith.constant 0 : i32
    %c0_i32_0 = arith.constant 0 : i32
    %c0_i32_1 = arith.constant 0 : i32
    return %c0_i32, %c0_i32_0 : i32, i32
  }
  func.func @transform_6(%arg0: i32) -> (i32, i32) {
    %c0_i32 = arith.constant 0 : i32
    %c0_i32_0 = arith.constant 0 : i32
    %c0_i32_1 = arith.constant 0 : i32
    return %c0_i32, %c0_i32_0 : i32, i32
  }
  func.func @transform_7(%arg0: i32) -> (i32, i32) {
    %c0_i32 = arith.constant 0 : i32
    %c0_i32_0 = arith.constant 0 : i32
    %c0_i32_1 = arith.constant 0 : i32
    return %c0_i32, %c0_i32_0 : i32, i32
  }
  func.func @transform_8(%arg0: i32) -> (i32, i32) {
    %c0_i32 = arith.constant 0 : i32
    %c0_i32_0 = arith.constant 0 : i32
    %c0_i32_1 = arith.constant 0 : i32
    return %c0_i32, %c0_i32_0 : i32, i32
  }
  func.func @transform_9(%arg0: i32) -> (i32, i32, i32) {
    %c0_i32 = arith.constant 0 : i32
    %c0_i32_0 = arith.constant 0 : i32
    %c0_i32_1 = arith.constant 0 : i32
    return %arg0, %c0_i32, %c0_i32_0 : i32, i32, i32
  }
}

</mosaic_0001>

<bundles_post_ra>
// kernel: lstm_forward.1
= control target key start
LH: loop header
LB: loop body
LE: loop exit
PB: predicated region body
PF: predicated region fallthrough
CT: control target
= control target key end

     0   :  { %14 = vsyncpa [#allocation7], 0  ;;  %s6670_s0 = inlined_call_operand.vmem [shape: f32[8,8,128], index: 0, kind: input, shape index: {}]   ;;  %s6671_s1 = inlined_call_operand.hbm [shape: f32[128,512], index: 1, kind: input, shape index: {}]   ;;  %s6672_s2 = inlined_call_operand.hbm [shape: f32[128,512], index: 2, kind: input, shape index: {}]   ;;  %s6673_s3 = inlined_call_operand.vmem [shape: f32[1,512], index: 3, kind: input, shape index: {}]   ;;  %s6674_s4 = inlined_call_operand.hbm [shape: f32[128,512], index: 4, kind: input, shape index: {}]   ;;  %s6675_s5 = inlined_call_operand.hbm [shape: f32[128,512], index: 5, kind: input, shape index: {}]   ;;  %s6676_s6 = inlined_call_operand.vmem [shape: f32[1,512], index: 6, kind: input, shape index: {}]   ;;  %s6677_s7 = inlined_call_operand.hbm [shape: f32[128,128], index: 7, kind: input, shape index: {}]   ;;  %s6678_s8 = inlined_call_operand.vmem [shape: f32[1,128], index: 8, kind: input, shape index: {}]   ;;  %s6679_s9 = inlined_call_operand.vmem [shape: f32[8,8,128], index: 9, kind: output, shape index: {}]  }
   0x1   :  { %15 = vsyncpa [#allocation9], 0 }
   0x2   :  { %16 = vsyncpa [#allocation12], 0  ;;  %s4532_s30 = smov [#allocation8]   ;;  %s4533_s11 = smov [#allocation11]  }
   0x3   :  { %s36_s10 = sshll.u32 %s4532_s30, 4  ;;  %s62_s12 = sshll.u32 %s4533_s11, 4  ;;  %s37_s10 = int_to_ptr.vmem [resolvable:$true] %s36_s10  ;;  %s63_s12 = int_to_ptr.vmem [resolvable:$true] %s62_s12 }
   0x4   :  { %s4434_s13 = scalar_lea.vmem %s37_s10, 8192  ;;  %p4439_p1 = scmp.lt.s32.totalorder %s37_s10, %s37_s10 }
   0x5   :  { %p4435_p0 = scmp.ne.s32.totalorder %s37_s10, %s4434_s13  ;;  %p4440_p2 = scmp.lt.s32.totalorder %s4434_s13, %s4434_s13 }
   0x7   :  { %p4441_p3 = por %p4440_p2, %p4439_p1 }
   0x9   :  { %p4442_p4 = pnand %p4441_p3, %p4435_p0 }
   0xb   :  { %4445 = shalt.err (!%p4442_p4)
}
   0xc   :  { %s4534_s14 = smov 512   ;;  %s4535_s15 = smov 32  }
   0xd   :  { %42 = dma.hbm_to_vmem [thread:$0]  %s6672_s2, 8192, %s37_s10, [#allocation9], %s4534_s14, %s4534_s14, %s4535_s15  }
   0xe   :  { %s4454_s18 = scalar_lea.vmem %s63_s12, 8192  ;;  %p4459_p6 = scmp.lt.s32.totalorder %s63_s12, %s63_s12 }
   0xf   :  { %p4455_p5 = scmp.ne.s32.totalorder %s63_s12, %s4454_s18  ;;  %p4460_p7 = scmp.lt.s32.totalorder %s4454_s18, %s4454_s18 }
  0x11   :  { %p4461_p8 = por %p4460_p7, %p4459_p6 }
  0x13   :  { %p4462_p9 = pnand %p4461_p8, %p4455_p5 }
  0x15   :  { %4465 = shalt.err (!%p4462_p9)
}
  0x16   :  { %68 = dma.hbm_to_vmem [thread:$0]  %s6675_s5, 8192, %s63_s12, [#allocation12], %s4534_s14, %s4534_s14, %s4535_s15  }
  0x17   :  { %s4536_s21 = smov [#allocation6]   ;;  %s4537_s23 = smov [#allocation10]  }
  0x18   :  { %s24_s22 = sshll.u32 %s4536_s21, 4  ;;  %s50_s24 = sshll.u32 %s4537_s23, 4  ;;  %s25_s22 = int_to_ptr.vmem [resolvable:$true] %s24_s22  ;;  %s51_s24 = int_to_ptr.vmem [resolvable:$true] %s50_s24 }
  0x19   :  { %s4474_s2 = scalar_lea.vmem %s25_s22, 8192  ;;  %p4479_p11 = scmp.lt.s32.totalorder %s25_s22, %s25_s22 }
  0x1a   :  { %p4475_p10 = scmp.ne.s32.totalorder %s25_s22, %s4474_s2  ;;  %p4480_p12 = scmp.lt.s32.totalorder %s4474_s2, %s4474_s2 }
  0x1c   :  { %p4481_p13 = por %p4480_p12, %p4479_p11 }
  0x1e   :  { %p4482_p0 = pnand %p4481_p13, %p4475_p10 }
  0x20   :  { %4485 = shalt.err (!%p4482_p0)
}
  0x21   :  { %30 = dma.hbm_to_vmem [thread:$0]  %s6671_s1, 8192, %s25_s22, [#allocation7], %s4534_s14, %s4534_s14, %s4535_s15  }
  0x22   :  { %s4494_s5 = scalar_lea.vmem %s51_s24, 8192  ;;  %p4499_p2 = scmp.lt.s32.totalorder %s51_s24, %s51_s24 }
  0x23   :  { %p4495_p1 = scmp.ne.s32.totalorder %s51_s24, %s4494_s5  ;;  %p4500_p3 = scmp.lt.s32.totalorder %s4494_s5, %s4494_s5 }
  0x25   :  { %p4501_p4 = por %p4500_p3, %p4499_p2 }
  0x27   :  { %p4502_p5 = pnand %p4501_p4, %p4495_p1 }
  0x29   :  { %4505 = shalt.err (!%p4502_p5)
}
  0x2a   :  { %56 = dma.hbm_to_vmem [thread:$0]  %s6674_s4, 8192, %s51_s24, [#allocation9], %s4534_s14, %s4534_s14, %s4535_s15  }
  0x2b   :  { %s4538_s29 = smov [#allocation13]  }
  0x2c   :  { %s76_s30 = sshll.u32 %s4538_s29, 4  ;;  %s77_s30 = int_to_ptr.vmem [resolvable:$true] %s76_s30 }
  0x2d   :  { %s4514_s10 = scalar_lea.vmem %s77_s30, 2048  ;;  %p4519_p7 = scmp.lt.s32.totalorder %s77_s30, %s77_s30 }
  0x2e   :  { %p4515_p6 = scmp.ne.s32.totalorder %s77_s30, %s4514_s10  ;;  %p4520_p8 = scmp.lt.s32.totalorder %s4514_s10, %s4514_s10 }
  0x30   :  { %p4521_p9 = por %p4520_p8, %p4519_p7 }
  0x32   :  { %p4522_p10 = pnand %p4521_p9, %p4515_p6 }
  0x34   :  { %4525 = shalt.err (!%p4522_p10)
}
  0x35   :  { %s4539_s1 = smov 128   ;;  %s4540_s11 = smov 8  }
  0x36   :  { %82 = dma.hbm_to_vmem [thread:$0]  %s6677_s7, 2048, %s77_s30, [#allocation12], %s4539_s1, %s4539_s1, %s4540_s11  }
  0x37   :  { %4526 = dma.done.wait [#allocation7], 8192  }
  0x38   :  { %4527 = vsyncadd [#allocation7], 4294959104 }
  0x39   :  { %4528 = dma.done.wait [#allocation9], 16384  }
  0x3a   :  { %4529 = vsyncadd [#allocation9], 4294950912 }
  0x3b   :  { %4530 = dma.done.wait [#allocation12], 10240  }
  0x3c   :  { %4531 = vsyncadd [#allocation12], 4294957056  ;;  %v6682_v0 = vmov 0.0   ;;  %v169_v1 = vld [vmem:[#allocation6 + $0x1e8] sm:$0xff]  ;;  %v168_v2 = vld [vmem:[#allocation6 + $0x1e0] sm:$0xff] }
  0x3d   :  { %330 = vmatprep.mubr.f32.mxu1 %v6682_v0  ;;  %594 = vmatprep.mubr.f32.mxu0 %v6682_v0  ;;  %v165_v3 = vld [vmem:[#allocation6 + $0x1c8] sm:$0xff]  ;;  %v164_v5 = vld [vmem:[#allocation6 + $0x1c0] sm:$0xff] }
  0x3e   :  { %266 = vmatprep.subr.mxu1 %v169_v1  ;;  %v4621_v4 = vld [vmem:[#allocation8 + $0x1e8] sm:$0xff]  ;;  %v4623_v6 = vld [vmem:[#allocation8 + $0x1e0] sm:$0xff] }
  0x3f   :  { %267 = vmatpush1.msra.mxu1 %v168_v2  ;;  %530 = vmatprep.subr.mxu0 %v4621_v4  ;;  %v161_v7 = vld [vmem:[#allocation6 + $0x1a8] sm:$0xff]  ;;  %v160_v9 = vld [vmem:[#allocation6 + $0x1a0] sm:$0xff]  ;;  %v171_v2 = vld [vmem:[#allocation6 + $0x1f8] sm:$0xff] }
  0x40   :  { %v4626_v8 = vld [vmem:[#allocation8 + $0x1c8] sm:$0xff]  ;;  %268 = vmatprep.subr.mxu1 %v165_v3  ;;  %531 = vmatpush1.msra.mxu0 %v4623_v6  ;;  %v4629_v10 = vld [vmem:[#allocation8 + $0x1c0] sm:$0xff]  ;;  %v170_v3 = vld [vmem:[#allocation6 + $0x1f0] sm:$0xff] }
  0x41   :  { %v4631_v11 = vld [vmem:[#allocation8 + $0x1a8] sm:$0xff]  ;;  %269 = vmatpush1.msra.mxu1 %v164_v5  ;;  %532 = vmatprep.subr.mxu0 %v4626_v8  ;;  %v4634_v13 = vld [vmem:[#allocation8 + $0x1a0] sm:$0xff] }
  0x42   :  { %v157_v12 = vld [vmem:[#allocation6 + $0x188] sm:$0xff]  ;;  %270 = vmatprep.subr.mxu1 %v161_v7  ;;  %533 = vmatpush1.msra.mxu0 %v4629_v10  ;;  %v156_v14 = vld [vmem:[#allocation6 + $0x180] sm:$0xff]  ;;  %v167_v7 = vld [vmem:[#allocation6 + $0x1d8] sm:$0xff] }
  0x43   :  { %v4637_v15 = vld [vmem:[#allocation8 + $0x188] sm:$0xff]  ;;  %271 = vmatpush1.msra.mxu1 %v160_v9  ;;  %534 = vmatprep.subr.mxu0 %v4631_v11  ;;  %v4640_v17 = vld [vmem:[#allocation8 + $0x180] sm:$0xff]  ;;  %v166_v9 = vld [vmem:[#allocation6 + $0x1d0] sm:$0xff] }
  0x44   :  { %v153_v16 = vld [vmem:[#allocation6 + $0x168] sm:$0xff]  ;;  %272 = vmatprep.subr.mxu1 %v157_v12  ;;  %535 = vmatpush1.msra.mxu0 %v4634_v13  ;;  %v152_v18 = vld [vmem:[#allocation6 + $0x160] sm:$0xff] }
  0x45   :  { %v4643_v19 = vld [vmem:[#allocation8 + $0x168] sm:$0xff]  ;;  %273 = vmatpush1.msra.mxu1 %v156_v14  ;;  %536 = vmatprep.subr.mxu0 %v4637_v15  ;;  %v4646_v21 = vld [vmem:[#allocation8 + $0x160] sm:$0xff]  ;;  %v163_v14 = vld [vmem:[#allocation6 + $0x1b8] sm:$0xff] }
  0x46   :  { %v149_v20 = vld [vmem:[#allocation6 + $0x148] sm:$0xff]  ;;  %274 = vmatprep.subr.mxu1 %v153_v16  ;;  %537 = vmatpush1.msra.mxu0 %v4640_v17  ;;  %v148_v22 = vld [vmem:[#allocation6 + $0x140] sm:$0xff]  ;;  %v162_v16 = vld [vmem:[#allocation6 + $0x1b0] sm:$0xff] }
  0x47   :  { %v4649_v23 = vld [vmem:[#allocation8 + $0x148] sm:$0xff]  ;;  %275 = vmatpush1.msra.mxu1 %v152_v18  ;;  %538 = vmatprep.subr.mxu0 %v4643_v19  ;;  %v4652_v25 = vld [vmem:[#allocation8 + $0x140] sm:$0xff]  ;;  %v159_v18 = vld [vmem:[#allocation6 + $0x198] sm:$0xff] }
  0x48   :  { %v145_v24 = vld [vmem:[#allocation6 + $0x128] sm:$0xff]  ;;  %276 = vmatprep.subr.mxu1 %v149_v20  ;;  %539 = vmatpush1.msra.mxu0 %v4646_v21  ;;  %v144_v26 = vld [vmem:[#allocation6 + $0x120] sm:$0xff]  ;;  %v158_v20 = vld [vmem:[#allocation6 + $0x190] sm:$0xff] }
  0x49   :  { %v4655_v27 = vld [vmem:[#allocation8 + $0x128] sm:$0xff]  ;;  %277 = vmatpush1.msra.mxu1 %v148_v22  ;;  %540 = vmatprep.subr.mxu0 %v4649_v23  ;;  %v4658_v29 = vld [vmem:[#allocation8 + $0x120] sm:$0xff]  ;;  %v4735_v22 = vld [vmem:[%s6670_s0 + $0x10] sm:$0xff] }
  0x4a   :  { %v141_v28 = vld [vmem:[#allocation6 + $0x108] sm:$0xff]  ;;  %278 = vmatprep.subr.mxu1 %v145_v24  ;;  %541 = vmatpush1.msra.mxu0 %v4652_v25  ;;  %v140_v30 = vld [vmem:[#allocation6 + $0x100] sm:$0xff]  ;;  %v155_v24 = vld [vmem:[#allocation6 + $0x178] sm:$0xff] }
  0x4b   :  { %v4661_v31 = vld [vmem:[#allocation8 + $0x108] sm:$0xff]  ;;  %279 = vmatpush1.msra.mxu1 %v144_v26  ;;  %542 = vmatprep.subr.mxu0 %v4655_v27  ;;  %v4664_v33 = vld [vmem:[#allocation8 + $0x100] sm:$0xff]  ;;  %v154_v26 = vld [vmem:[#allocation6 + $0x170] sm:$0xff] }
  0x4c   :  { %v137_v32 = vld [vmem:[#allocation6 + $0xe8] sm:$0xff]  ;;  %280 = vmatprep.subr.mxu1 %v141_v28  ;;  %543 = vmatpush1.msra.mxu0 %v4658_v29  ;;  %v136_v34 = vld [vmem:[#allocation6 + $0xe0] sm:$0xff]  ;;  %v151_v28 = vld [vmem:[#allocation6 + $0x158] sm:$0xff] }
  0x4d   :  { %v4667_v35 = vld [vmem:[#allocation8 + $0xe8] sm:$0xff]  ;;  %281 = vmatpush1.msra.mxu1 %v140_v30  ;;  %544 = vmatprep.subr.mxu0 %v4661_v31  ;;  %v4670_v37 = vld [vmem:[#allocation8 + $0xe0] sm:$0xff]  ;;  %v150_v30 = vld [vmem:[#allocation6 + $0x150] sm:$0xff] }
  0x4e   :  { %v133_v36 = vld [vmem:[#allocation6 + $0xc8] sm:$0xff]  ;;  %282 = vmatprep.subr.mxu1 %v137_v32  ;;  %545 = vmatpush1.msra.mxu0 %v4664_v33  ;;  %v132_v38 = vld [vmem:[#allocation6 + $0xc0] sm:$0xff]  ;;  %v4744_v32 = vld [vmem:[%s6670_s0 + $0x18] sm:$0xff] }
  0x4f   :  { %v4673_v39 = vld [vmem:[#allocation8 + $0xc8] sm:$0xff]  ;;  %283 = vmatpush1.msra.mxu1 %v136_v34  ;;  %546 = vmatprep.subr.mxu0 %v4667_v35  ;;  %v4676_v41 = vld [vmem:[#allocation8 + $0xc0] sm:$0xff]  ;;  %v147_v34 = vld [vmem:[#allocation6 + $0x138] sm:$0xff] }
  0x50   :  { %v129_v40 = vld [vmem:[#allocation6 + $0xa8] sm:$0xff]  ;;  %284 = vmatprep.subr.mxu1 %v133_v36  ;;  %547 = vmatpush1.msra.mxu0 %v4670_v37  ;;  %v128_v42 = vld [vmem:[#allocation6 + $0xa0] sm:$0xff]  ;;  %v146_v36 = vld [vmem:[#allocation6 + $0x130] sm:$0xff] }
  0x51   :  { %v4679_v43 = vld [vmem:[#allocation8 + $0xa8] sm:$0xff]  ;;  %285 = vmatpush1.msra.mxu1 %v132_v38  ;;  %548 = vmatprep.subr.mxu0 %v4673_v39  ;;  %v4682_v45 = vld [vmem:[#allocation8 + $0xa0] sm:$0xff]  ;;  %v143_v38 = vld [vmem:[#allocation6 + $0x118] sm:$0xff] }
  0x52   :  { %v125_v44 = vld [vmem:[#allocation6 + $0x88] sm:$0xff]  ;;  %6896 = vst [vmem:[#allocation17_spill] sm:$0xff] %v4682_v45  ;;  %286 = vmatprep.subr.mxu1 %v129_v40  ;;  %549 = vmatpush1.msra.mxu0 %v4676_v41  ;;  %v124_v46 = vld [vmem:[#allocation6 + $0x80] sm:$0xff]  ;;  %v142_v40 = vld [vmem:[#allocation6 + $0x110] sm:$0xff] }
  0x53   :  { %v4685_v47 = vld [vmem:[#allocation8 + $0x88] sm:$0xff]  ;;  %287 = vmatpush1.msra.mxu1 %v128_v42  ;;  %550 = vmatprep.subr.mxu0 %v4679_v43  ;;  %v4688_v49 = vld [vmem:[#allocation8 + $0x80] sm:$0xff] }
  0x54   :  { %6897 = vst [vmem:[#allocation18_spill] sm:$0xff] %v4685_v47  ;;  %v121_v48 = vld [vmem:[#allocation6 + $0x68] sm:$0xff]  ;;  %6898 = vst [vmem:[#allocation19_spill] sm:$0xff] %v4688_v49  ;;  %288 = vmatprep.subr.mxu1 %v125_v44  ;;  %551 = vmatpush1.msra.mxu0 %v4682_v45  ;;  %v120_v50 = vld [vmem:[#allocation6 + $0x60] sm:$0xff] }
  0x55   :  { %v4691_v51 = vld [vmem:[#allocation8 + $0x68] sm:$0xff]  ;;  %289 = vmatpush1.msra.mxu1 %v124_v46  ;;  %552 = vmatprep.subr.mxu0 %v4685_v47  ;;  %v4694_v53 = vld [vmem:[#allocation8 + $0x60] sm:$0xff]  ;;  %v139_v44 = vld [vmem:[#allocation6 + $0xf8] sm:$0xff] }
  0x56   :  { %6899 = vst [vmem:[#allocation20_spill] sm:$0xff] %v4691_v51  ;;  %v117_v52 = vld [vmem:[#allocation6 + $0x48] sm:$0xff]  ;;  %6900 = vst [vmem:[#allocation21_spill] sm:$0xff] %v4694_v53  ;;  %290 = vmatprep.subr.mxu1 %v121_v48  ;;  %553 = vmatpush1.msra.mxu0 %v4688_v49  ;;  %v116_v54 = vld [vmem:[#allocation6 + $0x40] sm:$0xff] }
  0x57   :  { %v4697_v55 = vld [vmem:[#allocation8 + $0x48] sm:$0xff]  ;;  %291 = vmatpush1.msra.mxu1 %v120_v50  ;;  %554 = vmatprep.subr.mxu0 %v4691_v51  ;;  %v4700_v57 = vld [vmem:[#allocation8 + $0x40] sm:$0xff]  ;;  %v138_v46 = vld [vmem:[#allocation6 + $0xf0] sm:$0xff] }
  0x58   :  { %6901 = vst [vmem:[#allocation22_spill] sm:$0xff] %v4697_v55  ;;  %v113_v56 = vld [vmem:[#allocation6 + $0x28] sm:$0xff]  ;;  %6902 = vst [vmem:[#allocation23_spill] sm:$0xff] %v4700_v57  ;;  %292 = vmatprep.subr.mxu1 %v117_v52  ;;  %555 = vmatpush1.msra.mxu0 %v4694_v53  ;;  %v112_v58 = vld [vmem:[#allocation6 + $0x20] sm:$0xff] }
  0x59   :  { %v4703_v59 = vld [vmem:[#allocation8 + $0x28] sm:$0xff]  ;;  %293 = vmatpush1.msra.mxu1 %v116_v54  ;;  %556 = vmatprep.subr.mxu0 %v4697_v55  ;;  %v4706_v61 = vld [vmem:[#allocation8 + $0x20] sm:$0xff]  ;;  %v135_v48 = vld [vmem:[#allocation6 + $0xd8] sm:$0xff] }
  0x5a   :  { %6903 = vst [vmem:[#allocation24_spill] sm:$0xff] %v4703_v59  ;;  %v109_v60 = vld [vmem:[#allocation6 + $0x8] sm:$0xff]  ;;  %6904 = vst [vmem:[#allocation25_spill] sm:$0xff] %v4706_v61  ;;  %294 = vmatprep.subr.mxu1 %v113_v56  ;;  %557 = vmatpush1.msra.mxu0 %v4700_v57  ;;  %v108_v62 = vld [vmem:[#allocation6] sm:$0xff] }
  0x5b   :  { %v4709_v63 = vld [vmem:[#allocation8 + $0x8] sm:$0xff]  ;;  %295 = vmatpush1.msra.mxu1 %v112_v58  ;;  %558 = vmatprep.subr.mxu0 %v4703_v59  ;;  %v4715_v1 = vld [vmem:[%s6670_s0] sm:$0xff]  ;;  %v134_v50 = vld [vmem:[#allocation6 + $0xd0] sm:$0xff] }
  0x5c   :  { %6905 = vst [vmem:[#allocation26_spill] sm:$0xff] %v4709_v63  ;;  %296 = vmatprep.subr.mxu1 %v109_v60  ;;  %559 = vmatpush1.msra.mxu0 %v4706_v61  ;;  %v4718_v5 = vld [vmem:[#allocation8] sm:$0xff]  ;;  %v4726_v12 = vld [vmem:[%s6670_s0 + $0x8] sm:$0xff]  ;;  %v131_v54 = vld [vmem:[#allocation6 + $0xb8] sm:$0xff] }
  0x5d   :  { %6906 = vst [vmem:[#allocation27_spill] sm:$0xff] %v4718_v5  ;;  %297 = vmatpush1.msra.mxu1 %v108_v62  ;;  %560 = vmatprep.subr.mxu0 %v4709_v63  ;;  %v4753_v42 = vld [vmem:[%s6670_s0 + $0x20] sm:$0xff]  ;;  %v4762_v52 = vld [vmem:[%s6670_s0 + $0x28] sm:$0xff]  ;;  %v130_v56 = vld [vmem:[#allocation6 + $0xb0] sm:$0xff] }
  0x5e   :  { %331 = vmatmul.mubr.f32.vlgmr.msra.gmra.mxu1 %v4715_v1  ;;  %379 = vmatprep.subr.mxu1 %v171_v2  ;;  %v127_v58 = vld [vmem:[#allocation6 + $0x98] sm:$0xff]  ;;  %v126_v60 = vld [vmem:[#allocation6 + $0x90] sm:$0xff] }
  0x5f   :  { %380 = vmatpush1.msra.mxu1 %v170_v3  ;;  %561 = vmatpush1.msra.mxu0 %v4718_v5  ;;  %v4771_v62 = vld [vmem:[%s6670_s0 + $0x30] sm:$0xff]  ;;  %v123_v2 = vld [vmem:[#allocation6 + $0x78] sm:$0xff] }
  0x60   :  { %381 = vmatprep.subr.mxu1 %v167_v7  ;;  %595 = vmatmul.mubr.f32.vlgmr.msra.gmra.mxu0 %v6682_v0  ;;  %v122_v3 = vld [vmem:[#allocation6 + $0x70] sm:$0xff]  ;;  %v119_v7 = vld [vmem:[#allocation6 + $0x58] sm:$0xff] }
  0x61   :  { %336 = vmatprep.mubr.f32.mxu1 %v6682_v0  ;;  %382 = vmatpush1.msra.mxu1 %v166_v9  ;;  %v118_v9 = vld [vmem:[#allocation6 + $0x50] sm:$0xff] }
  0x62   :  { %337 = vmatmul.mubr.f32.gmra.mxu1 %v4726_v12  ;;  %383 = vmatprep.subr.mxu1 %v163_v14  ;;  %v4780_v14 = vld [vmem:[%s6670_s0 + $0x38] sm:$0xff] }
  0x63   :  { %384 = vmatpush1.msra.mxu1 %v162_v16  ;;  %342 = vmatprep.mubr.f32.mxu1 %v6682_v0  ;;  %v115_v16 = vld [vmem:[#allocation6 + $0x38] sm:$0xff] }
  0x64   :  { %385 = vmatprep.subr.mxu1 %v159_v18  ;;  %706 = vmatprep.subr.mxu0 %v4621_v4  ;;  %v114_v18 = vld [vmem:[#allocation6 + $0x30] sm:$0xff] }
  0x65   :  { %386 = vmatpush1.msra.mxu1 %v158_v20  ;;  %707 = vmatpush1.msra.mxu0 %v4623_v6  ;;  %v111_v20 = vld [vmem:[#allocation6 + $0x18] sm:$0xff] }
  0x66   :  { %343 = vmatmul.mubr.f32.gmra.mxu1 %v4735_v22  ;;  %387 = vmatprep.subr.mxu1 %v155_v24  ;;  %v110_v24 = vld [vmem:[#allocation6 + $0x10] sm:$0xff] }
  0x67   :  { %388 = vmatpush1.msra.mxu1 %v154_v26  ;;  %348 = vmatprep.mubr.f32.mxu1 %v6682_v0  ;;  %v4786_v26 = vld [vmem:[#allocation8 + $0x1f8] sm:$0xff] }
  0x68   :  { %389 = vmatprep.subr.mxu1 %v151_v28  ;;  %708 = vmatprep.subr.mxu0 %v4626_v8  ;;  %6907 = vst [vmem:[#allocation28_spill] sm:$0xff] %v4786_v26  ;;  %v4788_v28 = vld [vmem:[#allocation8 + $0x1f0] sm:$0xff] }
  0x69   :  { %390 = vmatpush1.msra.mxu1 %v150_v30  ;;  %709 = vmatpush1.msra.mxu0 %v4629_v10  ;;  %v4791_v30 = vld [vmem:[#allocation8 + $0x1d8] sm:$0xff] }
  0x6a   :  { %349 = vmatmul.mubr.f32.gmra.mxu1 %v4744_v32  ;;  %391 = vmatprep.subr.mxu1 %v147_v34  ;;  %v4796_v34 = vld [vmem:[#allocation8 + $0x1d0] sm:$0xff] }
  0x6b   :  { %392 = vmatpush1.msra.mxu1 %v146_v36  ;;  %354 = vmatprep.mubr.f32.mxu1 %v6682_v0  ;;  %v4800_v36 = vld [vmem:[#allocation8 + $0x1b8] sm:$0xff] }
  0x6c   :  { %393 = vmatprep.subr.mxu1 %v143_v38  ;;  %710 = vmatprep.subr.mxu0 %v4631_v11  ;;  %v4803_v38 = vld [vmem:[#allocation8 + $0x1b0] sm:$0xff] }
  0x6d   :  { %394 = vmatpush1.msra.mxu1 %v142_v40  ;;  %711 = vmatpush1.msra.mxu0 %v4634_v13  ;;  %v4807_v40 = vld [vmem:[#allocation8 + $0x198] sm:$0xff] }
  0x6e   :  { %355 = vmatmul.mubr.f32.gmra.mxu1 %v4753_v42  ;;  %395 = vmatprep.subr.mxu1 %v139_v44  ;;  %v4816_v44 = vld [vmem:[#allocation8 + $0x178] sm:$0xff] }
  0x6f   :  { %396 = vmatpush1.msra.mxu1 %v138_v46  ;;  %360 = vmatprep.mubr.f32.mxu1 %v6682_v0  ;;  %v4819_v46 = vld [vmem:[#allocation8 + $0x170] sm:$0xff] }
  0x70   :  { %397 = vmatprep.subr.mxu1 %v135_v48  ;;  %712 = vmatprep.subr.mxu0 %v4637_v15  ;;  %v4823_v48 = vld [vmem:[#allocation8 + $0x158] sm:$0xff] }
  0x71   :  { %398 = vmatpush1.msra.mxu1 %v134_v50  ;;  %713 = vmatpush1.msra.mxu0 %v4640_v17  ;;  %v4832_v50 = vld [vmem:[#allocation8 + $0x138] sm:$0xff] }
  0x72   :  { %361 = vmatmul.mubr.f32.gmra.mxu1 %v4762_v52  ;;  %399 = vmatprep.subr.mxu1 %v131_v54  ;;  %v4835_v54 = vld [vmem:[#allocation8 + $0x130] sm:$0xff] }
  0x73   :  { %400 = vmatpush1.msra.mxu1 %v130_v56  ;;  %366 = vmatprep.mubr.f32.mxu1 %v6682_v0  ;;  %v4839_v56 = vld [vmem:[#allocation8 + $0x118] sm:$0xff] }
  0x74   :  { %401 = vmatprep.subr.mxu1 %v127_v58  ;;  %714 = vmatprep.subr.mxu0 %v4643_v19  ;;  %v4848_v58 = vld [vmem:[#allocation8 + $0xf8] sm:$0xff] }
  0x75   :  { %402 = vmatpush1.msra.mxu1 %v126_v60  ;;  %715 = vmatpush1.msra.mxu0 %v4646_v21  ;;  %v4851_v60 = vld [vmem:[#allocation8 + $0xf0] sm:$0xff] }
  0x76   :  { %367 = vmatmul.mubr.f32.gmra.mxu1 %v4771_v62  ;;  %403 = vmatprep.subr.mxu1 %v123_v2  ;;  %v4855_v2 = vld [vmem:[#allocation8 + $0xd8] sm:$0xff] }
  0x77   :  { %404 = vmatpush1.msra.mxu1 %v122_v3  ;;  %372 = vmatprep.mubr.f32.mxu1 %v6682_v0  ;;  %v4864_v3 = vld [vmem:[#allocation8 + $0xb8] sm:$0xff] }
  0x78   :  { %405 = vmatprep.subr.mxu1 %v119_v7  ;;  %716 = vmatprep.subr.mxu0 %v4649_v23  ;;  %v4867_v7 = vld [vmem:[#allocation8 + $0xb0] sm:$0xff] }
  0x79   :  { %406 = vmatpush1.msra.mxu1 %v118_v9  ;;  %717 = vmatpush1.msra.mxu0 %v4652_v25  ;;  %6908 = vst [vmem:[#allocation29_spill] sm:$0xff] %v4867_v7  ;;  %v4871_v9 = vld [vmem:[#allocation8 + $0x98] sm:$0xff] }
  0x7a   :  { %373 = vmatmul.mubr.f32.gmra.mxu1 %v4780_v14  ;;  %407 = vmatprep.subr.mxu1 %v115_v16  ;;  %6909 = vst [vmem:[#allocation30_spill] sm:$0xff] %v4871_v9  ;;  %v4880_v16 = vld [vmem:[#allocation8 + $0x78] sm:$0xff] }
  0x7b   :  { %408 = vmatpush1.msra.mxu1 %v114_v18  ;;  %443 = vmatprep.mubr.f32.mxu1 %v6682_v0  ;;  %6911 = vst [vmem:[#allocation32_spill] sm:$0xff] %v4880_v16  ;;  %v4883_v18 = vld [vmem:[#allocation8 + $0x70] sm:$0xff] }
  0x7c   :  { %409 = vmatprep.subr.mxu1 %v111_v20  ;;  %718 = vmatprep.subr.mxu0 %v4655_v27  ;;  %6912 = vst [vmem:[#allocation33_spill] sm:$0xff] %v4883_v18  ;;  %v4887_v20 = vld [vmem:[#allocation8 + $0x58] sm:$0xff] }
  0x7d   :  { %410 = vmatpush1.msra.mxu1 %v110_v24  ;;  %719 = vmatpush1.msra.mxu0 %v4658_v29  ;;  %6913 = vst [vmem:[#allocation34_spill] sm:$0xff] %v4887_v20  ;;  %v4896_v24 = vld [vmem:[#allocation8 + $0x38] sm:$0xff] }
  0x7e   :  { %444 = vmatmul.mubr.f32.vlgmr.msra.gmra.mxu1 %v4715_v1  ;;  %601 = vmatprep.subr.mxu1 %v4786_v26  ;;  %v4812_v1 = vld [vmem:[#allocation8 + $0x190] sm:$0xff]  ;;  %6915 = vst [vmem:[#allocation36_spill] sm:$0xff] %v4896_v24 }
  0x7f   :  { %602 = vmatpush1.msra.mxu1 %v4788_v28  ;;  %449 = vmatprep.mubr.f32.mxu1 %v6682_v0 }
  0x80   :  { %603 = vmatprep.subr.mxu1 %v4791_v30  ;;  %720 = vmatprep.subr.mxu0 %v4661_v31 }
  0x81   :  { %604 = vmatpush1.msra.mxu1 %v4796_v34  ;;  %721 = vmatpush1.msra.mxu0 %v4664_v33 }
  0x82   :  { %450 = vmatmul.mubr.f32.gmra.mxu1 %v4726_v12  ;;  %605 = vmatprep.subr.mxu1 %v4800_v36  ;;  %v4828_v12 = vld [vmem:[#allocation8 + $0x150] sm:$0xff] }
  0x83   :  { %606 = vmatpush1.msra.mxu1 %v4803_v38  ;;  %455 = vmatprep.mubr.f32.mxu1 %v6682_v0 }
  0x84   :  { %607 = vmatprep.subr.mxu1 %v4807_v40  ;;  %722 = vmatprep.subr.mxu0 %v4667_v35 }
  0x85   :  { %608 = vmatpush1.msra.mxu1 %v4812_v1  ;;  %723 = vmatpush1.msra.mxu0 %v4670_v37 }
  0x86   :  { %456 = vmatmul.mubr.f32.gmra.mxu1 %v4735_v22  ;;  %609 = vmatprep.subr.mxu1 %v4816_v44  ;;  %v4844_v22 = vld [vmem:[#allocation8 + $0x110] sm:$0xff] }
  0x87   :  { %610 = vmatpush1.msra.mxu1 %v4819_v46  ;;  %461 = vmatprep.mubr.f32.mxu1 %v6682_v0 }
  0x88   :  { %611 = vmatprep.subr.mxu1 %v4823_v48  ;;  %724 = vmatprep.subr.mxu0 %v4673_v39 }
  0x89   :  { %612 = vmatpush1.msra.mxu1 %v4828_v12  ;;  %725 = vmatpush1.msra.mxu0 %v4676_v41 }
  0x8a   :  { %462 = vmatmul.mubr.f32.gmra.mxu1 %v4744_v32  ;;  %613 = vmatprep.subr.mxu1 %v4832_v50  ;;  %v4860_v32 = vld [vmem:[#allocation8 + $0xd0] sm:$0xff] }
  0x8b   :  { %614 = vmatpush1.msra.mxu1 %v4835_v54  ;;  %467 = vmatprep.mubr.f32.mxu1 %v6682_v0 }
  0x8c   :  { %615 = vmatprep.subr.mxu1 %v4839_v56  ;;  %726 = vmatprep.subr.mxu0 %v4679_v43 }
  0x8d   :  { %616 = vmatpush1.msra.mxu1 %v4844_v22  ;;  %727 = vmatpush1.msra.mxu0 %v4682_v45 }
  0x8e   :  { %468 = vmatmul.mubr.f32.gmra.mxu1 %v4753_v42  ;;  %617 = vmatprep.subr.mxu1 %v4848_v58  ;;  %v4876_v42 = vld [vmem:[#allocation8 + $0x90] sm:$0xff] }
  0x8f   :  { %618 = vmatpush1.msra.mxu1 %v4851_v60  ;;  %473 = vmatprep.mubr.f32.mxu1 %v6682_v0  ;;  %6910 = vst [vmem:[#allocation31_spill] sm:$0xff] %v4876_v42 }
  0x90   :  { %619 = vmatprep.subr.mxu1 %v4855_v2  ;;  %728 = vmatprep.subr.mxu0 %v4685_v47 }
  0x91   :  { %620 = vmatpush1.msra.mxu1 %v4860_v32  ;;  %729 = vmatpush1.msra.mxu0 %v4688_v49 }
  0x92   :  { %474 = vmatmul.mubr.f32.gmra.mxu1 %v4762_v52  ;;  %621 = vmatprep.subr.mxu1 %v4864_v3  ;;  %v4892_v52 = vld [vmem:[#allocation8 + $0x50] sm:$0xff] }
  0x93   :  { %622 = vmatpush1.msra.mxu1 %v4867_v7  ;;  %479 = vmatprep.mubr.f32.mxu1 %v6682_v0  ;;  %6914 = vst [vmem:[#allocation35_spill] sm:$0xff] %v4892_v52 }
  0x94   :  { %623 = vmatprep.subr.mxu1 %v4871_v9  ;;  %730 = vmatprep.subr.mxu0 %v4691_v51  ;;  %v4899_v51 = vld [vmem:[#allocation8 + $0x30] sm:$0xff] }
  0x95   :  { %624 = vmatpush1.msra.mxu1 %v4876_v42  ;;  %731 = vmatpush1.msra.mxu0 %v4694_v53  ;;  %6916 = vst [vmem:[#allocation37_spill] sm:$0xff] %v4899_v51  ;;  %v4903_v53 = vld [vmem:[#allocation8 + $0x18] sm:$0xff] }
  0x96   :  { %480 = vmatmul.mubr.f32.gmra.mxu1 %v4771_v62  ;;  %625 = vmatprep.subr.mxu1 %v4880_v16  ;;  %6917 = vst [vmem:[#allocation38_spill] sm:$0xff] %v4903_v53  ;;  %v4908_v62 = vld [vmem:[#allocation8 + $0x10] sm:$0xff] }
  0x97   :  { %626 = vmatpush1.msra.mxu1 %v4883_v18  ;;  %485 = vmatprep.mubr.f32.mxu1 %v6682_v0  ;;  %6918 = vst [vmem:[#allocation39_spill] sm:$0xff] %v4908_v62 }
  0x98   :  { %627 = vmatprep.subr.mxu1 %v4887_v20  ;;  %732 = vmatprep.subr.mxu0 %v4697_v55 }
  0x99   :  { %628 = vmatpush1.msra.mxu1 %v4892_v52  ;;  %733 = vmatpush1.msra.mxu0 %v4700_v57 }
  0x9a   :  { %486 = vmatmul.mubr.f32.gmra.mxu1 %v4780_v14  ;;  %629 = vmatprep.subr.mxu1 %v4896_v24 }
  0x9b   :  { %630 = vmatpush1.msra.mxu1 %v4899_v51  ;;  %665 = vmatprep.mubr.f32.mxu1 %v6682_v0 }
  0x9c   :  { %631 = vmatprep.subr.mxu1 %v4903_v53  ;;  %734 = vmatprep.subr.mxu0 %v4703_v59 }
  0x9d   :  { %632 = vmatpush1.msra.mxu1 %v4908_v62  ;;  %735 = vmatpush1.msra.mxu0 %v4706_v61 }
  0x9e   :  { %666 = vmatmul.mubr.f32.vlgmr.msra.gmra.mxu1 %v6682_v0  ;;  %777 = vmatprep.subr.mxu1 %v4786_v26 }
  0x9f   :  { %778 = vmatpush1.msra.mxu1 %v4788_v28  ;;  %736 = vmatprep.subr.mxu0 %v4709_v63 }
  0xa0   :  { %779 = vmatprep.subr.mxu1 %v4791_v30  ;;  %737 = vmatpush1.msra.mxu0 %v4718_v5  ;;  %v236_v5 = vld [vmem:[%s6673_s3] sm:$0xf] }
  0xa1   :  { %780 = vmatpush1.msra.mxu1 %v4796_v34  ;;  %770 = vmatprep.mubr.f32.mxu0 %v6682_v0 }
  0xa2   :  { %781 = vmatprep.subr.mxu1 %v4800_v36  ;;  %841 = vmatprep.mubr.f32.mxu1 %v6682_v0 }
  0xa3   :  { %782 = vmatpush1.msra.mxu1 %v4803_v38  ;;  %883 = vmatprep.subr.mxu0 %v4621_v4  ;;  %v246_v4 = vlaneseq }
  0xa4   :  { %783 = vmatprep.subr.mxu1 %v4807_v40 }
  0xa5   :  { %784 = vmatpush1.msra.mxu1 %v4812_v1  ;;  %v4955_v14 = vshrl.u32 %v246_v4, 7 }
  0xa6   :  { %785 = vmatprep.subr.mxu1 %v4816_v44 }
  0xa7   :  { %786 = vmatpush1.msra.mxu1 %v4819_v46  ;;  %6919 = vst [vmem:[#allocation40_spill] sm:$0xff] %v4955_v14  ;;  %v6710_v0 = vsub.s32 0, %v4955_v14  ;;  %v6714_v61 = vsub.s32 1, %v4955_v14 }
  0xa8   :  { %787 = vmatprep.subr.mxu1 %v4823_v48 }
  0xa9   :  { %788 = vmatpush1.msra.mxu1 %v4828_v12 }
  0xaa   :  { %789 = vmatprep.subr.mxu1 %v4832_v50 }
  0xab   :  { %790 = vmatpush1.msra.mxu1 %v4835_v54 }
  0xac   :  { %791 = vmatprep.subr.mxu1 %v4839_v56 }
  0xad   :  { %792 = vmatpush1.msra.mxu1 %v4844_v22 }
  0xae   :  { %793 = vmatprep.subr.mxu1 %v4848_v58 }
  0xaf   :  { %794 = vmatpush1.msra.mxu1 %v4851_v60 }
  0xb0   :  { %795 = vmatprep.subr.mxu1 %v4855_v2 }
  0xb1   :  { %796 = vmatpush1.msra.mxu1 %v4860_v32 }
  0xb2   :  { %797 = vmatprep.subr.mxu1 %v4864_v3 }
  0xb3   :  { %798 = vmatpush1.msra.mxu1 %v4867_v7 }
  0xb4   :  { %799 = vmatprep.subr.mxu1 %v4871_v9 }
  0xb5   :  { %800 = vmatpush1.msra.mxu1 %v4876_v42 }
  0xb6   :  { %801 = vmatprep.subr.mxu1 %v4880_v16 }
  0xb7   :  { %802 = vmatpush1.msra.mxu1 %v4883_v18 }
  0xb8   :  { %803 = vmatprep.subr.mxu1 %v4887_v20 }
  0xb9   :  { %804 = vmatpush1.msra.mxu1 %v4892_v52 }
  0xba   :  { %805 = vmatprep.subr.mxu1 %v4896_v24 }
  0xbb   :  { %806 = vmatpush1.msra.mxu1 %v4899_v51 }
  0xbc   :  { %807 = vmatprep.subr.mxu1 %v4903_v53  ;;  %v249_v53 = vrot.slane %v236_v5, %v6710_v0 }
  0xbd   :  { %808 = vmatpush1.msra.mxu1 %v4908_v62 }
  0xbe   :  { %954 = vmatprep.subr.mxu1 %v4786_v26  ;;  %v253_v26 = vrot.slane %v236_v5, %v6714_v61 }
 0x11e   :  { %v332_v63 = vpop.f32.mrf.mxu1 }
 0x120   :  { %v334_v24 = vpop.f32.mrf.mxu1 }
 0x122   :  { %v338_v51 = vpop.f32.mrf.mxu1 }
 0x123   :  { %v4966_v62 = vadd.f32 %v338_v51, %v249_v53 }
 0x124   :  { %v340_v4 = vpop.f32.mrf.mxu1 }
 0x125   :  { %6920 = vst [vmem:[#allocation41_spill] sm:$0xff] %v4966_v62  ;;  %v4968_v59 = vadd.f32 %v340_v4, %v253_v26 }
 0x126   :  { %v344_v52 = vpop.f32.mrf.mxu1 }
 0x127   :  { %6921 = vst [vmem:[#allocation42_spill] sm:$0xff] %v4968_v59  ;;  %v4970_v57 = vadd.f32 %v344_v52, %v249_v53 }
 0x128   :  { %v346_v20 = vpop.f32.mrf.mxu1 }
 0x129   :  { %6922 = vst [vmem:[#allocation43_spill] sm:$0xff] %v4970_v57  ;;  %v4972_v55 = vadd.f32 %v346_v20, %v253_v26 }
 0x12a   :  { %v350_v18 = vpop.f32.mrf.mxu1 }
 0x12b   :  { %6923 = vst [vmem:[#allocation44_spill] sm:$0xff] %v4972_v55  ;;  %v4974_v16 = vadd.f32 %v350_v18, %v249_v53 }
 0x12c   :  { %v352_v42 = vpop.f32.mrf.mxu1 }
 0x12d   :  { %6924 = vst [vmem:[#allocation45_spill] sm:$0xff] %v4974_v16  ;;  %v4976_v0 = vadd.f32 %v352_v42, %v253_v26 }
 0x12e   :  { %v356_v49 = vpop.f32.mrf.mxu1 }
 0x12f   :  { %6925 = vst [vmem:[#allocation46_spill] sm:$0xff] %v4976_v0  ;;  %v4978_v9 = vadd.f32 %v356_v49, %v249_v53  ;;  %v596_v49 = vpop.f32.mrf.mxu0 }
 0x130   :  { %v358_v51 = vpop.f32.mrf.mxu1 }
 0x131   :  { %6926 = vst [vmem:[#allocation47_spill] sm:$0xff] %v4978_v9  ;;  %v4980_v61 = vadd.f32 %v358_v51, %v253_v26  ;;  %v6719_v51 = vsub.s32 2, %v4955_v14 }
 0x132   :  { %v362_v4 = vpop.f32.mrf.mxu1 }
 0x133   :  { %6927 = vst [vmem:[#allocation48_spill] sm:$0xff] %v4980_v61  ;;  %v4982_v59 = vadd.f32 %v362_v4, %v249_v53  ;;  %v598_v61 = vpop.f32.mrf.mxu0 }
 0x134   :  { %v364_v52 = vpop.f32.mrf.mxu1 }
 0x135   :  { %6928 = vst [vmem:[#allocation49_spill] sm:$0xff] %v4982_v59  ;;  %v4984_v57 = vadd.f32 %v364_v52, %v253_v26  ;;  %v335_v59 = vadd.f32 %v334_v24, %v253_v26  ;;  %v6720_v52 = vsub.s32 3, %v4955_v14 }
 0x136   :  { %v368_v20 = vpop.f32.mrf.mxu1 }
 0x137   :  { %6929 = vst [vmem:[#allocation50_spill] sm:$0xff] %v4984_v57  ;;  %v4986_v55 = vadd.f32 %v368_v20, %v249_v53  ;;  %v333_v57 = vadd.f32 %v332_v63, %v249_v53 }
 0x138   :  { %v370_v18 = vpop.f32.mrf.mxu1 }
 0x139   :  { %6930 = vst [vmem:[#allocation51_spill] sm:$0xff] %v4986_v55  ;;  %v4988_v16 = vadd.f32 %v370_v18, %v253_v26  ;;  %v257_v18 = vrot.slane %v236_v5, %v6719_v51  ;;  %v673_v55 = vadd.f32 %v598_v61, %v335_v59 }
 0x13a   :  { %v374_v42 = vpop.f32.mrf.mxu1 }
 0x13b   :  { %6931 = vst [vmem:[#allocation52_spill] sm:$0xff] %v4988_v16  ;;  %v4990_v0 = vadd.f32 %v374_v42, %v249_v53  ;;  %v261_v42 = vrot.slane %v236_v5, %v6720_v52  ;;  %v3916_v24 = vmul.f32 -1.442695, %v673_v55 }
 0x13c   :  { %v376_v9 = vpop.f32.mrf.mxu1 }
 0x13d   :  { %6932 = vst [vmem:[#allocation53_spill] sm:$0xff] %v4990_v0  ;;  %v4992_v62 = vadd.f32 %v376_v9, %v253_v26  ;;  %v672_v9 = vadd.f32 %v596_v49, %v333_v57  ;;  %4042 = vpow2.f32 %v3916_v24 }
 0x13e   :  { %v445_v4 = vpop.f32.mrf.mxu1 }
 0x13f   :  { %6933 = vst [vmem:[#allocation54_spill] sm:$0xff] %v4992_v62  ;;  %v3915_v53 = vmul.f32 -1.442695, %v672_v9 }
 0x140   :  { %v447_v20 = vpop.f32.mrf.mxu1 }
 0x141   :  { %4044 = vpow2.f32 %v3915_v53 }
 0x142   :  { %v451_v16 = vpop.f32.mrf.mxu1 }
 0x143   :  { %v5000_v0 = vadd.f32 %v451_v16, %v257_v18 }
 0x144   :  { %v453_v62 = vpop.f32.mrf.mxu1 }
 0x145   :  { %v5002_v47 = vadd.f32 %v453_v62, %v261_v42 }
 0x146   :  { %v457_v26 = vpop.f32.mrf.mxu1 }
 0x147   :  { %v5004_v7 = vadd.f32 %v457_v26, %v257_v18 }
 0x148   :  { %v459_v63 = vpop.f32.mrf.mxu1 }
 0x149   :  { %6934 = vst [vmem:[#allocation55_spill] sm:$0xff] %v5004_v7  ;;  %v5006_v45 = vadd.f32 %v459_v63, %v261_v42 }
 0x14a   :  { %v463_v51 = vpop.f32.mrf.mxu1 }
 0x14b   :  { %v5008_v59 = vadd.f32 %v463_v51, %v257_v18  ;;  %v4043_v51 = vpop.eup %4042 }
 0x14c   :  { %v465_v61 = vpop.f32.mrf.mxu1 }
 0x14d   :  { %6935 = vst [vmem:[#allocation56_spill] sm:$0xff] %v5008_v59  ;;  %v5010_v5 = vadd.f32 %v465_v61, %v261_v42 }
 0x14e   :  { %v469_v57 = vpop.f32.mrf.mxu1  ;;  %v4045_v14 = vpop.eup %4044 }
 0x14f   :  { %6936 = vst [vmem:[#allocation57_spill] sm:$0xff] %v5010_v5  ;;  %v5012_v16 = vadd.f32 %v469_v57, %v257_v18  ;;  %v685_v57 = vadd.f32 1.0, %v4043_v51  ;;  %v446_v5 = vadd.f32 %v445_v4, %v257_v18 }
 0x150   :  { %v471_v62 = vpop.f32.mrf.mxu1 }
 0x151   :  { %6937 = vst [vmem:[#allocation58_spill] sm:$0xff] %v5012_v16  ;;  %v5014_v49 = vadd.f32 %v471_v62, %v261_v42  ;;  %v679_v62 = vadd.f32 1.0, %v4045_v14  ;;  %4046 = vrcp.f32 %v685_v57 }
 0x152   :  { %v475_v55 = vpop.f32.mrf.mxu1 }
 0x153   :  { %6938 = vst [vmem:[#allocation59_spill] sm:$0xff] %v5014_v49  ;;  %v5016_v26 = vadd.f32 %v475_v55, %v257_v18  ;;  %4048 = vrcp.f32 %v679_v62 }
 0x154   :  { %v477_v9 = vpop.f32.mrf.mxu1 }
 0x155   :  { %6939 = vst [vmem:[#allocation60_spill] sm:$0xff] %v5016_v26  ;;  %v5018_v63 = vadd.f32 %v477_v9, %v261_v42  ;;  %v448_v9 = vadd.f32 %v447_v20, %v261_v42 }
 0x156   :  { %v481_v52 = vpop.f32.mrf.mxu1 }
 0x157   :  { %6940 = vst [vmem:[#allocation61_spill] sm:$0xff] %v5018_v63  ;;  %v5020_v24 = vadd.f32 %v481_v52, %v257_v18 }
 0x158   :  { %v483_v53 = vpop.f32.mrf.mxu1 }
 0x159   :  { %6941 = vst [vmem:[#allocation62_spill] sm:$0xff] %v5020_v24  ;;  %v5022_v61 = vadd.f32 %v483_v53, %v261_v42 }
 0x15a   :  { %v487_v59 = vpop.f32.mrf.mxu1 }
 0x15b   :  { %6942 = vst [vmem:[#allocation63_spill] sm:$0xff] %v5022_v61  ;;  %v5024_v16 = vadd.f32 %v487_v59, %v257_v18 }
 0x15c   :  { %v489_v49 = vpop.f32.mrf.mxu1 }
 0x15d   :  { %6943 = vst [vmem:[#allocation64_spill] sm:$0xff] %v5024_v16  ;;  %v5026_v55 = vadd.f32 %v489_v49, %v261_v42  ;;  %v6968_v49 = vld [vmem:[#allocation39_spill] sm:$0xff] }
 0x15e   :  { %v667_v26 = vpop.f32.mrf.mxu1  ;;  %v4047_v53 = vpop.eup %4046 }
 0x15f   :  { %6944 = vst [vmem:[#allocation65_spill] sm:$0xff] %v5026_v55  ;;  %v674_v63 = vadd.f32 %v667_v26, %v446_v5  ;;  %v695_v59 = vmul.f32 0.0, %v4047_v53  ;;  %v5099_v26 = vld [vmem:[#allocation8 + $0x1e8] sm:$0xff] }
 0x160   :  { %v669_v52 = vpop.f32.mrf.mxu1  ;;  %v4049_v61 = vpop.eup %4048  ;;  %v5215_v55 = vld [vmem:[#allocation8 + $0x48] sm:$0xff] }
 0x161   :  { %4050 = vtanh.f32 %v674_v63  ;;  %v675_v24 = vadd.f32 %v669_v52, %v448_v9  ;;  %v6970_v63 = vld [vmem:[#allocation28_spill] sm:$0xff]  ;;  %v6972_v52 = vld [vmem:[#allocation42_spill] sm:$0xff] }
 0x163   :  { %v3917_v7 = vmul.f32 -1.442695, %v675_v24 }
 0x165   :  { %4052 = vpow2.f32 %v3917_v7  ;;  %v6966_v7 = vld [vmem:[#allocation27_spill] sm:$0xff] }
 0x16e   :  { %v4051_v51 = vpop.eup %4050 }
 0x16f   :  { %v696_v16 = vmul.f32 %v4051_v51, %v4049_v61  ;;  %v6971_v61 = vld [vmem:[#allocation41_spill] sm:$0xff] }
 0x171   :  { %v5028_v14 = vadd.f32 %v696_v16, %v695_v59  ;;  %v6967_v16 = vmov 0.0  }
 0x172   :  { %v4053_v4 = vpop.eup %4052 }
 0x173   :  { %v692_v18 = vadd.f32 1.0, %v4053_v4  ;;  %4054 = vtanh.f32 %v5028_v14 }
 0x175   :  { %4056 = vrcp.f32 %v692_v18 }
 0x180   :  { %v4055_v20 = vpop.eup %4054 }
 0x182   :  { %v4057_v42 = vpop.eup %4056 }
 0x183   :  { %v5031_v5 = vmul.f32 %v4057_v42, %v4055_v20 }
 0x185   :  { %6945 = vst [vmem:[#allocation66_spill] sm:$0xff] %v5031_v5  ;;  %771 = vmatmul.mubr.f32.vlgmr.msra.gmra.mxu0 %v5031_v5  ;;  %842 = vmatmul.mubr.f32.vlgmr.msra.gmra.mxu1 %v5031_v5  ;;  %v5223_v5 = vld [vmem:[#allocation8 + $0x28] sm:$0xff] }
 0x186   :  { %884 = vmatpush1.msra.mxu0 %v4623_v6  ;;  %955 = vmatpush1.msra.mxu1 %v4788_v28  ;;  %v6946_v6 = vld [vmem:[#allocation17_spill] sm:$0xff] }
 0x187   :  { %885 = vmatprep.subr.mxu0 %v4626_v8  ;;  %956 = vmatprep.subr.mxu1 %v4791_v30  ;;  %v6947_v8 = vld [vmem:[#allocation29_spill] sm:$0xff]  ;;  %6969 = vst [vmem:[#allocation17_spill] sm:$0xff] %v5099_v26 }
 0x188   :  { %886 = vmatpush1.msra.mxu0 %v4629_v10  ;;  %957 = vmatpush1.msra.mxu1 %v4796_v34  ;;  %v6948_v10 = vld [vmem:[#allocation18_spill] sm:$0xff] }
 0x189   :  { %887 = vmatprep.subr.mxu0 %v4631_v11  ;;  %958 = vmatprep.subr.mxu1 %v4800_v36  ;;  %v6949_v11 = vld [vmem:[#allocation30_spill] sm:$0xff] }
 0x18a   :  { %888 = vmatpush1.msra.mxu0 %v4634_v13  ;;  %959 = vmatpush1.msra.mxu1 %v4803_v38  ;;  %v6950_v13 = vld [vmem:[#allocation19_spill] sm:$0xff] }
 0x18b   :  { %889 = vmatprep.subr.mxu0 %v4637_v15  ;;  %960 = vmatprep.subr.mxu1 %v4807_v40  ;;  %v6951_v15 = vld [vmem:[#allocation31_spill] sm:$0xff]  ;;  %6976 = vst [vmem:[#allocation19_spill] sm:$0xff] %v5215_v55 }
 0x18c   :  { %890 = vmatpush1.msra.mxu0 %v4640_v17  ;;  %961 = vmatpush1.msra.mxu1 %v4812_v1  ;;  %v6952_v17 = vld [vmem:[#allocation20_spill] sm:$0xff] }
 0x18d   :  { %891 = vmatprep.subr.mxu0 %v4643_v19  ;;  %962 = vmatprep.subr.mxu1 %v4816_v44  ;;  %v6953_v19 = vld [vmem:[#allocation32_spill] sm:$0xff] }
 0x18e   :  { %892 = vmatpush1.msra.mxu0 %v4646_v21  ;;  %963 = vmatpush1.msra.mxu1 %v4819_v46  ;;  %v6954_v21 = vld [vmem:[#allocation21_spill] sm:$0xff] }
 0x18f   :  { %893 = vmatprep.subr.mxu0 %v4649_v23  ;;  %964 = vmatprep.subr.mxu1 %v4823_v48  ;;  %v6955_v23 = vld [vmem:[#allocation33_spill] sm:$0xff]  ;;  %6978 = vst [vmem:[#allocation21_spill] sm:$0xff] %v5223_v5 }
 0x190   :  { %894 = vmatpush1.msra.mxu0 %v4652_v25  ;;  %965 = vmatpush1.msra.mxu1 %v4828_v12  ;;  %v6956_v25 = vld [vmem:[#allocation22_spill] sm:$0xff] }
 0x191   :  { %895 = vmatprep.subr.mxu0 %v4655_v27  ;;  %966 = vmatprep.subr.mxu1 %v4832_v50  ;;  %v6957_v27 = vld [vmem:[#allocation34_spill] sm:$0xff] }
 0x192   :  { %896 = vmatpush1.msra.mxu0 %v4658_v29  ;;  %967 = vmatpush1.msra.mxu1 %v4835_v54  ;;  %v6958_v29 = vld [vmem:[#allocation23_spill] sm:$0xff] }
 0x193   :  { %897 = vmatprep.subr.mxu0 %v4661_v31  ;;  %968 = vmatprep.subr.mxu1 %v4839_v56  ;;  %v6959_v31 = vld [vmem:[#allocation35_spill] sm:$0xff] }
 0x194   :  { %898 = vmatpush1.msra.mxu0 %v4664_v33  ;;  %969 = vmatpush1.msra.mxu1 %v4844_v22  ;;  %v6960_v33 = vld [vmem:[#allocation24_spill] sm:$0xff] }
 0x195   :  { %899 = vmatprep.subr.mxu0 %v4667_v35  ;;  %970 = vmatprep.subr.mxu1 %v4848_v58  ;;  %v6961_v35 = vld [vmem:[#allocation36_spill] sm:$0xff] }
 0x196   :  { %900 = vmatpush1.msra.mxu0 %v4670_v37  ;;  %971 = vmatpush1.msra.mxu1 %v4851_v60  ;;  %v6962_v37 = vld [vmem:[#allocation25_spill] sm:$0xff] }
 0x197   :  { %901 = vmatprep.subr.mxu0 %v4673_v39  ;;  %972 = vmatprep.subr.mxu1 %v4855_v2  ;;  %v6963_v39 = vld [vmem:[#allocation37_spill] sm:$0xff] }
 0x198   :  { %902 = vmatpush1.msra.mxu0 %v4676_v41  ;;  %973 = vmatpush1.msra.mxu1 %v4860_v32  ;;  %v6964_v41 = vld [vmem:[#allocation26_spill] sm:$0xff] }
 0x199   :  { %903 = vmatprep.subr.mxu0 %v4679_v43  ;;  %974 = vmatprep.subr.mxu1 %v4864_v3  ;;  %v6965_v43 = vld [vmem:[#allocation38_spill] sm:$0xff] }
 0x19a   :  { %904 = vmatpush1.msra.mxu0 %v6946_v6  ;;  %975 = vmatpush1.msra.mxu1 %v6947_v8 }
 0x19b   :  { %905 = vmatprep.subr.mxu0 %v6948_v10  ;;  %976 = vmatprep.subr.mxu1 %v6949_v11 }
 0x19c   :  { %906 = vmatpush1.msra.mxu0 %v6950_v13  ;;  %977 = vmatpush1.msra.mxu1 %v6951_v15 }
 0x19d   :  { %907 = vmatprep.subr.mxu0 %v6952_v17  ;;  %978 = vmatprep.subr.mxu1 %v6953_v19 }
 0x19e   :  { %908 = vmatpush1.msra.mxu0 %v6954_v21  ;;  %979 = vmatpush1.msra.mxu1 %v6955_v23 }
 0x19f   :  { %909 = vmatprep.subr.mxu0 %v6956_v25  ;;  %980 = vmatprep.subr.mxu1 %v6957_v27 }
 0x1a0   :  { %910 = vmatpush1.msra.mxu0 %v6958_v29  ;;  %981 = vmatpush1.msra.mxu1 %v6959_v31 }
 0x1a1   :  { %911 = vmatprep.subr.mxu0 %v6960_v33  ;;  %982 = vmatprep.subr.mxu1 %v6961_v35 }
 0x1a2   :  { %912 = vmatpush1.msra.mxu0 %v6962_v37  ;;  %983 = vmatpush1.msra.mxu1 %v6963_v39 }
 0x1a3   :  { %913 = vmatprep.subr.mxu0 %v6964_v41  ;;  %984 = vmatprep.subr.mxu1 %v6965_v43 }
 0x1a4   :  { %914 = vmatpush1.msra.mxu0 %v6966_v7  ;;  %947 = vmatprep.mubr.f32.mxu0 %v6967_v16 }
 0x1a5   :  { %985 = vmatpush1.msra.mxu1 %v6968_v49  ;;  %1018 = vmatprep.mubr.f32.mxu1 %v6967_v16 }
 0x1a6   :  { %1060 = vmatprep.subr.mxu0 %v5099_v26  ;;  %1131 = vmatprep.subr.mxu1 %v6970_v63 }
 0x245   :  { %v772_v24 = vpop.f32.mrf.mxu0  ;;  %v843_v51 = vpop.f32.mrf.mxu1 }
 0x246   :  { %v848_v57 = vadd.f32 %v772_v24, %v6971_v61  ;;  %v850_v20 = vadd.f32 %v843_v51, %v5000_v0  ;;  %v5139_v51 = vld [vmem:[#allocation8 + $0x180] sm:$0xff] }
 0x247   :  { %v774_v62 = vpop.f32.mrf.mxu0  ;;  %v845_v4 = vpop.f32.mrf.mxu1 }
 0x248   :  { %v3918_v9 = vmul.f32 -1.442695, %v848_v57  ;;  %v849_v53 = vadd.f32 %v774_v62, %v6972_v52  ;;  %v851_v18 = vadd.f32 %v845_v4, %v5002_v47  ;;  %v5115_v57 = vld [vmem:[#allocation8 + $0x1e0] sm:$0xff] }
 0x249   :  { %v5123_v62 = vld [vmem:[#allocation8 + $0x1c0] sm:$0xff] }
 0x24a   :  { %4058 = vpow2.f32 %v3918_v9  ;;  %v3919_v59 = vmul.f32 -1.442695, %v849_v53  ;;  %v3920_v42 = vmul.f32 -1.442695, %v851_v18  ;;  %v5127_v9 = vld [vmem:[#allocation8 + $0x1a8] sm:$0xff]  ;;  %v5131_v52 = vld [vmem:[#allocation8 + $0x1a0] sm:$0xff] }
 0x24b   :  { %v5135_v53 = vld [vmem:[#allocation8 + $0x188] sm:$0xff]  ;;  %v5147_v4 = vld [vmem:[#allocation8 + $0x160] sm:$0xff] }
 0x24c   :  { %4060 = vpow2.f32 %v3919_v59  ;;  %v5143_v59 = vld [vmem:[#allocation8 + $0x168] sm:$0xff] }
 0x24d   :  { %4062 = vtanh.f32 %v850_v20  ;;  %v5151_v18 = vld [vmem:[#allocation8 + $0x148] sm:$0xff]  ;;  %v5155_v20 = vld [vmem:[#allocation8 + $0x140] sm:$0xff] }
 0x24e   :  { %4064 = vpow2.f32 %v3920_v42  ;;  %v5159_v42 = vld [vmem:[#allocation8 + $0x128] sm:$0xff] }
 0x257   :  { %v4059_v6 = vpop.eup %4058 }
 0x258   :  { %v855_v10 = vadd.f32 1.0, %v4059_v6  ;;  %v5163_v6 = vld [vmem:[#allocation8 + $0x120] sm:$0xff] }
 0x259   :  { %v4061_v13 = vpop.eup %4060 }
 0x25a   :  { %4066 = vrcp.f32 %v855_v10  ;;  %v861_v17 = vadd.f32 1.0, %v4061_v13  ;;  %v4063_v21 = vpop.eup %4062  ;;  %v5167_v10 = vld [vmem:[#allocation8 + $0x108] sm:$0xff]  ;;  %v5171_v13 = vld [vmem:[#allocation8 + $0x100] sm:$0xff] }
 0x25b   :  { %v4065_v25 = vpop.eup %4064 }
 0x25c   :  { %4068 = vrcp.f32 %v861_v17  ;;  %v868_v41 = vadd.f32 1.0, %v4065_v25  ;;  %v5175_v17 = vld [vmem:[#allocation8 + $0xe8] sm:$0xff] }
 0x25d   :  { %v5183_v25 = vld [vmem:[#allocation8 + $0xc8] sm:$0xff] }
 0x25e   :  { %4070 = vrcp.f32 %v868_v41  ;;  %v5199_v41 = vld [vmem:[#allocation8 + $0x88] sm:$0xff] }
 0x267   :  { %v4067_v29 = vpop.eup %4066 }
 0x268   :  { %v872_v33 = vmul.f32 %v4067_v29, %v4063_v21  ;;  %v5179_v21 = vld [vmem:[#allocation8 + $0xe0] sm:$0xff] }
 0x269   :  { %v4069_v37 = vpop.eup %4068  ;;  %v5187_v29 = vld [vmem:[#allocation8 + $0xc0] sm:$0xff] }
 0x26a   :  { %v871_v7 = vmul.f32 %v4069_v37, %v5028_v14  ;;  %v5119_v14 = vld [vmem:[#allocation8 + $0x1c8] sm:$0xff]  ;;  %v5195_v37 = vld [vmem:[#allocation8 + $0xa0] sm:$0xff] }
 0x26b   :  { %v4071_v0 = vpop.eup %4070 }
 0x26c   :  { %v5108_v47 = vadd.f32 %v872_v33, %v871_v7  ;;  %v5191_v33 = vld [vmem:[#allocation8 + $0xa8] sm:$0xff]  ;;  %v5203_v7 = vld [vmem:[#allocation8 + $0x80] sm:$0xff] }
 0x26e   :  { %4072 = vtanh.f32 %v5108_v47 }
 0x27b   :  { %v4073_v24 = vpop.eup %4072 }
 0x27c   :  { %v5111_v61 = vmul.f32 %v4073_v24, %v4071_v0  ;;  %v5207_v0 = vld [vmem:[#allocation8 + $0x68] sm:$0xff]  ;;  %v5211_v24 = vld [vmem:[#allocation8 + $0x60] sm:$0xff] }
 0x27d   :  { %6974 = vst [vmem:[#allocation18_spill] sm:$0xff] %v5207_v0  ;;  %6975 = vst [vmem:[#allocation30_spill] sm:$0xff] %v5211_v24 }
 0x27e   :  { %6973 = vst [vmem:[#allocation29_spill] sm:$0xff] %v5111_v61  ;;  %948 = vmatmul.mubr.f32.vlgmr.msra.gmra.mxu0 %v5111_v61  ;;  %1019 = vmatmul.mubr.f32.vlgmr.msra.gmra.mxu1 %v5111_v61  ;;  %v5219_v61 = vld [vmem:[#allocation8 + $0x40] sm:$0xff] }
 0x27f   :  { %1061 = vmatpush1.msra.mxu0 %v5115_v57  ;;  %1132 = vmatpush1.msra.mxu1 %v4788_v28  ;;  %6977 = vst [vmem:[#allocation20_spill] sm:$0xff] %v5219_v61 }
 0x280   :  { %1062 = vmatprep.subr.mxu0 %v5119_v14  ;;  %1133 = vmatprep.subr.mxu1 %v4791_v30 }
 0x281   :  { %1063 = vmatpush1.msra.mxu0 %v5123_v62  ;;  %1134 = vmatpush1.msra.mxu1 %v4796_v34 }
 0x282   :  { %1064 = vmatprep.subr.mxu0 %v5127_v9  ;;  %1135 = vmatprep.subr.mxu1 %v4800_v36 }
 0x283   :  { %1065 = vmatpush1.msra.mxu0 %v5131_v52  ;;  %1136 = vmatpush1.msra.mxu1 %v4803_v38 }
 0x284   :  { %1066 = vmatprep.subr.mxu0 %v5135_v53  ;;  %1137 = vmatprep.subr.mxu1 %v4807_v40 }
 0x285   :  { %1067 = vmatpush1.msra.mxu0 %v5139_v51  ;;  %1138 = vmatpush1.msra.mxu1 %v4812_v1 }
 0x286   :  { %1068 = vmatprep.subr.mxu0 %v5143_v59  ;;  %1139 = vmatprep.subr.mxu1 %v4816_v44 }
 0x287   :  { %1069 = vmatpush1.msra.mxu0 %v5147_v4  ;;  %1140 = vmatpush1.msra.mxu1 %v4819_v46 }
 0x288   :  { %1070 = vmatprep.subr.mxu0 %v5151_v18  ;;  %1141 = vmatprep.subr.mxu1 %v4823_v48 }
 0x289   :  { %1071 = vmatpush1.msra.mxu0 %v5155_v20  ;;  %1142 = vmatpush1.msra.mxu1 %v4828_v12 }
 0x28a   :  { %1072 = vmatprep.subr.mxu0 %v5159_v42  ;;  %1143 = vmatprep.subr.mxu1 %v4832_v50 }
 0x28b   :  { %1073 = vmatpush1.msra.mxu0 %v5163_v6  ;;  %1144 = vmatpush1.msra.mxu1 %v4835_v54 }
 0x28c   :  { %1074 = vmatprep.subr.mxu0 %v5167_v10  ;;  %1145 = vmatprep.subr.mxu1 %v4839_v56 }
 0x28d   :  { %1075 = vmatpush1.msra.mxu0 %v5171_v13  ;;  %1146 = vmatpush1.msra.mxu1 %v4844_v22 }
 0x28e   :  { %1076 = vmatprep.subr.mxu0 %v5175_v17  ;;  %1147 = vmatprep.subr.mxu1 %v4848_v58 }
 0x28f   :  { %1077 = vmatpush1.msra.mxu0 %v5179_v21  ;;  %1148 = vmatpush1.msra.mxu1 %v4851_v60 }
 0x290   :  { %1078 = vmatprep.subr.mxu0 %v5183_v25  ;;  %1149 = vmatprep.subr.mxu1 %v4855_v2 }
 0x291   :  { %1079 = vmatpush1.msra.mxu0 %v5187_v29  ;;  %1150 = vmatpush1.msra.mxu1 %v4860_v32 }
 0x292   :  { %1080 = vmatprep.subr.mxu0 %v5191_v33  ;;  %1151 = vmatprep.subr.mxu1 %v4864_v3 }
 0x293   :  { %1081 = vmatpush1.msra.mxu0 %v5195_v37  ;;  %1152 = vmatpush1.msra.mxu1 %v6947_v8 }
 0x294   :  { %1082 = vmatprep.subr.mxu0 %v5199_v41  ;;  %1153 = vmatprep.subr.mxu1 %v6949_v11 }
 0x295   :  { %1083 = vmatpush1.msra.mxu0 %v5203_v7  ;;  %1154 = vmatpush1.msra.mxu1 %v6951_v15 }
 0x296   :  { %1084 = vmatprep.subr.mxu0 %v5207_v0  ;;  %1155 = vmatprep.subr.mxu1 %v6953_v19  ;;  %v6984_v19 = vld [vmem:[#allocation55_spill] sm:$0xff] }
 0x297   :  { %1085 = vmatpush1.msra.mxu0 %v5211_v24  ;;  %1156 = vmatpush1.msra.mxu1 %v6955_v23  ;;  %v5227_v24 = vld [vmem:[#allocation8 + $0x20] sm:$0xff] }
 0x298   :  { %1086 = vmatprep.subr.mxu0 %v5215_v55  ;;  %1157 = vmatprep.subr.mxu1 %v6957_v27  ;;  %6979 = vst [vmem:[#allocation22_spill] sm:$0xff] %v5227_v24  ;;  %v5231_v55 = vld [vmem:[#allocation8 + $0x8] sm:$0xff] }
 0x299   :  { %1087 = vmatpush1.msra.mxu0 %v5219_v61  ;;  %1158 = vmatpush1.msra.mxu1 %v6959_v31  ;;  %6980 = vst [vmem:[#allocation23_spill] sm:$0xff] %v5231_v55  ;;  %v5235_v61 = vld [vmem:[#allocation8] sm:$0xff] }
 0x29a   :  { %1088 = vmatprep.subr.mxu0 %v5223_v5  ;;  %1159 = vmatprep.subr.mxu1 %v6961_v35  ;;  %6981 = vst [vmem:[#allocation24_spill] sm:$0xff] %v5235_v61 }
 0x29b   :  { %1089 = vmatpush1.msra.mxu0 %v5227_v24  ;;  %1160 = vmatpush1.msra.mxu1 %v6963_v39  ;;  %v6982_v24 = vld [vmem:[#allocation43_spill] sm:$0xff] }
 0x29c   :  { %1090 = vmatprep.subr.mxu0 %v5231_v55  ;;  %1161 = vmatprep.subr.mxu1 %v6965_v43  ;;  %v6983_v43 = vld [vmem:[#allocation44_spill] sm:$0xff] }
 0x29d   :  { %1091 = vmatpush1.msra.mxu0 %v5235_v61  ;;  %1124 = vmatprep.mubr.f32.mxu0 %v6967_v16 }
 0x29e   :  { %1162 = vmatpush1.msra.mxu1 %v6968_v49  ;;  %1195 = vmatprep.mubr.f32.mxu1 %v6967_v16 }
 0x29f   :  { %1237 = vmatprep.subr.mxu0 %v5099_v26  ;;  %1308 = vmatprep.subr.mxu1 %v6970_v63 }
 0x33e   :  { %v949_v39 = vpop.f32.mrf.mxu0  ;;  %v1020_v27 = vpop.f32.mrf.mxu1 }
 0x33f   :  { %v1025_v35 = vadd.f32 %v949_v39, %v6982_v24  ;;  %v1027_v16 = vadd.f32 %v1020_v27, %v6984_v19 }
 0x340   :  { %v951_v55 = vpop.f32.mrf.mxu0  ;;  %v1022_v23 = vpop.f32.mrf.mxu1 }
 0x341   :  { %v3921_v5 = vmul.f32 -1.442695, %v1025_v35  ;;  %v1026_v31 = vadd.f32 %v951_v55, %v6983_v43  ;;  %v1028_v49 = vadd.f32 %v1022_v23, %v5006_v45 }
 0x343   :  { %4074 = vpow2.f32 %v3921_v5  ;;  %v3922_v61 = vmul.f32 -1.442695, %v1026_v31  ;;  %v3923_v0 = vmul.f32 -1.442695, %v1028_v49 }
 0x345   :  { %4076 = vpow2.f32 %v3922_v61 }
 0x346   :  { %4078 = vtanh.f32 %v1027_v16 }
 0x347   :  { %4080 = vpow2.f32 %v3923_v0 }
 0x350   :  { %v4075_v26 = vpop.eup %4074 }
 0x351   :  { %v1032_v15 = vadd.f32 1.0, %v4075_v26  ;;  %v7007_v26 = vld [vmem:[#allocation46_spill] sm:$0xff] }
 0x352   :  { %v4077_v63 = vpop.eup %4076 }
 0x353   :  { %4082 = vrcp.f32 %v1032_v15  ;;  %v1038_v39 = vadd.f32 1.0, %v4077_v63  ;;  %v4079_v35 = vpop.eup %4078 }
 0x354   :  { %v4081_v55 = vpop.eup %4080 }
 0x355   :  { %4084 = vrcp.f32 %v1038_v39  ;;  %v1045_v61 = vadd.f32 1.0, %v4081_v55 }
 0x357   :  { %4086 = vrcp.f32 %v1045_v61 }
 0x360   :  { %v4083_v5 = vpop.eup %4082 }
 0x361   :  { %v1049_v43 = vmul.f32 %v4083_v5, %v4079_v35  ;;  %v7008_v35 = vld [vmem:[#allocation57_spill] sm:$0xff]  ;;  %v7009_v5 = vld [vmem:[#allocation56_spill] sm:$0xff] }
 0x362   :  { %v4085_v31 = vpop.eup %4084 }
 0x363   :  { %v1048_v24 = vmul.f32 %v4085_v31, %v5108_v47 }
 0x364   :  { %v4087_v19 = vpop.eup %4086 }
 0x365   :  { %v5248_v45 = vadd.f32 %v1049_v43, %v1048_v24 }
 0x367   :  { %4088 = vtanh.f32 %v5248_v45 }
 0x374   :  { %v4089_v23 = vpop.eup %4088 }
 0x375   :  { %v5251_v27 = vmul.f32 %v4089_v23, %v4087_v19 }
 0x377   :  { %6985 = vst [vmem:[#allocation25_spill] sm:$0xff] %v5251_v27  ;;  %1125 = vmatmul.mubr.f32.vlgmr.msra.gmra.mxu0 %v5251_v27  ;;  %1196 = vmatmul.mubr.f32.vlgmr.msra.gmra.mxu1 %v5251_v27  ;;  %v5448_v27 = vld [vmem:[#allocation8 + $0x30] sm:$0xff] }
 0x378   :  { %1238 = vmatpush1.msra.mxu0 %v5115_v57  ;;  %1309 = vmatpush1.msra.mxu1 %v4788_v28  ;;  %v6986_v28 = vld [vmem:[#allocation31_spill] sm:$0xff] }
 0x379   :  { %1239 = vmatprep.subr.mxu0 %v5119_v14  ;;  %1310 = vmatprep.subr.mxu1 %v4791_v30  ;;  %v6987_v30 = vld [vmem:[#allocation18_spill] sm:$0xff]  ;;  %7017 = vst [vmem:[#allocation31_spill] sm:$0xff] %v5448_v27 }
 0x37a   :  { %1240 = vmatpush1.msra.mxu0 %v5123_v62  ;;  %1311 = vmatpush1.msra.mxu1 %v4796_v34  ;;  %v6988_v34 = vld [vmem:[#allocation32_spill] sm:$0xff] }
 0x37b   :  { %1241 = vmatprep.subr.mxu0 %v5127_v9  ;;  %1312 = vmatprep.subr.mxu1 %v4800_v36  ;;  %v6989_v36 = vld [vmem:[#allocation30_spill] sm:$0xff] }
 0x37c   :  { %1242 = vmatpush1.msra.mxu0 %v5131_v52  ;;  %1313 = vmatpush1.msra.mxu1 %v4803_v38  ;;  %v6990_v38 = vld [vmem:[#allocation33_spill] sm:$0xff] }
 0x37d   :  { %1243 = vmatprep.subr.mxu0 %v5135_v53  ;;  %1314 = vmatprep.subr.mxu1 %v4807_v40  ;;  %v6991_v40 = vld [vmem:[#allocation19_spill] sm:$0xff] }
 0x37e   :  { %1244 = vmatpush1.msra.mxu0 %v5139_v51  ;;  %1315 = vmatpush1.msra.mxu1 %v4812_v1  ;;  %v6992_v1 = vld [vmem:[#allocation34_spill] sm:$0xff] }
 0x37f   :  { %1245 = vmatprep.subr.mxu0 %v5143_v59  ;;  %1316 = vmatprep.subr.mxu1 %v4816_v44  ;;  %v6993_v44 = vld [vmem:[#allocation20_spill] sm:$0xff] }
 0x380   :  { %1246 = vmatpush1.msra.mxu0 %v5147_v4  ;;  %1317 = vmatpush1.msra.mxu1 %v4819_v46  ;;  %v6994_v46 = vld [vmem:[#allocation35_spill] sm:$0xff] }
 0x381   :  { %1247 = vmatprep.subr.mxu0 %v5151_v18  ;;  %1318 = vmatprep.subr.mxu1 %v4823_v48  ;;  %v6995_v48 = vld [vmem:[#allocation21_spill] sm:$0xff] }
 0x382   :  { %1248 = vmatpush1.msra.mxu0 %v5155_v20  ;;  %1319 = vmatpush1.msra.mxu1 %v4828_v12  ;;  %v6996_v12 = vld [vmem:[#allocation36_spill] sm:$0xff] }
 0x383   :  { %1249 = vmatprep.subr.mxu0 %v5159_v42  ;;  %1320 = vmatprep.subr.mxu1 %v4832_v50  ;;  %v6997_v50 = vld [vmem:[#allocation22_spill] sm:$0xff] }
 0x384   :  { %1250 = vmatpush1.msra.mxu0 %v5163_v6  ;;  %1321 = vmatpush1.msra.mxu1 %v4835_v54  ;;  %v6998_v54 = vld [vmem:[#allocation37_spill] sm:$0xff] }
 0x385   :  { %1251 = vmatprep.subr.mxu0 %v5167_v10  ;;  %1322 = vmatprep.subr.mxu1 %v4839_v56  ;;  %v6999_v56 = vld [vmem:[#allocation23_spill] sm:$0xff] }
 0x386   :  { %1252 = vmatpush1.msra.mxu0 %v5171_v13  ;;  %1323 = vmatpush1.msra.mxu1 %v4844_v22  ;;  %v7000_v22 = vld [vmem:[#allocation38_spill] sm:$0xff] }
 0x387   :  { %1253 = vmatprep.subr.mxu0 %v5175_v17  ;;  %1324 = vmatprep.subr.mxu1 %v4848_v58  ;;  %v7001_v58 = vld [vmem:[#allocation24_spill] sm:$0xff] }
 0x388   :  { %1254 = vmatpush1.msra.mxu0 %v5179_v21  ;;  %1325 = vmatpush1.msra.mxu1 %v4851_v60  ;;  %v7002_v60 = vmov 0.0  }
 0x389   :  { %1255 = vmatprep.subr.mxu0 %v5183_v25  ;;  %1326 = vmatprep.subr.mxu1 %v4855_v2  ;;  %v7003_v2 = vld [vmem:[#allocation39_spill] sm:$0xff] }
 0x38a   :  { %1256 = vmatpush1.msra.mxu0 %v5187_v29  ;;  %1327 = vmatpush1.msra.mxu1 %v4860_v32  ;;  %v7004_v32 = vld [vmem:[#allocation17_spill] sm:$0xff] }
 0x38b   :  { %1257 = vmatprep.subr.mxu0 %v5191_v33  ;;  %1328 = vmatprep.subr.mxu1 %v4864_v3  ;;  %v5320_v3 = vld [vmem:[#allocation8 + $0x1f8] sm:$0xff] }
 0x38c   :  { %1258 = vmatpush1.msra.mxu0 %v5195_v37  ;;  %1329 = vmatpush1.msra.mxu1 %v6947_v8  ;;  %7005 = vst [vmem:[#allocation26_spill] sm:$0xff] %v5320_v3 }
 0x38d   :  { %1259 = vmatprep.subr.mxu0 %v5199_v41  ;;  %1330 = vmatprep.subr.mxu1 %v6949_v11  ;;  %v7006_v11 = vld [vmem:[#allocation45_spill] sm:$0xff] }
 0x38e   :  { %1260 = vmatpush1.msra.mxu0 %v5203_v7  ;;  %1331 = vmatpush1.msra.mxu1 %v6986_v28 }
 0x38f   :  { %1261 = vmatprep.subr.mxu0 %v6987_v30  ;;  %1332 = vmatprep.subr.mxu1 %v6988_v34 }
 0x390   :  { %1262 = vmatpush1.msra.mxu0 %v6989_v36  ;;  %1333 = vmatpush1.msra.mxu1 %v6990_v38 }
 0x391   :  { %1263 = vmatprep.subr.mxu0 %v6991_v40  ;;  %1334 = vmatprep.subr.mxu1 %v6992_v1 }
 0x392   :  { %1264 = vmatpush1.msra.mxu0 %v6993_v44  ;;  %1335 = vmatpush1.msra.mxu1 %v6994_v46 }
 0x393   :  { %1265 = vmatprep.subr.mxu0 %v6995_v48  ;;  %1336 = vmatprep.subr.mxu1 %v6996_v12 }
 0x394   :  { %1266 = vmatpush1.msra.mxu0 %v6997_v50  ;;  %1337 = vmatpush1.msra.mxu1 %v6998_v54 }
 0x395   :  { %1267 = vmatprep.subr.mxu0 %v6999_v56  ;;  %1338 = vmatprep.subr.mxu1 %v7000_v22 }
 0x396   :  { %1268 = vmatpush1.msra.mxu0 %v7001_v58  ;;  %1301 = vmatprep.mubr.f32.mxu0 %v7002_v60 }
 0x397   :  { %1339 = vmatpush1.msra.mxu1 %v7003_v2  ;;  %1372 = vmatprep.mubr.f32.mxu1 %v7002_v60 }
 0x398   :  { %1414 = vmatprep.subr.mxu0 %v7004_v32  ;;  %1485 = vmatprep.subr.mxu1 %v5320_v3 }
 0x437   :  { %v1126_v8 = vpop.f32.mrf.mxu0  ;;  %v1197_v0 = vpop.f32.mrf.mxu1 }
 0x438   :  { %v1202_v15 = vadd.f32 %v1126_v8, %v7006_v11  ;;  %v1204_v43 = vadd.f32 %v1197_v0, %v7009_v5  ;;  %v5360_v0 = vld [vmem:[#allocation8 + $0x190] sm:$0xff]  ;;  %v5380_v5 = vld [vmem:[#allocation8 + $0x138] sm:$0xff] }
 0x439   :  { %v1128_v16 = vpop.f32.mrf.mxu0  ;;  %v1199_v39 = vpop.f32.mrf.mxu1 }
 0x43a   :  { %v3924_v49 = vmul.f32 -1.442695, %v1202_v15  ;;  %v1203_v47 = vadd.f32 %v1128_v16, %v7007_v26  ;;  %v1205_v55 = vadd.f32 %v1199_v39, %v7008_v35  ;;  %v5336_v15 = vld [vmem:[#allocation8 + $0x1f0] sm:$0xff]  ;;  %v5372_v35 = vld [vmem:[#allocation8 + $0x158] sm:$0xff] }
 0x43b   :  { %v5344_v16 = vld [vmem:[#allocation8 + $0x1d0] sm:$0xff] }
 0x43c   :  { %4090 = vpow2.f32 %v3924_v49  ;;  %v3925_v63 = vmul.f32 -1.442695, %v1203_v47  ;;  %v3926_v31 = vmul.f32 -1.442695, %v1205_v55  ;;  %v5348_v49 = vld [vmem:[#allocation8 + $0x1b8] sm:$0xff]  ;;  %v5352_v26 = vld [vmem:[#allocation8 + $0x1b0] sm:$0xff] }
 0x43d   :  { %v5356_v47 = vld [vmem:[#allocation8 + $0x198] sm:$0xff]  ;;  %v5368_v39 = vld [vmem:[#allocation8 + $0x170] sm:$0xff] }
 0x43e   :  { %4092 = vpow2.f32 %v3925_v63  ;;  %v5364_v63 = vld [vmem:[#allocation8 + $0x178] sm:$0xff]  ;;  %v5376_v55 = vld [vmem:[#allocation8 + $0x150] sm:$0xff] }
 0x43f   :  { %4094 = vtanh.f32 %v1204_v43  ;;  %v5384_v43 = vld [vmem:[#allocation8 + $0x130] sm:$0xff] }
 0x440   :  { %4096 = vpow2.f32 %v3926_v31  ;;  %v5388_v31 = vld [vmem:[#allocation8 + $0x118] sm:$0xff] }
 0x449   :  { %v4091_v61 = vpop.eup %4090 }
 0x44a   :  { %v1209_v24 = vadd.f32 1.0, %v4091_v61  ;;  %v5392_v61 = vld [vmem:[#allocation8 + $0x110] sm:$0xff] }
 0x44b   :  { %v4093_v19 = vpop.eup %4092 }
 0x44c   :  { %4098 = vrcp.f32 %v1209_v24  ;;  %v1215_v23 = vadd.f32 1.0, %v4093_v19  ;;  %v4095_v28 = vpop.eup %4094  ;;  %v5396_v24 = vld [vmem:[#allocation8 + $0xf8] sm:$0xff]  ;;  %v5400_v19 = vld [vmem:[#allocation8 + $0xf0] sm:$0xff] }
 0x44d   :  { %v4097_v34 = vpop.eup %4096 }
 0x44e   :  { %4100 = vrcp.f32 %v1215_v23  ;;  %v1222_v12 = vadd.f32 1.0, %v4097_v34  ;;  %v5404_v23 = vld [vmem:[#allocation8 + $0xd8] sm:$0xff] }
 0x44f   :  { %v5412_v34 = vld [vmem:[#allocation8 + $0xb8] sm:$0xff] }
 0x450   :  { %4102 = vrcp.f32 %v1222_v12  ;;  %v5428_v12 = vld [vmem:[#allocation8 + $0x78] sm:$0xff] }
 0x451   :  { %7012 = vst [vmem:[#allocation41_spill] sm:$0xff] %v5428_v12 }
 0x459   :  { %v4099_v38 = vpop.eup %4098 }
 0x45a   :  { %v1226_v1 = vmul.f32 %v4099_v38, %v4095_v28  ;;  %v5408_v28 = vld [vmem:[#allocation8 + $0xd0] sm:$0xff] }
 0x45b   :  { %v4101_v46 = vpop.eup %4100  ;;  %v5416_v38 = vld [vmem:[#allocation8 + $0xb0] sm:$0xff] }
 0x45c   :  { %v1225_v54 = vmul.f32 %v4101_v46, %v5248_v45  ;;  %v5340_v45 = vld [vmem:[#allocation8 + $0x1d8] sm:$0xff]  ;;  %v5424_v46 = vld [vmem:[#allocation8 + $0x90] sm:$0xff] }
 0x45d   :  { %v4103_v2 = vpop.eup %4102  ;;  %7011 = vst [vmem:[#allocation28_spill] sm:$0xff] %v5424_v46 }
 0x45e   :  { %v5328_v22 = vadd.f32 %v1226_v1, %v1225_v54  ;;  %v5420_v1 = vld [vmem:[#allocation8 + $0x98] sm:$0xff]  ;;  %v5432_v54 = vld [vmem:[#allocation8 + $0x70] sm:$0xff] }
 0x45f   :  { %7013 = vst [vmem:[#allocation42_spill] sm:$0xff] %v5432_v54 }
 0x460   :  { %4104 = vtanh.f32 %v5328_v22 }
 0x46d   :  { %v4105_v8 = vpop.eup %4104 }
 0x46e   :  { %v5331_v11 = vmul.f32 %v4105_v8, %v4103_v2  ;;  %v5436_v2 = vld [vmem:[#allocation8 + $0x58] sm:$0xff]  ;;  %v5440_v8 = vld [vmem:[#allocation8 + $0x50] sm:$0xff] }
 0x46f   :  { %7014 = vst [vmem:[#allocation43_spill] sm:$0xff] %v5436_v2  ;;  %7015 = vst [vmem:[#allocation44_spill] sm:$0xff] %v5440_v8 }
 0x470   :  { %7010 = vst [vmem:[#allocation27_spill] sm:$0xff] %v5331_v11  ;;  %1302 = vmatmul.mubr.f32.vlgmr.msra.gmra.mxu0 %v5331_v11  ;;  %1373 = vmatmul.mubr.f32.vlgmr.msra.gmra.mxu1 %v5331_v11  ;;  %v5444_v11 = vld [vmem:[#allocation8 + $0x38] sm:$0xff] }
 0x471   :  { %1415 = vmatpush1.msra.mxu0 %v5115_v57  ;;  %1486 = vmatpush1.msra.mxu1 %v5336_v15  ;;  %7016 = vst [vmem:[#allocation55_spill] sm:$0xff] %v5444_v11 }
 0x472   :  { %1416 = vmatprep.subr.mxu0 %v5119_v14  ;;  %1487 = vmatprep.subr.mxu1 %v5340_v45 }
 0x473   :  { %1417 = vmatpush1.msra.mxu0 %v5123_v62  ;;  %1488 = vmatpush1.msra.mxu1 %v5344_v16 }
 0x474   :  { %1418 = vmatprep.subr.mxu0 %v5127_v9  ;;  %1489 = vmatprep.subr.mxu1 %v5348_v49 }
 0x475   :  { %1419 = vmatpush1.msra.mxu0 %v5131_v52  ;;  %1490 = vmatpush1.msra.mxu1 %v5352_v26 }
 0x476   :  { %1420 = vmatprep.subr.mxu0 %v5135_v53  ;;  %1491 = vmatprep.subr.mxu1 %v5356_v47 }
 0x477   :  { %1421 = vmatpush1.msra.mxu0 %v5139_v51  ;;  %1492 = vmatpush1.msra.mxu1 %v5360_v0 }
 0x478   :  { %1422 = vmatprep.subr.mxu0 %v5143_v59  ;;  %1493 = vmatprep.subr.mxu1 %v5364_v63 }
 0x479   :  { %1423 = vmatpush1.msra.mxu0 %v5147_v4  ;;  %1494 = vmatpush1.msra.mxu1 %v5368_v39 }
 0x47a   :  { %1424 = vmatprep.subr.mxu0 %v5151_v18  ;;  %1495 = vmatprep.subr.mxu1 %v5372_v35 }
 0x47b   :  { %1425 = vmatpush1.msra.mxu0 %v5155_v20  ;;  %1496 = vmatpush1.msra.mxu1 %v5376_v55 }
 0x47c   :  { %1426 = vmatprep.subr.mxu0 %v5159_v42  ;;  %1497 = vmatprep.subr.mxu1 %v5380_v5 }
 0x47d   :  { %1427 = vmatpush1.msra.mxu0 %v5163_v6  ;;  %1498 = vmatpush1.msra.mxu1 %v5384_v43 }
 0x47e   :  { %1428 = vmatprep.subr.mxu0 %v5167_v10  ;;  %1499 = vmatprep.subr.mxu1 %v5388_v31 }
 0x47f   :  { %1429 = vmatpush1.msra.mxu0 %v5171_v13  ;;  %1500 = vmatpush1.msra.mxu1 %v5392_v61 }
 0x480   :  { %1430 = vmatprep.subr.mxu0 %v5175_v17  ;;  %1501 = vmatprep.subr.mxu1 %v5396_v24 }
 0x481   :  { %1431 = vmatpush1.msra.mxu0 %v5179_v21  ;;  %1502 = vmatpush1.msra.mxu1 %v5400_v19 }
 0x482   :  { %1432 = vmatprep.subr.mxu0 %v5183_v25  ;;  %1503 = vmatprep.subr.mxu1 %v5404_v23 }
 0x483   :  { %1433 = vmatpush1.msra.mxu0 %v5187_v29  ;;  %1504 = vmatpush1.msra.mxu1 %v5408_v28 }
 0x484   :  { %1434 = vmatprep.subr.mxu0 %v5191_v33  ;;  %1505 = vmatprep.subr.mxu1 %v5412_v34 }
 0x485   :  { %1435 = vmatpush1.msra.mxu0 %v5195_v37  ;;  %1506 = vmatpush1.msra.mxu1 %v5416_v38 }
 0x486   :  { %1436 = vmatprep.subr.mxu0 %v5199_v41  ;;  %1507 = vmatprep.subr.mxu1 %v5420_v1 }
 0x487   :  { %1437 = vmatpush1.msra.mxu0 %v5203_v7  ;;  %1508 = vmatpush1.msra.mxu1 %v5424_v46 }
 0x488   :  { %1438 = vmatprep.subr.mxu0 %v6987_v30  ;;  %1509 = vmatprep.subr.mxu1 %v5428_v12  ;;  %v7023_v12 = vld [vmem:[#allocation58_spill] sm:$0xff] }
 0x489   :  { %1439 = vmatpush1.msra.mxu0 %v6989_v36  ;;  %1510 = vmatpush1.msra.mxu1 %v5432_v54  ;;  %v7022_v36 = vld [vmem:[#allocation59_spill] sm:$0xff] }
 0x48a   :  { %1440 = vmatprep.subr.mxu0 %v6991_v40  ;;  %1511 = vmatprep.subr.mxu1 %v5436_v2  ;;  %v5452_v2 = vld [vmem:[#allocation8 + $0x18] sm:$0xff] }
 0x48b   :  { %1441 = vmatpush1.msra.mxu0 %v6993_v44  ;;  %1512 = vmatpush1.msra.mxu1 %v5440_v8  ;;  %7018 = vst [vmem:[#allocation32_spill] sm:$0xff] %v5452_v2 }
 0x48c   :  { %1442 = vmatprep.subr.mxu0 %v6995_v48  ;;  %1513 = vmatprep.subr.mxu1 %v5444_v11  ;;  %v5457_v48 = vld [vmem:[#allocation8 + $0x10] sm:$0xff] }
 0x48d   :  { %1443 = vmatpush1.msra.mxu0 %v6997_v50  ;;  %1514 = vmatpush1.msra.mxu1 %v5448_v27  ;;  %7019 = vst [vmem:[#allocation33_spill] sm:$0xff] %v5457_v48 }
 0x48e   :  { %1444 = vmatprep.subr.mxu0 %v6999_v56  ;;  %1515 = vmatprep.subr.mxu1 %v5452_v2  ;;  %v7020_v56 = vld [vmem:[#allocation47_spill] sm:$0xff]  ;;  %v7021_v2 = vld [vmem:[#allocation48_spill] sm:$0xff] }
 0x48f   :  { %1445 = vmatpush1.msra.mxu0 %v7001_v58  ;;  %1478 = vmatprep.mubr.f32.mxu0 %v7002_v60 }
 0x490   :  { %1516 = vmatpush1.msra.mxu1 %v5457_v48  ;;  %1549 = vmatprep.mubr.f32.mxu1 %v7002_v60 }
 0x491   :  { %1591 = vmatprep.subr.mxu0 %v7004_v32  ;;  %1662 = vmatprep.subr.mxu1 %v5320_v3 }
 0x530   :  { %v1303_v27 = vpop.f32.mrf.mxu0  ;;  %v1374_v58 = vpop.f32.mrf.mxu1 }
 0x531   :  { %v1379_v50 = vadd.f32 %v1303_v27, %v7020_v56  ;;  %v1381_v60 = vadd.f32 %v1374_v58, %v7023_v12  ;;  %v7030_v12 = vld [vmem:[#allocation19_spill] sm:$0xff] }
 0x532   :  { %v1305_v11 = vpop.f32.mrf.mxu0  ;;  %v1376_v54 = vpop.f32.mrf.mxu1 }
 0x533   :  { %v3927_v8 = vmul.f32 -1.442695, %v1379_v50  ;;  %v1380_v44 = vadd.f32 %v1305_v11, %v7021_v2  ;;  %v1382_v48 = vadd.f32 %v1376_v54, %v7022_v36  ;;  %v7031_v54 = vld [vmem:[#allocation43_spill] sm:$0xff] }
 0x535   :  { %4106 = vpow2.f32 %v3927_v8  ;;  %v3928_v40 = vmul.f32 -1.442695, %v1380_v44  ;;  %v3929_v30 = vmul.f32 -1.442695, %v1382_v48 }
 0x537   :  { %4108 = vpow2.f32 %v3928_v40 }
 0x538   :  { %4110 = vtanh.f32 %v1381_v60 }
 0x539   :  { %4112 = vpow2.f32 %v3929_v30  ;;  %v7025_v30 = vld [vmem:[#allocation28_spill] sm:$0xff] }
 0x542   :  { %v4107_v32 = vpop.eup %4106 }
 0x543   :  { %v1386_v46 = vadd.f32 1.0, %v4107_v32  ;;  %v7026_v32 = vld [vmem:[#allocation18_spill] sm:$0xff] }
 0x544   :  { %v4109_v3 = vpop.eup %4108 }
 0x545   :  { %4114 = vrcp.f32 %v1386_v46  ;;  %v1392_v27 = vadd.f32 1.0, %v4109_v3  ;;  %v4111_v50 = vpop.eup %4110  ;;  %v7027_v3 = vld [vmem:[#allocation41_spill] sm:$0xff]  ;;  %v7029_v46 = vld [vmem:[#allocation42_spill] sm:$0xff] }
 0x546   :  { %v4113_v56 = vpop.eup %4112 }
 0x547   :  { %4116 = vrcp.f32 %v1392_v27  ;;  %v1399_v40 = vadd.f32 1.0, %v4113_v56  ;;  %v7032_v27 = vld [vmem:[#allocation20_spill] sm:$0xff]  ;;  %v7034_v56 = vld [vmem:[#allocation21_spill] sm:$0xff] }
 0x549   :  { %4118 = vrcp.f32 %v1399_v40  ;;  %v7038_v40 = vld [vmem:[#allocation23_spill] sm:$0xff] }
 0x552   :  { %v4115_v11 = vpop.eup %4114 }
 0x553   :  { %v1403_v2 = vmul.f32 %v4115_v11, %v4111_v50  ;;  %v7033_v50 = vld [vmem:[#allocation44_spill] sm:$0xff]  ;;  %v7035_v11 = vld [vmem:[#allocation55_spill] sm:$0xff] }
 0x554   :  { %v4117_v44 = vpop.eup %4116 }
 0x555   :  { %v1402_v8 = vmul.f32 %v4117_v44, %v5328_v22  ;;  %v7028_v22 = vld [vmem:[#allocation30_spill] sm:$0xff]  ;;  %v7037_v44 = vld [vmem:[#allocation31_spill] sm:$0xff] }
 0x556   :  { %v4119_v48 = vpop.eup %4118 }
 0x557   :  { %v5468_v36 = vadd.f32 %v1403_v2, %v1402_v8  ;;  %v7036_v2 = vld [vmem:[#allocation22_spill] sm:$0xff]  ;;  %v7039_v8 = vld [vmem:[#allocation32_spill] sm:$0xff] }
 0x559   :  { %4120 = vtanh.f32 %v5468_v36 }
 0x566   :  { %v4121_v58 = vpop.eup %4120 }
 0x567   :  { %v5471_v60 = vmul.f32 %v4121_v58, %v4119_v48  ;;  %v7040_v48 = vld [vmem:[#allocation24_spill] sm:$0xff]  ;;  %v7041_v58 = vmov 0.0  }
 0x569   :  { %7024 = vst [vmem:[#allocation34_spill] sm:$0xff] %v5471_v60  ;;  %1479 = vmatmul.mubr.f32.vlgmr.msra.gmra.mxu0 %v5471_v60  ;;  %1550 = vmatmul.mubr.f32.vlgmr.msra.gmra.mxu1 %v5471_v60  ;;  %v7042_v60 = vld [vmem:[#allocation33_spill] sm:$0xff] }
 0x56a   :  { %1592 = vmatpush1.msra.mxu0 %v5115_v57  ;;  %1663 = vmatpush1.msra.mxu1 %v5336_v15 }
 0x56b   :  { %1593 = vmatprep.subr.mxu0 %v5119_v14  ;;  %1664 = vmatprep.subr.mxu1 %v5340_v45 }
 0x56c   :  { %1594 = vmatpush1.msra.mxu0 %v5123_v62  ;;  %1665 = vmatpush1.msra.mxu1 %v5344_v16 }
 0x56d   :  { %1595 = vmatprep.subr.mxu0 %v5127_v9  ;;  %1666 = vmatprep.subr.mxu1 %v5348_v49 }
 0x56e   :  { %1596 = vmatpush1.msra.mxu0 %v5131_v52  ;;  %1667 = vmatpush1.msra.mxu1 %v5352_v26 }
 0x56f   :  { %1597 = vmatprep.subr.mxu0 %v5135_v53  ;;  %1668 = vmatprep.subr.mxu1 %v5356_v47 }
 0x570   :  { %1598 = vmatpush1.msra.mxu0 %v5139_v51  ;;  %1669 = vmatpush1.msra.mxu1 %v5360_v0 }
 0x571   :  { %1599 = vmatprep.subr.mxu0 %v5143_v59  ;;  %1670 = vmatprep.subr.mxu1 %v5364_v63 }
 0x572   :  { %1600 = vmatpush1.msra.mxu0 %v5147_v4  ;;  %1671 = vmatpush1.msra.mxu1 %v5368_v39 }
 0x573   :  { %1601 = vmatprep.subr.mxu0 %v5151_v18  ;;  %1672 = vmatprep.subr.mxu1 %v5372_v35 }
 0x574   :  { %1602 = vmatpush1.msra.mxu0 %v5155_v20  ;;  %1673 = vmatpush1.msra.mxu1 %v5376_v55 }
 0x575   :  { %1603 = vmatprep.subr.mxu0 %v5159_v42  ;;  %1674 = vmatprep.subr.mxu1 %v5380_v5 }
 0x576   :  { %1604 = vmatpush1.msra.mxu0 %v5163_v6  ;;  %1675 = vmatpush1.msra.mxu1 %v5384_v43 }
 0x577   :  { %1605 = vmatprep.subr.mxu0 %v5167_v10  ;;  %1676 = vmatprep.subr.mxu1 %v5388_v31 }
 0x578   :  { %1606 = vmatpush1.msra.mxu0 %v5171_v13  ;;  %1677 = vmatpush1.msra.mxu1 %v5392_v61 }
 0x579   :  { %1607 = vmatprep.subr.mxu0 %v5175_v17  ;;  %1678 = vmatprep.subr.mxu1 %v5396_v24 }
 0x57a   :  { %1608 = vmatpush1.msra.mxu0 %v5179_v21  ;;  %1679 = vmatpush1.msra.mxu1 %v5400_v19 }
 0x57b   :  { %1609 = vmatprep.subr.mxu0 %v5183_v25  ;;  %1680 = vmatprep.subr.mxu1 %v5404_v23 }
 0x57c   :  { %1610 = vmatpush1.msra.mxu0 %v5187_v29  ;;  %1681 = vmatpush1.msra.mxu1 %v5408_v28 }
 0x57d   :  { %1611 = vmatprep.subr.mxu0 %v5191_v33  ;;  %1682 = vmatprep.subr.mxu1 %v5412_v34 }
 0x57e   :  { %1612 = vmatpush1.msra.mxu0 %v5195_v37  ;;  %1683 = vmatpush1.msra.mxu1 %v5416_v38 }
 0x57f   :  { %1613 = vmatprep.subr.mxu0 %v5199_v41  ;;  %1684 = vmatprep.subr.mxu1 %v5420_v1 }
 0x580   :  { %1614 = vmatpush1.msra.mxu0 %v5203_v7  ;;  %1685 = vmatpush1.msra.mxu1 %v7025_v30 }
 0x581   :  { %1615 = vmatprep.subr.mxu0 %v7026_v32  ;;  %1686 = vmatprep.subr.mxu1 %v7027_v3  ;;  %v7048_v3 = vld [vmem:[#allocation60_spill] sm:$0xff] }
 0x582   :  { %1616 = vmatpush1.msra.mxu0 %v7028_v22  ;;  %1687 = vmatpush1.msra.mxu1 %v7029_v46  ;;  %v7047_v22 = vld [vmem:[#allocation61_spill] sm:$0xff] }
 0x583   :  { %1617 = vmatprep.subr.mxu0 %v7030_v12  ;;  %1688 = vmatprep.subr.mxu1 %v7031_v54 }
 0x584   :  { %1618 = vmatpush1.msra.mxu0 %v7032_v27  ;;  %1689 = vmatpush1.msra.mxu1 %v7033_v50  ;;  %v7043_v50 = vld [vmem:[#allocation17_spill] sm:$0xff] }
 0x585   :  { %1619 = vmatprep.subr.mxu0 %v7034_v56  ;;  %1690 = vmatprep.subr.mxu1 %v7035_v11  ;;  %v7044_v56 = vld [vmem:[#allocation26_spill] sm:$0xff] }
 0x586   :  { %1620 = vmatpush1.msra.mxu0 %v7036_v2  ;;  %1691 = vmatpush1.msra.mxu1 %v7037_v44  ;;  %v7045_v2 = vld [vmem:[#allocation49_spill] sm:$0xff] }
 0x587   :  { %1621 = vmatprep.subr.mxu0 %v7038_v40  ;;  %1692 = vmatprep.subr.mxu1 %v7039_v8  ;;  %v7046_v40 = vld [vmem:[#allocation50_spill] sm:$0xff] }
 0x588   :  { %1622 = vmatpush1.msra.mxu0 %v7040_v48  ;;  %1655 = vmatprep.mubr.f32.mxu0 %v7041_v58 }
 0x589   :  { %1693 = vmatpush1.msra.mxu1 %v7042_v60  ;;  %1726 = vmatprep.mubr.f32.mxu1 %v7041_v58 }
 0x58a   :  { %1768 = vmatprep.subr.mxu0 %v7043_v50  ;;  %1839 = vmatprep.subr.mxu1 %v7044_v56 }
 0x629   :  { %v1480_v11 = vpop.f32.mrf.mxu0  ;;  %v1551_v8 = vpop.f32.mrf.mxu1 }
 0x62a   :  { %v1556_v27 = vadd.f32 %v1480_v11, %v7045_v2  ;;  %v1558_v58 = vadd.f32 %v1551_v8, %v7048_v3 }
 0x62b   :  { %v1482_v44 = vpop.f32.mrf.mxu0  ;;  %v1553_v46 = vpop.f32.mrf.mxu1 }
 0x62c   :  { %v3930_v54 = vmul.f32 -1.442695, %v1556_v27  ;;  %v1557_v12 = vadd.f32 %v1482_v44, %v7046_v40  ;;  %v1559_v60 = vadd.f32 %v1553_v46, %v7047_v22 }
 0x62e   :  { %4122 = vpow2.f32 %v3930_v54  ;;  %v3931_v48 = vmul.f32 -1.442695, %v1557_v12  ;;  %v3932_v32 = vmul.f32 -1.442695, %v1559_v60 }
 0x630   :  { %4124 = vpow2.f32 %v3931_v48 }
 0x631   :  { %4126 = vtanh.f32 %v1558_v58 }
 0x632   :  { %4128 = vpow2.f32 %v3932_v32 }
 0x63b   :  { %v4123_v50 = vpop.eup %4122 }
 0x63c   :  { %v1563_v30 = vadd.f32 1.0, %v4123_v50  ;;  %v2002_v50 = vld [vmem:[#allocation10 + $0x1e0] sm:$0xff] }
 0x63d   :  { %v4125_v56 = vpop.eup %4124 }
 0x63e   :  { %4130 = vrcp.f32 %v1563_v30  ;;  %v1569_v11 = vadd.f32 1.0, %v4125_v56  ;;  %v4127_v27 = vpop.eup %4126  ;;  %v2004_v56 = vld [vmem:[#allocation10 + $0x1f0] sm:$0xff] }
 0x63f   :  { %v4129_v2 = vpop.eup %4128 }
 0x640   :  { %4132 = vrcp.f32 %v1569_v11  ;;  %v1576_v40 = vadd.f32 1.0, %v4129_v2  ;;  %v1999_v11 = vld [vmem:[#allocation10 + $0x1c8] sm:$0xff]  ;;  %v1998_v2 = vld [vmem:[#allocation10 + $0x1c0] sm:$0xff] }
 0x642   :  { %4134 = vrcp.f32 %v1576_v40  ;;  %v1994_v40 = vld [vmem:[#allocation10 + $0x1a0] sm:$0xff] }
 0x64b   :  { %v4131_v54 = vpop.eup %4130 }
 0x64c   :  { %v1580_v44 = vmul.f32 %v4131_v54, %v4127_v27  ;;  %v2001_v27 = vld [vmem:[#allocation10 + $0x1d8] sm:$0xff]  ;;  %v2000_v54 = vld [vmem:[#allocation10 + $0x1d0] sm:$0xff] }
 0x64d   :  { %v4133_v12 = vpop.eup %4132 }
 0x64e   :  { %v1579_v48 = vmul.f32 %v4133_v12, %v5468_v36  ;;  %v1997_v12 = vld [vmem:[#allocation10 + $0x1b8] sm:$0xff] }
 0x64f   :  { %v4135_v60 = vpop.eup %4134 }
 0x650   :  { %v5546_v22 = vadd.f32 %v1580_v44, %v1579_v48  ;;  %v1995_v44 = vld [vmem:[#allocation10 + $0x1a8] sm:$0xff]  ;;  %v1996_v48 = vld [vmem:[#allocation10 + $0x1b0] sm:$0xff] }
 0x652   :  { %4136 = vtanh.f32 %v5546_v22 }
 0x65f   :  { %v4137_v3 = vpop.eup %4136 }
 0x660   :  { %v5549_v46 = vmul.f32 %v4137_v3, %v4135_v60  ;;  %v1993_v60 = vld [vmem:[#allocation10 + $0x198] sm:$0xff]  ;;  %v1990_v3 = vld [vmem:[#allocation10 + $0x180] sm:$0xff] }
 0x662   :  { %1656 = vmatmul.mubr.f32.vlgmr.msra.gmra.mxu0 %v5549_v46  ;;  %1727 = vmatmul.mubr.f32.vlgmr.msra.gmra.mxu1 %v5549_v46 }
 0x663   :  { %1769 = vmatpush1.msra.mxu0 %v5115_v57  ;;  %1840 = vmatpush1.msra.mxu1 %v5336_v15  ;;  %v7049_v57 = vld [vmem:[#allocation28_spill] sm:$0xff] }
 0x664   :  { %1770 = vmatprep.subr.mxu0 %v5119_v14  ;;  %1841 = vmatprep.subr.mxu1 %v5340_v45  ;;  %v7050_v14 = vld [vmem:[#allocation18_spill] sm:$0xff] }
 0x665   :  { %1771 = vmatpush1.msra.mxu0 %v5123_v62  ;;  %1842 = vmatpush1.msra.mxu1 %v5344_v16  ;;  %v7051_v62 = vld [vmem:[#allocation41_spill] sm:$0xff]  ;;  %v7068_v16 = vld [vmem:[#allocation52_spill] sm:$0xff] }
 0x666   :  { %1772 = vmatprep.subr.mxu0 %v5127_v9  ;;  %1843 = vmatprep.subr.mxu1 %v5348_v49  ;;  %v7052_v9 = vld [vmem:[#allocation30_spill] sm:$0xff] }
 0x667   :  { %1773 = vmatpush1.msra.mxu0 %v5131_v52  ;;  %1844 = vmatpush1.msra.mxu1 %v5352_v26  ;;  %v7053_v52 = vld [vmem:[#allocation42_spill] sm:$0xff] }
 0x668   :  { %1774 = vmatprep.subr.mxu0 %v5135_v53  ;;  %1845 = vmatprep.subr.mxu1 %v5356_v47  ;;  %v7054_v53 = vld [vmem:[#allocation19_spill] sm:$0xff] }
 0x669   :  { %1775 = vmatpush1.msra.mxu0 %v5139_v51  ;;  %1846 = vmatpush1.msra.mxu1 %v5360_v0  ;;  %v7055_v51 = vld [vmem:[#allocation43_spill] sm:$0xff] }
 0x66a   :  { %1776 = vmatprep.subr.mxu0 %v5143_v59  ;;  %1847 = vmatprep.subr.mxu1 %v5364_v63  ;;  %v7056_v59 = vld [vmem:[#allocation20_spill] sm:$0xff]  ;;  %v7069_v63 = vld [vmem:[#allocation63_spill] sm:$0xff] }
 0x66b   :  { %1777 = vmatpush1.msra.mxu0 %v5147_v4  ;;  %1848 = vmatpush1.msra.mxu1 %v5368_v39  ;;  %v7057_v4 = vld [vmem:[#allocation44_spill] sm:$0xff] }
 0x66c   :  { %1778 = vmatprep.subr.mxu0 %v5151_v18  ;;  %1849 = vmatprep.subr.mxu1 %v5372_v35  ;;  %v7058_v18 = vld [vmem:[#allocation21_spill] sm:$0xff]  ;;  %v7070_v35 = vld [vmem:[#allocation62_spill] sm:$0xff] }
 0x66d   :  { %1779 = vmatpush1.msra.mxu0 %v5155_v20  ;;  %1850 = vmatpush1.msra.mxu1 %v5376_v55  ;;  %v7059_v20 = vld [vmem:[#allocation55_spill] sm:$0xff] }
 0x66e   :  { %1780 = vmatprep.subr.mxu0 %v5159_v42  ;;  %1851 = vmatprep.subr.mxu1 %v5380_v5  ;;  %v7060_v42 = vld [vmem:[#allocation22_spill] sm:$0xff] }
 0x66f   :  { %1781 = vmatpush1.msra.mxu0 %v5163_v6  ;;  %1852 = vmatpush1.msra.mxu1 %v5384_v43  ;;  %v7061_v6 = vld [vmem:[#allocation31_spill] sm:$0xff] }
 0x670   :  { %1782 = vmatprep.subr.mxu0 %v5167_v10  ;;  %1853 = vmatprep.subr.mxu1 %v5388_v31  ;;  %v7062_v10 = vld [vmem:[#allocation23_spill] sm:$0xff] }
 0x671   :  { %1783 = vmatpush1.msra.mxu0 %v5171_v13  ;;  %1854 = vmatpush1.msra.mxu1 %v5392_v61  ;;  %v7063_v13 = vld [vmem:[#allocation32_spill] sm:$0xff] }
 0x672   :  { %1784 = vmatprep.subr.mxu0 %v5175_v17  ;;  %1855 = vmatprep.subr.mxu1 %v5396_v24  ;;  %v7064_v17 = vld [vmem:[#allocation24_spill] sm:$0xff] }
 0x673   :  { %1785 = vmatpush1.msra.mxu0 %v5179_v21  ;;  %1856 = vmatpush1.msra.mxu1 %v5400_v19  ;;  %v7065_v21 = vld [vmem:[#allocation33_spill] sm:$0xff] }
 0x674   :  { %1786 = vmatprep.subr.mxu0 %v5183_v25  ;;  %1857 = vmatprep.subr.mxu1 %v5404_v23  ;;  %v7066_v25 = vmov 0.0  }
 0x675   :  { %1787 = vmatpush1.msra.mxu0 %v5187_v29  ;;  %1858 = vmatpush1.msra.mxu1 %v5408_v28  ;;  %v2003_v29 = vld [vmem:[#allocation10 + $0x1e8] sm:$0xff] }
 0x676   :  { %1788 = vmatprep.subr.mxu0 %v5191_v33  ;;  %1859 = vmatprep.subr.mxu1 %v5412_v34  ;;  %v2005_v33 = vld [vmem:[#allocation10 + $0x1f8] sm:$0xff] }
 0x677   :  { %1789 = vmatpush1.msra.mxu0 %v5195_v37  ;;  %1860 = vmatpush1.msra.mxu1 %v5416_v38 }
 0x678   :  { %1790 = vmatprep.subr.mxu0 %v5199_v41  ;;  %1861 = vmatprep.subr.mxu1 %v5420_v1  ;;  %v7067_v41 = vld [vmem:[#allocation51_spill] sm:$0xff] }
 0x679   :  { %1791 = vmatpush1.msra.mxu0 %v5203_v7  ;;  %1862 = vmatpush1.msra.mxu1 %v7049_v57  ;;  %v1992_v57 = vld [vmem:[#allocation10 + $0x190] sm:$0xff] }
 0x67a   :  { %1792 = vmatprep.subr.mxu0 %v7050_v14  ;;  %1863 = vmatprep.subr.mxu1 %v7051_v62  ;;  %v1987_v14 = vld [vmem:[#allocation10 + $0x168] sm:$0xff]  ;;  %v1989_v62 = vld [vmem:[#allocation10 + $0x178] sm:$0xff] }
 0x67b   :  { %1793 = vmatpush1.msra.mxu0 %v7052_v9  ;;  %1864 = vmatpush1.msra.mxu1 %v7053_v52  ;;  %v1986_v9 = vld [vmem:[#allocation10 + $0x160] sm:$0xff]  ;;  %v1988_v52 = vld [vmem:[#allocation10 + $0x170] sm:$0xff] }
 0x67c   :  { %1794 = vmatprep.subr.mxu0 %v7054_v53  ;;  %1865 = vmatprep.subr.mxu1 %v7055_v51  ;;  %v1983_v53 = vld [vmem:[#allocation10 + $0x148] sm:$0xff]  ;;  %v1985_v51 = vld [vmem:[#allocation10 + $0x158] sm:$0xff] }
 0x67d   :  { %1795 = vmatpush1.msra.mxu0 %v7056_v59  ;;  %1866 = vmatpush1.msra.mxu1 %v7057_v4  ;;  %v1982_v59 = vld [vmem:[#allocation10 + $0x140] sm:$0xff]  ;;  %v1984_v4 = vld [vmem:[#allocation10 + $0x150] sm:$0xff] }
 0x67e   :  { %1796 = vmatprep.subr.mxu0 %v7058_v18  ;;  %1867 = vmatprep.subr.mxu1 %v7059_v20  ;;  %v1979_v18 = vld [vmem:[#allocation10 + $0x128] sm:$0xff]  ;;  %v1981_v20 = vld [vmem:[#allocation10 + $0x138] sm:$0xff] }
 0x67f   :  { %1797 = vmatpush1.msra.mxu0 %v7060_v42  ;;  %1868 = vmatpush1.msra.mxu1 %v7061_v6  ;;  %v1978_v42 = vld [vmem:[#allocation10 + $0x120] sm:$0xff]  ;;  %v1980_v6 = vld [vmem:[#allocation10 + $0x130] sm:$0xff] }
 0x680   :  { %1798 = vmatprep.subr.mxu0 %v7062_v10  ;;  %1869 = vmatprep.subr.mxu1 %v7063_v13  ;;  %v1975_v10 = vld [vmem:[#allocation10 + $0x108] sm:$0xff]  ;;  %v1977_v13 = vld [vmem:[#allocation10 + $0x118] sm:$0xff] }
 0x681   :  { %1799 = vmatpush1.msra.mxu0 %v7064_v17  ;;  %1870 = vmatpush1.msra.mxu1 %v7065_v21  ;;  %v1974_v17 = vld [vmem:[#allocation10 + $0x100] sm:$0xff]  ;;  %v1976_v21 = vld [vmem:[#allocation10 + $0x110] sm:$0xff] }
 0x682   :  { %1832 = vmatprep.mubr.f32.mxu0 %v7066_v25  ;;  %1903 = vmatprep.mubr.f32.mxu1 %v7066_v25 }
 0x683   :  { %2100 = vmatprep.subr.mxu0 %v2003_v29  ;;  %2213 = vmatprep.subr.mxu1 %v2005_v33  ;;  %v1971_v29 = vld [vmem:[#allocation10 + $0xe8] sm:$0xff]  ;;  %v1973_v33 = vld [vmem:[#allocation10 + $0xf8] sm:$0xff] }
 0x722   :  { %v1657_v37 = vpop.f32.mrf.mxu0  ;;  %v1728_v26 = vpop.f32.mrf.mxu1 }
 0x723   :  { %v1733_v7 = vadd.f32 %v1657_v37, %v7067_v41  ;;  %v1735_v55 = vadd.f32 %v1728_v26, %v7070_v35  ;;  %v1970_v37 = vld [vmem:[#allocation10 + $0xe0] sm:$0xff]  ;;  %v1972_v41 = vld [vmem:[#allocation10 + $0xf0] sm:$0xff]  ;;  %v1965_v26 = vld [vmem:[#allocation10 + $0xb8] sm:$0xff] }
 0x724   :  { %v1659_v15 = vpop.f32.mrf.mxu0  ;;  %v1730_v0 = vpop.f32.mrf.mxu1  ;;  %v1958_v35 = vld [vmem:[#allocation10 + $0x80] sm:$0xff] }
 0x725   :  { %v3933_v45 = vmul.f32 -1.442695, %v1733_v7  ;;  %v1734_v49 = vadd.f32 %v1659_v15, %v7068_v16  ;;  %v1736_v39 = vadd.f32 %v1730_v0, %v7069_v63  ;;  %v1967_v7 = vld [vmem:[#allocation10 + $0xc8] sm:$0xff]  ;;  %v1969_v15 = vld [vmem:[#allocation10 + $0xd8] sm:$0xff]  ;;  %v1968_v16 = vld [vmem:[#allocation10 + $0xd0] sm:$0xff] }
 0x726   :  { %v1964_v0 = vld [vmem:[#allocation10 + $0xb0] sm:$0xff]  ;;  %v1959_v63 = vld [vmem:[#allocation10 + $0x88] sm:$0xff] }
 0x727   :  { %4138 = vpow2.f32 %v3933_v45  ;;  %v3934_v47 = vmul.f32 -1.442695, %v1734_v49  ;;  %v3935_v5 = vmul.f32 -1.442695, %v1736_v39  ;;  %v1966_v45 = vld [vmem:[#allocation10 + $0xc0] sm:$0xff]  ;;  %v1963_v49 = vld [vmem:[#allocation10 + $0xa8] sm:$0xff] }
 0x728   :  { %v1961_v39 = vld [vmem:[#allocation10 + $0x98] sm:$0xff] }
 0x729   :  { %4140 = vpow2.f32 %v3934_v47  ;;  %v1962_v47 = vld [vmem:[#allocation10 + $0xa0] sm:$0xff] }
 0x72a   :  { %4142 = vtanh.f32 %v1735_v55  ;;  %v1960_v55 = vld [vmem:[#allocation10 + $0x90] sm:$0xff] }
 0x72b   :  { %4144 = vpow2.f32 %v3935_v5  ;;  %v1955_v5 = vld [vmem:[#allocation10 + $0x68] sm:$0xff] }
 0x734   :  { %v4139_v43 = vpop.eup %4138 }
 0x735   :  { %v1740_v31 = vadd.f32 1.0, %v4139_v43  ;;  %v1957_v43 = vld [vmem:[#allocation10 + $0x78] sm:$0xff] }
 0x736   :  { %v4141_v61 = vpop.eup %4140 }
 0x737   :  { %4146 = vrcp.f32 %v1740_v31  ;;  %v1746_v24 = vadd.f32 1.0, %v4141_v61  ;;  %v4143_v19 = vpop.eup %4142  ;;  %v1954_v31 = vld [vmem:[#allocation10 + $0x60] sm:$0xff]  ;;  %v1956_v61 = vld [vmem:[#allocation10 + $0x70] sm:$0xff] }
 0x738   :  { %v4145_v23 = vpop.eup %4144 }
 0x739   :  { %4148 = vrcp.f32 %v1746_v24  ;;  %v1753_v1 = vadd.f32 1.0, %v4145_v23  ;;  %v1951_v24 = vld [vmem:[#allocation10 + $0x48] sm:$0xff]  ;;  %v1950_v23 = vld [vmem:[#allocation10 + $0x40] sm:$0xff] }
 0x73b   :  { %4150 = vrcp.f32 %v1753_v1  ;;  %v1946_v1 = vld [vmem:[#allocation10 + $0x20] sm:$0xff] }
 0x744   :  { %v4147_v28 = vpop.eup %4146 }
 0x745   :  { %v1757_v34 = vmul.f32 %v4147_v28, %v4143_v19  ;;  %v1953_v19 = vld [vmem:[#allocation10 + $0x58] sm:$0xff]  ;;  %v1952_v28 = vld [vmem:[#allocation10 + $0x50] sm:$0xff] }
 0x746   :  { %v4149_v38 = vpop.eup %4148 }
 0x747   :  { %v1756_v36 = vmul.f32 %v4149_v38, %v5546_v22  ;;  %v1991_v22 = vld [vmem:[#allocation10 + $0x188] sm:$0xff]  ;;  %v1949_v38 = vld [vmem:[#allocation10 + $0x38] sm:$0xff] }
 0x748   :  { %v4151_v32 = vpop.eup %4150 }
 0x749   :  { %v5622_v30 = vadd.f32 %v1757_v34, %v1756_v36  ;;  %v1947_v34 = vld [vmem:[#allocation10 + $0x28] sm:$0xff]  ;;  %v1948_v36 = vld [vmem:[#allocation10 + $0x30] sm:$0xff] }
 0x74b   :  { %4152 = vtanh.f32 %v5622_v30 }
 0x758   :  { %v4153_v8 = vpop.eup %4152 }
 0x759   :  { %v5625_v58 = vmul.f32 %v4153_v8, %v4151_v32  ;;  %v1943_v32 = vld [vmem:[#allocation10 + $0x8] sm:$0xff]  ;;  %v1945_v8 = vld [vmem:[#allocation10 + $0x18] sm:$0xff] }
 0x75b   :  { %1833 = vmatmul.mubr.f32.vlgmr.msra.gmra.mxu0 %v5625_v58  ;;  %1904 = vmatmul.mubr.f32.vlgmr.msra.gmra.mxu1 %v5625_v58 }
 0x75c   :  { %2101 = vmatpush1.msra.mxu0 %v2002_v50  ;;  %2214 = vmatpush1.msra.mxu1 %v2004_v56  ;;  %v1942_v50 = vld [vmem:[#allocation10] sm:$0xff]  ;;  %v1944_v56 = vld [vmem:[#allocation10 + $0x10] sm:$0xff] }
 0x75d   :  { %2102 = vmatprep.subr.mxu0 %v1999_v11  ;;  %2215 = vmatprep.subr.mxu1 %v2001_v27  ;;  %v7071_v11 = vld [vmem:[#allocation66_spill] sm:$0xff]  ;;  %v7072_v27 = vld [vmem:[#allocation29_spill] sm:$0xff] }
 0x75e   :  { %2103 = vmatpush1.msra.mxu0 %v1998_v2  ;;  %2216 = vmatpush1.msra.mxu1 %v2000_v54  ;;  %v7073_v2 = vld [vmem:[#allocation25_spill] sm:$0xff]  ;;  %v7074_v54 = vld [vmem:[#allocation27_spill] sm:$0xff] }
 0x75f   :  { %2104 = vmatprep.subr.mxu0 %v1995_v44  ;;  %2217 = vmatprep.subr.mxu1 %v1997_v12  ;;  %v7075_v44 = vld [vmem:[#allocation34_spill] sm:$0xff] }
 0x760   :  { %2105 = vmatpush1.msra.mxu0 %v1994_v40  ;;  %2218 = vmatpush1.msra.mxu1 %v1996_v48  ;;  %v5659_v12 = vld [vmem:[#allocation11 + $0x1e8] sm:$0xff]  ;;  %v5661_v40 = vld [vmem:[#allocation11 + $0x1f8] sm:$0xff]  ;;  %v5667_v48 = vld [vmem:[#allocation11 + $0x1f0] sm:$0xff] }
 0x761   :  { %2106 = vmatprep.subr.mxu0 %v1991_v22  ;;  %2219 = vmatprep.subr.mxu1 %v1993_v60  ;;  %7076 = vst [vmem:[#allocation35_spill] sm:$0xff] %v5659_v12  ;;  %7077 = vst [vmem:[#allocation36_spill] sm:$0xff] %v5661_v40  ;;  %v5673_v22 = vld [vmem:[#allocation11 + $0x1d8] sm:$0xff]  ;;  %v5677_v60 = vld [vmem:[#allocation11 + $0x1c0] sm:$0xff] }
 0x762   :  { %2107 = vmatpush1.msra.mxu0 %v1990_v3  ;;  %2220 = vmatpush1.msra.mxu1 %v1992_v57  ;;  %v5679_v3 = vld [vmem:[#allocation11 + $0x1d0] sm:$0xff]  ;;  %v5683_v57 = vld [vmem:[#allocation11 + $0x1a8] sm:$0xff] }
 0x763   :  { %2108 = vmatprep.subr.mxu0 %v1987_v14  ;;  %2221 = vmatprep.subr.mxu1 %v1989_v62  ;;  %v5685_v14 = vld [vmem:[#allocation11 + $0x1b8] sm:$0xff]  ;;  %v5689_v62 = vld [vmem:[#allocation11 + $0x1a0] sm:$0xff] }
 0x764   :  { %2109 = vmatpush1.msra.mxu0 %v1986_v9  ;;  %2222 = vmatpush1.msra.mxu1 %v1988_v52  ;;  %v5691_v9 = vld [vmem:[#allocation11 + $0x1b0] sm:$0xff]  ;;  %v5695_v52 = vld [vmem:[#allocation11 + $0x188] sm:$0xff] }
 0x765   :  { %2110 = vmatprep.subr.mxu0 %v1983_v53  ;;  %2223 = vmatprep.subr.mxu1 %v1985_v51  ;;  %v5697_v53 = vld [vmem:[#allocation11 + $0x198] sm:$0xff]  ;;  %v5701_v51 = vld [vmem:[#allocation11 + $0x180] sm:$0xff] }
 0x766   :  { %2111 = vmatpush1.msra.mxu0 %v1982_v59  ;;  %2224 = vmatpush1.msra.mxu1 %v1984_v4  ;;  %v5703_v59 = vld [vmem:[#allocation11 + $0x190] sm:$0xff]  ;;  %v5707_v4 = vld [vmem:[#allocation11 + $0x168] sm:$0xff] }
 0x767   :  { %2112 = vmatprep.subr.mxu0 %v1979_v18  ;;  %2225 = vmatprep.subr.mxu1 %v1981_v20  ;;  %v5709_v18 = vld [vmem:[#allocation11 + $0x178] sm:$0xff]  ;;  %v5713_v20 = vld [vmem:[#allocation11 + $0x160] sm:$0xff] }
 0x768   :  { %2113 = vmatpush1.msra.mxu0 %v1978_v42  ;;  %2226 = vmatpush1.msra.mxu1 %v1980_v6  ;;  %v5715_v42 = vld [vmem:[#allocation11 + $0x170] sm:$0xff]  ;;  %v5719_v6 = vld [vmem:[#allocation11 + $0x148] sm:$0xff] }
 0x769   :  { %2114 = vmatprep.subr.mxu0 %v1975_v10  ;;  %2227 = vmatprep.subr.mxu1 %v1977_v13  ;;  %v5721_v10 = vld [vmem:[#allocation11 + $0x158] sm:$0xff]  ;;  %v5725_v13 = vld [vmem:[#allocation11 + $0x140] sm:$0xff] }
 0x76a   :  { %2115 = vmatpush1.msra.mxu0 %v1974_v17  ;;  %2228 = vmatpush1.msra.mxu1 %v1976_v21  ;;  %v5727_v17 = vld [vmem:[#allocation11 + $0x150] sm:$0xff]  ;;  %v5731_v21 = vld [vmem:[#allocation11 + $0x128] sm:$0xff] }
 0x76b   :  { %2116 = vmatprep.subr.mxu0 %v1971_v29  ;;  %2229 = vmatprep.subr.mxu1 %v1973_v33  ;;  %v5733_v29 = vld [vmem:[#allocation11 + $0x138] sm:$0xff]  ;;  %v5737_v33 = vld [vmem:[#allocation11 + $0x120] sm:$0xff] }
 0x76c   :  { %2117 = vmatpush1.msra.mxu0 %v1970_v37  ;;  %2230 = vmatpush1.msra.mxu1 %v1972_v41  ;;  %v5739_v37 = vld [vmem:[#allocation11 + $0x130] sm:$0xff]  ;;  %v5743_v41 = vld [vmem:[#allocation11 + $0x108] sm:$0xff] }
 0x76d   :  { %2118 = vmatprep.subr.mxu0 %v1967_v7  ;;  %2231 = vmatprep.subr.mxu1 %v1969_v15  ;;  %v5745_v7 = vld [vmem:[#allocation11 + $0x118] sm:$0xff]  ;;  %v5749_v15 = vld [vmem:[#allocation11 + $0x100] sm:$0xff] }
 0x76e   :  { %2119 = vmatpush1.msra.mxu0 %v1966_v45  ;;  %2232 = vmatpush1.msra.mxu1 %v1968_v16  ;;  %v5751_v45 = vld [vmem:[#allocation11 + $0x110] sm:$0xff]  ;;  %v5755_v16 = vld [vmem:[#allocation11 + $0xe8] sm:$0xff] }
 0x76f   :  { %2120 = vmatprep.subr.mxu0 %v1963_v49  ;;  %2233 = vmatprep.subr.mxu1 %v1965_v26  ;;  %v5757_v49 = vld [vmem:[#allocation11 + $0xf8] sm:$0xff]  ;;  %v5761_v26 = vld [vmem:[#allocation11 + $0xe0] sm:$0xff] }
 0x770   :  { %2121 = vmatpush1.msra.mxu0 %v1962_v47  ;;  %2234 = vmatpush1.msra.mxu1 %v1964_v0  ;;  %v5763_v47 = vld [vmem:[#allocation11 + $0xf0] sm:$0xff]  ;;  %v5767_v0 = vld [vmem:[#allocation11 + $0xc8] sm:$0xff] }
 0x771   :  { %2122 = vmatprep.subr.mxu0 %v1959_v63  ;;  %2235 = vmatprep.subr.mxu1 %v1961_v39  ;;  %v5769_v63 = vld [vmem:[#allocation11 + $0xd8] sm:$0xff]  ;;  %v5773_v39 = vld [vmem:[#allocation11 + $0xc0] sm:$0xff] }
 0x772   :  { %2123 = vmatpush1.msra.mxu0 %v1958_v35  ;;  %2236 = vmatpush1.msra.mxu1 %v1960_v55  ;;  %v5775_v35 = vld [vmem:[#allocation11 + $0xd0] sm:$0xff]  ;;  %v5779_v55 = vld [vmem:[#allocation11 + $0xa8] sm:$0xff] }
 0x773   :  { %2124 = vmatprep.subr.mxu0 %v1955_v5  ;;  %2237 = vmatprep.subr.mxu1 %v1957_v43  ;;  %v5781_v5 = vld [vmem:[#allocation11 + $0xb8] sm:$0xff]  ;;  %v5785_v43 = vld [vmem:[#allocation11 + $0xa0] sm:$0xff] }
 0x774   :  { %2125 = vmatpush1.msra.mxu0 %v1954_v31  ;;  %2238 = vmatpush1.msra.mxu1 %v1956_v61  ;;  %v5787_v31 = vld [vmem:[#allocation11 + $0xb0] sm:$0xff]  ;;  %v5791_v61 = vld [vmem:[#allocation11 + $0x88] sm:$0xff] }
 0x775   :  { %2126 = vmatprep.subr.mxu0 %v1951_v24  ;;  %2239 = vmatprep.subr.mxu1 %v1953_v19  ;;  %7078 = vst [vmem:[#allocation37_spill] sm:$0xff] %v5787_v31  ;;  %7079 = vst [vmem:[#allocation38_spill] sm:$0xff] %v5791_v61  ;;  %v5793_v24 = vld [vmem:[#allocation11 + $0x98] sm:$0xff]  ;;  %v5797_v19 = vld [vmem:[#allocation11 + $0x80] sm:$0xff] }
 0x776   :  { %2127 = vmatpush1.msra.mxu0 %v1950_v23  ;;  %2240 = vmatpush1.msra.mxu1 %v1952_v28  ;;  %7080 = vst [vmem:[#allocation39_spill] sm:$0xff] %v5793_v24  ;;  %7081 = vst [vmem:[#allocation45_spill] sm:$0xff] %v5797_v19  ;;  %v5799_v23 = vld [vmem:[#allocation11 + $0x90] sm:$0xff]  ;;  %v5803_v28 = vld [vmem:[#allocation11 + $0x68] sm:$0xff] }
 0x777   :  { %2128 = vmatprep.subr.mxu0 %v1947_v34  ;;  %2241 = vmatprep.subr.mxu1 %v1949_v38  ;;  %7082 = vst [vmem:[#allocation46_spill] sm:$0xff] %v5799_v23  ;;  %7083 = vst [vmem:[#allocation57_spill] sm:$0xff] %v5803_v28  ;;  %v5805_v34 = vld [vmem:[#allocation11 + $0x78] sm:$0xff]  ;;  %v5809_v38 = vld [vmem:[#allocation11 + $0x60] sm:$0xff] }
 0x778   :  { %2129 = vmatpush1.msra.mxu0 %v1946_v1  ;;  %2242 = vmatpush1.msra.mxu1 %v1948_v36  ;;  %7084 = vst [vmem:[#allocation56_spill] sm:$0xff] %v5805_v34  ;;  %7085 = vst [vmem:[#allocation47_spill] sm:$0xff] %v5809_v38  ;;  %v5811_v1 = vld [vmem:[#allocation11 + $0x70] sm:$0xff]  ;;  %v5815_v36 = vld [vmem:[#allocation11 + $0x48] sm:$0xff] }
 0x779   :  { %2130 = vmatprep.subr.mxu0 %v1943_v32  ;;  %2243 = vmatprep.subr.mxu1 %v1945_v8  ;;  %7086 = vst [vmem:[#allocation48_spill] sm:$0xff] %v5811_v1  ;;  %7087 = vst [vmem:[#allocation59_spill] sm:$0xff] %v5815_v36  ;;  %v5817_v32 = vld [vmem:[#allocation11 + $0x58] sm:$0xff]  ;;  %v5821_v8 = vld [vmem:[#allocation11 + $0x40] sm:$0xff] }
 0x77a   :  { %2131 = vmatpush1.msra.mxu0 %v1942_v50  ;;  %2164 = vmatprep.mubr.f32.mxu0 %v7066_v25  ;;  %7088 = vst [vmem:[#allocation58_spill] sm:$0xff] %v5817_v32  ;;  %7089 = vst [vmem:[#allocation17_spill] sm:$0xff] %v5821_v8  ;;  %v5823_v50 = vld [vmem:[#allocation11 + $0x50] sm:$0xff] }
 0x77b   :  { %2244 = vmatpush1.msra.mxu1 %v1944_v56  ;;  %2277 = vmatprep.mubr.f32.mxu1 %v7066_v25  ;;  %7090 = vst [vmem:[#allocation26_spill] sm:$0xff] %v5823_v50  ;;  %v5827_v56 = vld [vmem:[#allocation11 + $0x28] sm:$0xff] }
 0x77c   :  { %2165 = vmatmul.mubr.f32.vlgmr.msra.gmra.mxu0 %v7071_v11  ;;  %2278 = vmatmul.mubr.f32.vlgmr.msra.gmra.mxu1 %v7071_v11  ;;  %7091 = vst [vmem:[#allocation49_spill] sm:$0xff] %v5827_v56  ;;  %v5829_v11 = vld [vmem:[#allocation11 + $0x38] sm:$0xff] }
 0x77d   :  { %2170 = vmatprep.mubr.f32.mxu0 %v7066_v25  ;;  %2283 = vmatprep.mubr.f32.mxu1 %v7066_v25  ;;  %7092 = vst [vmem:[#allocation50_spill] sm:$0xff] %v5829_v11 }
 0x77e   :  { %2366 = vmatprep.subr.mxu0 %v5659_v12  ;;  %2437 = vmatprep.subr.mxu1 %v5661_v40 }
 0x77f   :  { %2438 = vmatpush1.msra.mxu1 %v5667_v48 }
 0x780   :  { %2171 = vmatmul.mubr.f32.gmra.mxu0 %v7072_v27  ;;  %2284 = vmatmul.mubr.f32.gmra.mxu1 %v7072_v27  ;;  %v5833_v27 = vld [vmem:[#allocation11 + $0x20] sm:$0xff] }
 0x781   :  { %2176 = vmatprep.mubr.f32.mxu0 %v7066_v25  ;;  %2289 = vmatprep.mubr.f32.mxu1 %v7066_v25  ;;  %7093 = vst [vmem:[#allocation61_spill] sm:$0xff] %v5833_v27 }
 0x782   :  { %2439 = vmatprep.subr.mxu1 %v5673_v22 }
 0x783   :  { %2440 = vmatpush1.msra.mxu1 %v5679_v3 }
 0x784   :  { %2177 = vmatmul.mubr.f32.gmra.mxu0 %v7073_v2  ;;  %2290 = vmatmul.mubr.f32.gmra.mxu1 %v7073_v2  ;;  %v5835_v2 = vld [vmem:[#allocation11 + $0x30] sm:$0xff] }
 0x785   :  { %2182 = vmatprep.mubr.f32.mxu0 %v7066_v25  ;;  %2295 = vmatprep.mubr.f32.mxu1 %v7066_v25  ;;  %7094 = vst [vmem:[#allocation60_spill] sm:$0xff] %v5835_v2 }
 0x786   :  { %2441 = vmatprep.subr.mxu1 %v5685_v14 }
 0x787   :  { %2442 = vmatpush1.msra.mxu1 %v5691_v9 }
 0x788   :  { %2183 = vmatmul.mubr.f32.gmra.mxu0 %v7074_v54  ;;  %2296 = vmatmul.mubr.f32.gmra.mxu1 %v7074_v54  ;;  %v5839_v54 = vld [vmem:[#allocation11 + $0x8] sm:$0xff] }
 0x789   :  { %2188 = vmatprep.mubr.f32.mxu0 %v7066_v25  ;;  %2301 = vmatprep.mubr.f32.mxu1 %v7066_v25  ;;  %7095 = vst [vmem:[#allocation28_spill] sm:$0xff] %v5839_v54 }
 0x78a   :  { %2443 = vmatprep.subr.mxu1 %v5697_v53 }
 0x78b   :  { %2444 = vmatpush1.msra.mxu1 %v5703_v59 }
 0x78c   :  { %2189 = vmatmul.mubr.f32.gmra.mxu0 %v7075_v44  ;;  %2302 = vmatmul.mubr.f32.gmra.mxu1 %v7075_v44  ;;  %v5841_v44 = vld [vmem:[#allocation11 + $0x18] sm:$0xff] }
 0x78d   :  { %2194 = vmatprep.mubr.f32.mxu0 %v7066_v25  ;;  %2307 = vmatprep.mubr.f32.mxu1 %v7066_v25  ;;  %7096 = vst [vmem:[#allocation18_spill] sm:$0xff] %v5841_v44 }
 0x78e   :  { %2445 = vmatprep.subr.mxu1 %v5709_v18 }
 0x78f   :  { %2446 = vmatpush1.msra.mxu1 %v5715_v42 }
 0x790   :  { %2195 = vmatmul.mubr.f32.gmra.mxu0 %v5549_v46  ;;  %2308 = vmatmul.mubr.f32.gmra.mxu1 %v5549_v46  ;;  %v5665_v46 = vld [vmem:[#allocation11 + $0x1e0] sm:$0xff] }
 0x791   :  { %2200 = vmatprep.mubr.f32.mxu0 %v7066_v25  ;;  %2313 = vmatprep.mubr.f32.mxu1 %v7066_v25 }
 0x792   :  { %2367 = vmatpush1.msra.mxu0 %v5665_v46  ;;  %2447 = vmatprep.subr.mxu1 %v5721_v10 }
 0x793   :  { %2448 = vmatpush1.msra.mxu1 %v5727_v17 }
 0x794   :  { %2201 = vmatmul.mubr.f32.gmra.mxu0 %v5625_v58  ;;  %2314 = vmatmul.mubr.f32.gmra.mxu1 %v5625_v58  ;;  %v5671_v58 = vld [vmem:[#allocation11 + $0x1c8] sm:$0xff] }
 0x795   :  { %2206 = vmatprep.mubr.f32.mxu0 %v7066_v25  ;;  %2319 = vmatprep.mubr.f32.mxu1 %v7066_v25 }
 0x796   :  { %2368 = vmatprep.subr.mxu0 %v5671_v58  ;;  %2449 = vmatprep.subr.mxu1 %v5733_v29 }
 0x797   :  { %2369 = vmatpush1.msra.mxu0 %v5677_v60  ;;  %2450 = vmatpush1.msra.mxu1 %v5739_v37 }
 0x798   :  { %2370 = vmatprep.subr.mxu0 %v5683_v57  ;;  %2451 = vmatprep.subr.mxu1 %v5745_v7 }
 0x799   :  { %2371 = vmatpush1.msra.mxu0 %v5689_v62  ;;  %2452 = vmatpush1.msra.mxu1 %v5751_v45 }
 0x79a   :  { %2372 = vmatprep.subr.mxu0 %v5695_v52  ;;  %2453 = vmatprep.subr.mxu1 %v5757_v49 }
 0x79b   :  { %2373 = vmatpush1.msra.mxu0 %v5701_v51  ;;  %2454 = vmatpush1.msra.mxu1 %v5763_v47 }
 0x79c   :  { %2374 = vmatprep.subr.mxu0 %v5707_v4  ;;  %2455 = vmatprep.subr.mxu1 %v5769_v63 }
 0x79d   :  { %2375 = vmatpush1.msra.mxu0 %v5713_v20  ;;  %2456 = vmatpush1.msra.mxu1 %v5775_v35 }
 0x79e   :  { %2376 = vmatprep.subr.mxu0 %v5719_v6  ;;  %2457 = vmatprep.subr.mxu1 %v5781_v5 }
 0x79f   :  { %2377 = vmatpush1.msra.mxu0 %v5725_v13  ;;  %2458 = vmatpush1.msra.mxu1 %v5787_v31 }
 0x7a0   :  { %2378 = vmatprep.subr.mxu0 %v5731_v21  ;;  %2459 = vmatprep.subr.mxu1 %v5793_v24 }
 0x7a1   :  { %2379 = vmatpush1.msra.mxu0 %v5737_v33  ;;  %2460 = vmatpush1.msra.mxu1 %v5799_v23 }
 0x7a2   :  { %2380 = vmatprep.subr.mxu0 %v5743_v41  ;;  %2461 = vmatprep.subr.mxu1 %v5805_v34  ;;  %v7101_v34 = vld [vmem:[#allocation65_spill] sm:$0xff] }
 0x7a3   :  { %2381 = vmatpush1.msra.mxu0 %v5749_v15  ;;  %2462 = vmatpush1.msra.mxu1 %v5811_v1 }
 0x7a4   :  { %2382 = vmatprep.subr.mxu0 %v5755_v16  ;;  %2463 = vmatprep.subr.mxu1 %v5817_v32 }
 0x7a5   :  { %2383 = vmatpush1.msra.mxu0 %v5761_v26  ;;  %2464 = vmatpush1.msra.mxu1 %v5823_v50  ;;  %v5843_v50 = vld [vmem:[#allocation11] sm:$0xff] }
 0x7a6   :  { %2384 = vmatprep.subr.mxu0 %v5767_v0  ;;  %2465 = vmatprep.subr.mxu1 %v5829_v11  ;;  %7097 = vst [vmem:[#allocation41_spill] sm:$0xff] %v5843_v50 }
 0x7a7   :  { %2385 = vmatpush1.msra.mxu0 %v5773_v39  ;;  %2466 = vmatpush1.msra.mxu1 %v5835_v2 }
 0x7a8   :  { %2386 = vmatprep.subr.mxu0 %v5779_v55  ;;  %2467 = vmatprep.subr.mxu1 %v5841_v44 }
 0x7a9   :  { %2387 = vmatpush1.msra.mxu0 %v5785_v43 }
 0x7aa   :  { %2388 = vmatprep.subr.mxu0 %v5791_v61 }
 0x7ab   :  { %2389 = vmatpush1.msra.mxu0 %v5797_v19 }
 0x7ac   :  { %2390 = vmatprep.subr.mxu0 %v5803_v28  ;;  %v7102_v28 = vld [vmem:[#allocation64_spill] sm:$0xff] }
 0x7ad   :  { %2391 = vmatpush1.msra.mxu0 %v5809_v38 }
 0x7ae   :  { %2392 = vmatprep.subr.mxu0 %v5815_v36  ;;  %v7100_v36 = vld [vmem:[#allocation54_spill] sm:$0xff] }
 0x7af   :  { %2393 = vmatpush1.msra.mxu0 %v5821_v8 }
 0x7b0   :  { %2394 = vmatprep.subr.mxu0 %v5827_v56  ;;  %v5847_v56 = vld [vmem:[#allocation11 + $0x10] sm:$0xff] }
 0x7b1   :  { %2395 = vmatpush1.msra.mxu0 %v5833_v27  ;;  %7098 = vst [vmem:[#allocation30_spill] sm:$0xff] %v5847_v56  ;;  %2468 = vmatpush1.msra.mxu1 %v5847_v56  ;;  %v7099_v27 = vld [vmem:[#allocation53_spill] sm:$0xff] }
 0x7b2   :  { %2396 = vmatprep.subr.mxu0 %v5839_v54  ;;  %2612 = vmatprep.subr.mxu1 %v5661_v40 }
 0x7b3   :  { %2397 = vmatpush1.msra.mxu0 %v5843_v50 }
 0x7b4   :  { %2541 = vmatprep.subr.mxu0 %v5659_v12 }
 0x81b   :  { %v1834_v2 = vpop.f32.mrf.mxu0  ;;  %v1905_v54 = vpop.f32.mrf.mxu1 }
 0x81c   :  { %v1910_v11 = vadd.f32 %v1834_v2, %v7099_v27  ;;  %v1912_v56 = vadd.f32 %v1905_v54, %v7102_v28  ;;  %v7109_v54 = vld [vmem:[#allocation59_spill] sm:$0xff] }
 0x81d   :  { %v1836_v8 = vpop.f32.mrf.mxu0  ;;  %v1907_v38 = vpop.f32.mrf.mxu1 }
 0x81e   :  { %v3936_v32 = vmul.f32 -1.442695, %v1910_v11  ;;  %v1911_v1 = vadd.f32 %v1836_v8, %v7100_v36  ;;  %v1913_v50 = vadd.f32 %v1907_v38, %v7101_v34 }
 0x820   :  { %4154 = vpow2.f32 %v3936_v32  ;;  %v3937_v44 = vmul.f32 -1.442695, %v1911_v1  ;;  %v3938_v23 = vmul.f32 -1.442695, %v1913_v50  ;;  %v7107_v50 = vld [vmem:[#allocation47_spill] sm:$0xff] }
 0x822   :  { %4156 = vpow2.f32 %v3937_v44 }
 0x823   :  { %4158 = vtanh.f32 %v1912_v56  ;;  %v7108_v56 = vld [vmem:[#allocation48_spill] sm:$0xff] }
 0x824   :  { %4160 = vpow2.f32 %v3938_v23  ;;  %v7106_v23 = vld [vmem:[#allocation56_spill] sm:$0xff] }
 0x82d   :  { %v4155_v12 = vpop.eup %4154 }
 0x82e   :  { %v1917_v19 = vadd.f32 1.0, %v4155_v12 }
 0x82f   :  { %v4157_v40 = vpop.eup %4156 }
 0x830   :  { %4162 = vrcp.f32 %v1917_v19  ;;  %v1923_v27 = vadd.f32 1.0, %v4157_v40  ;;  %v4159_v11 = vpop.eup %4158  ;;  %v7104_v40 = vld [vmem:[#allocation46_spill] sm:$0xff]  ;;  %v7105_v19 = vld [vmem:[#allocation57_spill] sm:$0xff] }
 0x831   :  { %v4161_v36 = vpop.eup %4160 }
 0x832   :  { %4164 = vrcp.f32 %v1923_v27  ;;  %v1930_v2 = vadd.f32 1.0, %v4161_v36  ;;  %v7110_v27 = vld [vmem:[#allocation58_spill] sm:$0xff] }
 0x833   :  { %v7112_v36 = vld [vmem:[#allocation26_spill] sm:$0xff] }
 0x834   :  { %4166 = vrcp.f32 %v1930_v2  ;;  %v7116_v2 = vld [vmem:[#allocation60_spill] sm:$0xff] }
 0x83d   :  { %v4163_v32 = vpop.eup %4162 }
 0x83e   :  { %v1934_v8 = vmul.f32 %v4163_v32, %v4159_v11  ;;  %v7111_v11 = vld [vmem:[#allocation17_spill] sm:$0xff] }
 0x83f   :  { %v4165_v1 = vpop.eup %4164  ;;  %v7113_v32 = vld [vmem:[#allocation49_spill] sm:$0xff] }
 0x840   :  { %v1933_v44 = vmul.f32 %v4165_v1, %v5622_v30  ;;  %v7103_v30 = vld [vmem:[#allocation45_spill] sm:$0xff] }
 0x841   :  { %v4167_v28 = vpop.eup %4166  ;;  %v7115_v1 = vld [vmem:[#allocation61_spill] sm:$0xff] }
 0x842   :  { %v1935_v34 = vadd.f32 %v1934_v8, %v1933_v44  ;;  %v7114_v8 = vld [vmem:[#allocation50_spill] sm:$0xff]  ;;  %v7117_v44 = vld [vmem:[#allocation28_spill] sm:$0xff] }
 0x844   :  { %4168 = vtanh.f32 %v1935_v34  ;;  %v7118_v34 = vld [vmem:[#allocation18_spill] sm:$0xff] }
 0x851   :  { %v4169_v38 = vpop.eup %4168 }
 0x852   :  { %v1937_v12 = vmul.f32 %v4169_v38, %v4167_v28  ;;  %v7119_v28 = vld [vmem:[#allocation41_spill] sm:$0xff]  ;;  %v7120_v38 = vld [vmem:[#allocation30_spill] sm:$0xff] }
 0x854   :  { %2207 = vmatmul.mubr.f32.gmra.mxu0 %v1937_v12  ;;  %2320 = vmatmul.mubr.f32.gmra.mxu1 %v1937_v12  ;;  %v7121_v12 = vld [vmem:[#allocation35_spill] sm:$0xff] }
 0x855   :  { %2430 = vmatprep.mubr.f32.mxu0 %v7066_v25  ;;  %2501 = vmatprep.mubr.f32.mxu1 %v7066_v25 }
 0x858   :  { %2431 = vmatmul.mubr.f32.vlgmr.msra.gmra.mxu0 %v7066_v25  ;;  %2502 = vmatmul.mubr.f32.vlgmr.msra.gmra.mxu1 %v7066_v25 }
 0x859   :  { %2542 = vmatpush1.msra.mxu0 %v5665_v46  ;;  %2613 = vmatpush1.msra.mxu1 %v5667_v48 }
 0x85a   :  { %2543 = vmatprep.subr.mxu0 %v5671_v58  ;;  %2614 = vmatprep.subr.mxu1 %v5673_v22 }
 0x85b   :  { %2544 = vmatpush1.msra.mxu0 %v5677_v60  ;;  %2615 = vmatpush1.msra.mxu1 %v5679_v3 }
 0x85c   :  { %2545 = vmatprep.subr.mxu0 %v5683_v57  ;;  %2616 = vmatprep.subr.mxu1 %v5685_v14 }
 0x85d   :  { %2546 = vmatpush1.msra.mxu0 %v5689_v62  ;;  %2617 = vmatpush1.msra.mxu1 %v5691_v9 }
 0x85e   :  { %2547 = vmatprep.subr.mxu0 %v5695_v52  ;;  %2618 = vmatprep.subr.mxu1 %v5697_v53 }
 0x85f   :  { %2548 = vmatpush1.msra.mxu0 %v5701_v51  ;;  %2619 = vmatpush1.msra.mxu1 %v5703_v59 }
 0x860   :  { %2549 = vmatprep.subr.mxu0 %v5707_v4  ;;  %2620 = vmatprep.subr.mxu1 %v5709_v18 }
 0x861   :  { %2550 = vmatpush1.msra.mxu0 %v5713_v20  ;;  %2621 = vmatpush1.msra.mxu1 %v5715_v42 }
 0x862   :  { %2551 = vmatprep.subr.mxu0 %v5719_v6  ;;  %2622 = vmatprep.subr.mxu1 %v5721_v10 }
 0x863   :  { %2552 = vmatpush1.msra.mxu0 %v5725_v13  ;;  %2623 = vmatpush1.msra.mxu1 %v5727_v17 }
 0x864   :  { %2553 = vmatprep.subr.mxu0 %v5731_v21  ;;  %2624 = vmatprep.subr.mxu1 %v5733_v29 }
 0x865   :  { %2554 = vmatpush1.msra.mxu0 %v5737_v33  ;;  %2625 = vmatpush1.msra.mxu1 %v5739_v37 }
 0x866   :  { %2555 = vmatprep.subr.mxu0 %v5743_v41  ;;  %2626 = vmatprep.subr.mxu1 %v5745_v7 }
 0x867   :  { %2556 = vmatpush1.msra.mxu0 %v5749_v15  ;;  %2627 = vmatpush1.msra.mxu1 %v5751_v45 }
 0x868   :  { %2557 = vmatprep.subr.mxu0 %v5755_v16  ;;  %2628 = vmatprep.subr.mxu1 %v5757_v49 }
 0x869   :  { %2558 = vmatpush1.msra.mxu0 %v5761_v26  ;;  %2629 = vmatpush1.msra.mxu1 %v5763_v47 }
 0x86a   :  { %2559 = vmatprep.subr.mxu0 %v5767_v0  ;;  %2630 = vmatprep.subr.mxu1 %v5769_v63 }
 0x86b   :  { %2560 = vmatpush1.msra.mxu0 %v5773_v39  ;;  %2631 = vmatpush1.msra.mxu1 %v5775_v35 }
 0x86c   :  { %2561 = vmatprep.subr.mxu0 %v5779_v55  ;;  %2632 = vmatprep.subr.mxu1 %v5781_v5 }
 0x86d   :  { %2562 = vmatpush1.msra.mxu0 %v5785_v43  ;;  %2633 = vmatpush1.msra.mxu1 %v5787_v31 }
 0x86e   :  { %2563 = vmatprep.subr.mxu0 %v5791_v61  ;;  %2634 = vmatprep.subr.mxu1 %v5793_v24 }
 0x86f   :  { %2564 = vmatpush1.msra.mxu0 %v7103_v30  ;;  %2635 = vmatpush1.msra.mxu1 %v7104_v40 }
 0x870   :  { %2565 = vmatprep.subr.mxu0 %v7105_v19  ;;  %2636 = vmatprep.subr.mxu1 %v7106_v23 }
 0x871   :  { %2566 = vmatpush1.msra.mxu0 %v7107_v50  ;;  %2637 = vmatpush1.msra.mxu1 %v7108_v56 }
 0x872   :  { %2567 = vmatprep.subr.mxu0 %v7109_v54  ;;  %2638 = vmatprep.subr.mxu1 %v7110_v27 }
 0x873   :  { %2568 = vmatpush1.msra.mxu0 %v7111_v11  ;;  %2639 = vmatpush1.msra.mxu1 %v7112_v36 }
 0x874   :  { %2569 = vmatprep.subr.mxu0 %v7113_v32  ;;  %2640 = vmatprep.subr.mxu1 %v7114_v8  ;;  %v7122_v32 = vld [vmem:[#allocation36_spill] sm:$0xff]  ;;  %v2166_v8 = vpop.f32.mrf.mxu0 }
 0x875   :  { %2570 = vmatpush1.msra.mxu0 %v7115_v1  ;;  %2641 = vmatpush1.msra.mxu1 %v7116_v2  ;;  %v2279_v1 = vpop.f32.mrf.mxu1 }
 0x876   :  { %2571 = vmatprep.subr.mxu0 %v7117_v44  ;;  %2642 = vmatprep.subr.mxu1 %v7118_v34  ;;  %v2168_v36 = vpop.f32.mrf.mxu0 }
 0x877   :  { %2572 = vmatpush1.msra.mxu0 %v7119_v28  ;;  %2605 = vmatprep.mubr.f32.mxu0 %v7066_v25  ;;  %v2281_v2 = vpop.f32.mrf.mxu1 }
 0x878   :  { %2643 = vmatpush1.msra.mxu1 %v7120_v38  ;;  %2676 = vmatprep.mubr.f32.mxu1 %v7066_v25  ;;  %v5928_v11 = vpop.f32.mrf.mxu0 }
 0x879   :  { %2716 = vmatprep.subr.mxu0 %v7121_v12  ;;  %2787 = vmatprep.subr.mxu1 %v7122_v32  ;;  %7123 = vst [vmem:[#allocation42_spill] sm:$0xff] %v5928_v11  ;;  %v5930_v44 = vpop.f32.mrf.mxu1 }
 0x87a   :  { %7124 = vst [vmem:[#allocation19_spill] sm:$0xff] %v5930_v44  ;;  %v5932_v34 = vpop.f32.mrf.mxu0 }
 0x87b   :  { %7125 = vst [vmem:[#allocation43_spill] sm:$0xff] %v5932_v34  ;;  %v5934_v28 = vpop.f32.mrf.mxu1 }
 0x87c   :  { %7126 = vst [vmem:[#allocation20_spill] sm:$0xff] %v5934_v28  ;;  %v5936_v27 = vpop.f32.mrf.mxu0 }
 0x87d   :  { %7127 = vst [vmem:[#allocation44_spill] sm:$0xff] %v5936_v27  ;;  %v5938_v38 = vpop.f32.mrf.mxu1 }
 0x87e   :  { %7128 = vst [vmem:[#allocation21_spill] sm:$0xff] %v5938_v38  ;;  %v5940_v25 = vpop.f32.mrf.mxu0 }
 0x87f   :  { %7129 = vst [vmem:[#allocation55_spill] sm:$0xff] %v5940_v25  ;;  %v5942_v12 = vpop.f32.mrf.mxu1 }
 0x880   :  { %7130 = vst [vmem:[#allocation22_spill] sm:$0xff] %v5942_v12  ;;  %v5944_v32 = vpop.f32.mrf.mxu0 }
 0x881   :  { %7131 = vst [vmem:[#allocation31_spill] sm:$0xff] %v5944_v32  ;;  %v5946_v54 = vpop.f32.mrf.mxu1 }
 0x882   :  { %7132 = vst [vmem:[#allocation23_spill] sm:$0xff] %v5946_v54  ;;  %v5948_v56 = vpop.f32.mrf.mxu0 }
 0x883   :  { %7133 = vst [vmem:[#allocation32_spill] sm:$0xff] %v5948_v56  ;;  %v5950_v11 = vpop.f32.mrf.mxu1 }
 0x884   :  { %7134 = vst [vmem:[#allocation24_spill] sm:$0xff] %v5950_v11  ;;  %v5952_v44 = vpop.f32.mrf.mxu0 }
 0x885   :  { %7135 = vst [vmem:[#allocation33_spill] sm:$0xff] %v5952_v44  ;;  %v5954_v34 = vpop.f32.mrf.mxu1 }
 0x886   :  { %7136 = vst [vmem:[#allocation51_spill] sm:$0xff] %v5954_v34  ;;  %v5956_v28 = vpop.f32.mrf.mxu0  ;;  %v2070_v34 = vld [vmem:[%s6676_s6] sm:$0xf] }
 0x887   :  { %7137 = vst [vmem:[#allocation52_spill] sm:$0xff] %v5956_v28  ;;  %v5958_v27 = vpop.f32.mrf.mxu1  ;;  %v7146_v28 = vld [vmem:[#allocation40_spill] sm:$0xff] }
 0x888   :  { %7138 = vst [vmem:[#allocation63_spill] sm:$0xff] %v5958_v27  ;;  %v5960_v38 = vpop.f32.mrf.mxu0  ;;  %v7147_v27 = vsub.s32 0, %v7146_v28 }
 0x889   :  { %7139 = vst [vmem:[#allocation62_spill] sm:$0xff] %v5960_v38  ;;  %v5962_v25 = vpop.f32.mrf.mxu1 }
 0x88a   :  { %7140 = vst [vmem:[#allocation66_spill] sm:$0xff] %v5962_v25  ;;  %v5964_v12 = vpop.f32.mrf.mxu0  ;;  %v5979_v11 = vrot.slane %v2070_v34, %v7147_v27 }
 0x88b   :  { %7141 = vst [vmem:[#allocation29_spill] sm:$0xff] %v5964_v12  ;;  %v5966_v32 = vpop.f32.mrf.mxu1 }
 0x88c   :  { %7142 = vst [vmem:[#allocation25_spill] sm:$0xff] %v5966_v32  ;;  %v5968_v54 = vpop.f32.mrf.mxu0  ;;  %7148 = vst [vmem:[#allocation54_spill] sm:$0xff] %v5979_v11  ;;  %v7151_v32 = vsub.s32 1, %v7146_v28  ;;  %v2167_v50 = vadd.f32 %v2166_v8, %v5979_v11 }
 0x88d   :  { %7143 = vst [vmem:[#allocation27_spill] sm:$0xff] %v5968_v54  ;;  %v5970_v56 = vpop.f32.mrf.mxu1 }
 0x88e   :  { %7144 = vst [vmem:[#allocation34_spill] sm:$0xff] %v5970_v56  ;;  %v5975_v44 = vpop.f32.mrf.mxu0  ;;  %v5987_v12 = vrot.slane %v2070_v34, %v7151_v32  ;;  %v7155_v32 = vsub.s32 3, %v7146_v28 }
 0x88f   :  { %7145 = vst [vmem:[#allocation53_spill] sm:$0xff] %v5975_v44  ;;  %v5981_v38 = vpop.f32.mrf.mxu1 }
 0x890   :  { %7149 = vst [vmem:[#allocation65_spill] sm:$0xff] %v5981_v38  ;;  %v2169_v44 = vadd.f32 %v2168_v36, %v5987_v12  ;;  %v5999_v61 = vrot.slane %v2070_v34, %v7155_v32 }
 0x892   :  { %7156 = vst [vmem:[#allocation69_spill] sm:$0xff] %v5999_v61  ;;  %v2282_v8 = vadd.f32 %v2281_v2, %v5999_v61 }
 0x914   :  { %v5983_v25 = vpop.f32.mrf.mxu0  ;;  %v5989_v54 = vpop.f32.mrf.mxu1 }
 0x915   :  { %7150 = vst [vmem:[#allocation64_spill] sm:$0xff] %v5983_v25  ;;  %7152 = vst [vmem:[#allocation40_spill] sm:$0xff] %v5989_v54 }
 0x916   :  { %v5991_v56 = vpop.f32.mrf.mxu0  ;;  %v5995_v19 = vpop.f32.mrf.mxu1 }
 0x917   :  { %7153 = vst [vmem:[#allocation67_spill] sm:$0xff] %v5991_v56  ;;  %7154 = vst [vmem:[#allocation68_spill] sm:$0xff] %v5995_v19  ;;  %v7157_v56 = vsub.s32 2, %v7146_v28 }
 0x918   :  { %v2432_v23 = vpop.f32.mrf.mxu0  ;;  %v2503_v25 = vpop.f32.mrf.mxu1 }
 0x919   :  { %v2508_v27 = vadd.f32 %v2432_v23, %v2167_v50  ;;  %v6004_v36 = vrot.slane %v2070_v34, %v7157_v56 }
 0x91a   :  { %v2434_v40 = vpop.f32.mrf.mxu0  ;;  %v2505_v54 = vpop.f32.mrf.mxu1 }
 0x91b   :  { %v3939_v38 = vmul.f32 -1.442695, %v2508_v27  ;;  %v2509_v30 = vadd.f32 %v2434_v40, %v2169_v44  ;;  %v2511_v19 = vadd.f32 %v2505_v54, %v2282_v8  ;;  %v2280_v23 = vadd.f32 %v2279_v1, %v6004_v36  ;;  %v7160_v8 = vld [vmem:[#allocation39_spill] sm:$0xff] }
 0x91d   :  { %4170 = vpow2.f32 %v3939_v38  ;;  %v3940_v24 = vmul.f32 -1.442695, %v2509_v30  ;;  %v3941_v50 = vmul.f32 -1.442695, %v2511_v19  ;;  %v2510_v44 = vadd.f32 %v2503_v25, %v2280_v23  ;;  %v7161_v23 = vld [vmem:[#allocation45_spill] sm:$0xff] }
 0x91f   :  { %4172 = vpow2.f32 %v3940_v24 }
 0x920   :  { %4174 = vpow2.f32 %v3941_v50  ;;  %v7162_v50 = vld [vmem:[#allocation46_spill] sm:$0xff] }
 0x92a   :  { %v4171_v40 = vpop.eup %4170 }
 0x92b   :  { %v2515_v38 = vadd.f32 1.0, %v4171_v40  ;;  %v7163_v40 = vld [vmem:[#allocation57_spill] sm:$0xff] }
 0x92c   :  { %v4173_v30 = vpop.eup %4172 }
 0x92d   :  { %4176 = vrcp.f32 %v2515_v38  ;;  %v2521_v27 = vadd.f32 1.0, %v4173_v30  ;;  %v4175_v24 = vpop.eup %4174  ;;  %v7165_v38 = vld [vmem:[#allocation47_spill] sm:$0xff]  ;;  %v7166_v30 = vld [vmem:[#allocation48_spill] sm:$0xff] }
 0x92e   :  { %4178 = vtanh.f32 %v2510_v44  ;;  %v2528_v28 = vadd.f32 1.0, %v4175_v24  ;;  %v7164_v44 = vld [vmem:[#allocation56_spill] sm:$0xff]  ;;  %v7168_v24 = vld [vmem:[#allocation58_spill] sm:$0xff] }
 0x92f   :  { %4180 = vrcp.f32 %v2521_v27  ;;  %v7167_v27 = vld [vmem:[#allocation59_spill] sm:$0xff] }
 0x930   :  { %4182 = vrcp.f32 %v2528_v28  ;;  %v7171_v28 = vld [vmem:[#allocation49_spill] sm:$0xff] }
 0x93a   :  { %v4177_v32 = vpop.eup %4176 }
 0x93b   :  { %v4179_v2 = vpop.eup %4178 }
 0x93c   :  { %v4181_v61 = vpop.eup %4180  ;;  %v2532_v34 = vmul.f32 %v4179_v2, %v4177_v32  ;;  %v7169_v32 = vld [vmem:[#allocation17_spill] sm:$0xff]  ;;  %v7170_v2 = vld [vmem:[#allocation26_spill] sm:$0xff] }
 0x93d   :  { %v2531_v56 = vmul.f32 0.0, %v4181_v61  ;;  %v4183_v25 = vpop.eup %4182  ;;  %v7159_v61 = vld [vmem:[#allocation38_spill] sm:$0xff] }
 0x93f   :  { %v6007_v54 = vadd.f32 %v2532_v34, %v2531_v56  ;;  %v7172_v56 = vld [vmem:[#allocation50_spill] sm:$0xff]  ;;  %v7173_v34 = vld [vmem:[#allocation61_spill] sm:$0xff] }
 0x941   :  { %4184 = vtanh.f32 %v6007_v54 }
 0x94e   :  { %v4185_v19 = vpop.eup %4184 }
 0x94f   :  { %v6010_v1 = vmul.f32 %v4185_v19, %v4183_v25  ;;  %v7174_v25 = vld [vmem:[#allocation60_spill] sm:$0xff] }
 0x950   :  { %v7175_v19 = vld [vmem:[#allocation28_spill] sm:$0xff] }
 0x951   :  { %7158 = vst [vmem:[#allocation70_spill] sm:$0xff] %v6010_v1  ;;  %2606 = vmatmul.mubr.f32.vlgmr.msra.gmra.mxu0 %v6010_v1  ;;  %2677 = vmatmul.mubr.f32.vlgmr.msra.gmra.mxu1 %v6010_v1  ;;  %v7176_v1 = vld [vmem:[#allocation18_spill] sm:$0xff] }
 0x952   :  { %2717 = vmatpush1.msra.mxu0 %v5665_v46  ;;  %2788 = vmatpush1.msra.mxu1 %v5667_v48 }
 0x953   :  { %2718 = vmatprep.subr.mxu0 %v5671_v58  ;;  %2789 = vmatprep.subr.mxu1 %v5673_v22 }
 0x954   :  { %2719 = vmatpush1.msra.mxu0 %v5677_v60  ;;  %2790 = vmatpush1.msra.mxu1 %v5679_v3 }
 0x955   :  { %2720 = vmatprep.subr.mxu0 %v5683_v57  ;;  %2791 = vmatprep.subr.mxu1 %v5685_v14 }
 0x956   :  { %2721 = vmatpush1.msra.mxu0 %v5689_v62  ;;  %2792 = vmatpush1.msra.mxu1 %v5691_v9 }
 0x957   :  { %2722 = vmatprep.subr.mxu0 %v5695_v52  ;;  %2793 = vmatprep.subr.mxu1 %v5697_v53 }
 0x958   :  { %2723 = vmatpush1.msra.mxu0 %v5701_v51  ;;  %2794 = vmatpush1.msra.mxu1 %v5703_v59 }
 0x959   :  { %2724 = vmatprep.subr.mxu0 %v5707_v4  ;;  %2795 = vmatprep.subr.mxu1 %v5709_v18 }
 0x95a   :  { %2725 = vmatpush1.msra.mxu0 %v5713_v20  ;;  %2796 = vmatpush1.msra.mxu1 %v5715_v42 }
 0x95b   :  { %2726 = vmatprep.subr.mxu0 %v5719_v6  ;;  %2797 = vmatprep.subr.mxu1 %v5721_v10 }
 0x95c   :  { %2727 = vmatpush1.msra.mxu0 %v5725_v13  ;;  %2798 = vmatpush1.msra.mxu1 %v5727_v17 }
 0x95d   :  { %2728 = vmatprep.subr.mxu0 %v5731_v21  ;;  %2799 = vmatprep.subr.mxu1 %v5733_v29 }
 0x95e   :  { %2729 = vmatpush1.msra.mxu0 %v5737_v33  ;;  %2800 = vmatpush1.msra.mxu1 %v5739_v37 }
 0x95f   :  { %2730 = vmatprep.subr.mxu0 %v5743_v41  ;;  %2801 = vmatprep.subr.mxu1 %v5745_v7 }
 0x960   :  { %2731 = vmatpush1.msra.mxu0 %v5749_v15  ;;  %2802 = vmatpush1.msra.mxu1 %v5751_v45 }
 0x961   :  { %2732 = vmatprep.subr.mxu0 %v5755_v16  ;;  %2803 = vmatprep.subr.mxu1 %v5757_v49 }
 0x962   :  { %2733 = vmatpush1.msra.mxu0 %v5761_v26  ;;  %2804 = vmatpush1.msra.mxu1 %v5763_v47 }
 0x963   :  { %2734 = vmatprep.subr.mxu0 %v5767_v0  ;;  %2805 = vmatprep.subr.mxu1 %v5769_v63 }
 0x964   :  { %2735 = vmatpush1.msra.mxu0 %v5773_v39  ;;  %2806 = vmatpush1.msra.mxu1 %v5775_v35 }
 0x965   :  { %2736 = vmatprep.subr.mxu0 %v5779_v55  ;;  %2807 = vmatprep.subr.mxu1 %v5781_v5 }
 0x966   :  { %2737 = vmatpush1.msra.mxu0 %v5785_v43  ;;  %2808 = vmatpush1.msra.mxu1 %v5787_v31 }
 0x967   :  { %2738 = vmatprep.subr.mxu0 %v7159_v61  ;;  %2809 = vmatprep.subr.mxu1 %v7160_v8  ;;  %v7186_v8 = vld [vmem:[#allocation19_spill] sm:$0xff] }
 0x968   :  { %2739 = vmatpush1.msra.mxu0 %v7161_v23  ;;  %2810 = vmatpush1.msra.mxu1 %v7162_v50  ;;  %v7184_v50 = vld [vmem:[#allocation69_spill] sm:$0xff] }
 0x969   :  { %2740 = vmatprep.subr.mxu0 %v7163_v40  ;;  %2811 = vmatprep.subr.mxu1 %v7164_v44 }
 0x96a   :  { %2741 = vmatpush1.msra.mxu0 %v7165_v38  ;;  %2812 = vmatpush1.msra.mxu1 %v7166_v30  ;;  %v7177_v30 = vld [vmem:[#allocation41_spill] sm:$0xff] }
 0x96b   :  { %2742 = vmatprep.subr.mxu0 %v7167_v27  ;;  %2813 = vmatprep.subr.mxu1 %v7168_v24  ;;  %v7178_v27 = vmov 0.0   ;;  %v7179_v24 = vld [vmem:[#allocation30_spill] sm:$0xff] }
 0x96c   :  { %2743 = vmatpush1.msra.mxu0 %v7169_v32  ;;  %2814 = vmatpush1.msra.mxu1 %v7170_v2  ;;  %v7180_v2 = vld [vmem:[#allocation35_spill] sm:$0xff] }
 0x96d   :  { %2744 = vmatprep.subr.mxu0 %v7171_v28  ;;  %2815 = vmatprep.subr.mxu1 %v7172_v56  ;;  %v7181_v28 = vld [vmem:[#allocation36_spill] sm:$0xff] }
 0x96e   :  { %2745 = vmatpush1.msra.mxu0 %v7173_v34  ;;  %2816 = vmatpush1.msra.mxu1 %v7174_v25  ;;  %v7182_v34 = vld [vmem:[#allocation42_spill] sm:$0xff] }
 0x96f   :  { %2746 = vmatprep.subr.mxu0 %v7175_v19  ;;  %2817 = vmatprep.subr.mxu1 %v7176_v1  ;;  %v2173_v56 = vadd.f32 %v7182_v34, %v5979_v11  ;;  %v7183_v19 = vld [vmem:[#allocation43_spill] sm:$0xff]  ;;  %v2286_v34 = vadd.f32 %v7186_v8, %v6004_v36 }
 0x970   :  { %2747 = vmatpush1.msra.mxu0 %v7177_v30  ;;  %2780 = vmatprep.mubr.f32.mxu0 %v7178_v27  ;;  %v2175_v32 = vadd.f32 %v7183_v19, %v5987_v12 }
 0x971   :  { %2818 = vmatpush1.msra.mxu1 %v7179_v24  ;;  %2851 = vmatprep.mubr.f32.mxu1 %v7178_v27 }
 0x972   :  { %2891 = vmatprep.subr.mxu0 %v7180_v2  ;;  %2962 = vmatprep.subr.mxu1 %v7181_v28  ;;  %v7185_v2 = vld [vmem:[#allocation20_spill] sm:$0xff] }
 0x973   :  { %v2288_v23 = vadd.f32 %v7185_v2, %v7184_v50 }
 0xa11   :  { %v2607_v25 = vpop.f32.mrf.mxu0  ;;  %v2678_v40 = vpop.f32.mrf.mxu1 }
 0xa12   :  { %v2683_v1 = vadd.f32 %v2607_v25, %v2173_v56  ;;  %v2685_v11 = vadd.f32 %v2678_v40, %v2286_v34  ;;  %v7200_v40 = vld [vmem:[#allocation26_spill] sm:$0xff]  ;;  %v7203_v34 = vld [vmem:[#allocation61_spill] sm:$0xff] }
 0xa13   :  { %v2609_v38 = vpop.f32.mrf.mxu0  ;;  %v2680_v27 = vpop.f32.mrf.mxu1  ;;  %v7202_v25 = vld [vmem:[#allocation50_spill] sm:$0xff] }
 0xa14   :  { %v3942_v30 = vmul.f32 -1.442695, %v2683_v1  ;;  %v2684_v44 = vadd.f32 %v2609_v38, %v2175_v32  ;;  %v2686_v28 = vadd.f32 %v2680_v27, %v2288_v23 }
 0xa16   :  { %4186 = vpow2.f32 %v3942_v30  ;;  %v3943_v24 = vmul.f32 -1.442695, %v2684_v44  ;;  %v3944_v61 = vmul.f32 -1.442695, %v2686_v28  ;;  %v7201_v28 = vld [vmem:[#allocation49_spill] sm:$0xff] }
 0xa18   :  { %4188 = vpow2.f32 %v3943_v24 }
 0xa19   :  { %4190 = vtanh.f32 %v2685_v11 }
 0xa1a   :  { %4192 = vpow2.f32 %v3944_v61  ;;  %v7199_v61 = vld [vmem:[#allocation17_spill] sm:$0xff] }
 0xa23   :  { %v4187_v31 = vpop.eup %4186 }
 0xa24   :  { %v2690_v19 = vadd.f32 1.0, %v4187_v31 }
 0xa25   :  { %v4189_v56 = vpop.eup %4188 }
 0xa26   :  { %4194 = vrcp.f32 %v2690_v19  ;;  %v2696_v1 = vadd.f32 1.0, %v4189_v56  ;;  %v4191_v44 = vpop.eup %4190  ;;  %v7204_v19 = vld [vmem:[#allocation60_spill] sm:$0xff] }
 0xa27   :  { %v4193_v38 = vpop.eup %4192  ;;  %v7205_v56 = vld [vmem:[#allocation28_spill] sm:$0xff] }
 0xa28   :  { %4196 = vrcp.f32 %v2696_v1  ;;  %v2703_v2 = vadd.f32 1.0, %v4193_v38  ;;  %v7206_v1 = vld [vmem:[#allocation18_spill] sm:$0xff]  ;;  %v7208_v38 = vmov 0.0  }
 0xa2a   :  { %4198 = vrcp.f32 %v2703_v2  ;;  %v7212_v2 = vld [vmem:[#allocation54_spill] sm:$0xff] }
 0xa33   :  { %v4195_v30 = vpop.eup %4194 }
 0xa34   :  { %v2707_v24 = vmul.f32 %v4195_v30, %v4191_v44  ;;  %v7207_v44 = vld [vmem:[#allocation41_spill] sm:$0xff]  ;;  %v7209_v30 = vld [vmem:[#allocation30_spill] sm:$0xff] }
 0xa35   :  { %v4197_v32 = vpop.eup %4196 }
 0xa36   :  { %v2706_v23 = vmul.f32 %v4197_v32, %v6007_v54  ;;  %v7198_v54 = vld [vmem:[#allocation58_spill] sm:$0xff]  ;;  %v7211_v32 = vld [vmem:[#allocation36_spill] sm:$0xff] }
 0xa37   :  { %v4199_v31 = vpop.eup %4198 }
 0xa38   :  { %v6089_v27 = vadd.f32 %v2707_v24, %v2706_v23  ;;  %v7210_v24 = vld [vmem:[#allocation35_spill] sm:$0xff]  ;;  %v7213_v23 = vld [vmem:[#allocation44_spill] sm:$0xff] }
 0xa3a   :  { %4200 = vtanh.f32 %v6089_v27 }
 0xa47   :  { %v4201_v11 = vpop.eup %4200 }
 0xa48   :  { %v6092_v8 = vmul.f32 %v4201_v11, %v4199_v31  ;;  %v2179_v31 = vadd.f32 %v7213_v23, %v7212_v2 }
 0xa4a   :  { %7187 = vst [vmem:[#allocation42_spill] sm:$0xff] %v6092_v8  ;;  %2781 = vmatmul.mubr.f32.vlgmr.msra.gmra.mxu0 %v6092_v8  ;;  %2852 = vmatmul.mubr.f32.vlgmr.msra.gmra.mxu1 %v6092_v8  ;;  %v7214_v8 = vld [vmem:[#allocation55_spill] sm:$0xff] }
 0xa4b   :  { %2892 = vmatpush1.msra.mxu0 %v5665_v46  ;;  %2963 = vmatpush1.msra.mxu1 %v5667_v48  ;;  %v7188_v46 = vld [vmem:[#allocation37_spill] sm:$0xff]  ;;  %v7189_v48 = vld [vmem:[#allocation38_spill] sm:$0xff] }
 0xa4c   :  { %2893 = vmatprep.subr.mxu0 %v5671_v58  ;;  %2964 = vmatprep.subr.mxu1 %v5673_v22  ;;  %v7190_v58 = vld [vmem:[#allocation39_spill] sm:$0xff]  ;;  %v7191_v22 = vld [vmem:[#allocation45_spill] sm:$0xff] }
 0xa4d   :  { %2894 = vmatpush1.msra.mxu0 %v5677_v60  ;;  %2965 = vmatpush1.msra.mxu1 %v5679_v3  ;;  %v7192_v60 = vld [vmem:[#allocation46_spill] sm:$0xff]  ;;  %v7193_v3 = vld [vmem:[#allocation57_spill] sm:$0xff] }
 0xa4e   :  { %2895 = vmatprep.subr.mxu0 %v5683_v57  ;;  %2966 = vmatprep.subr.mxu1 %v5685_v14  ;;  %v7194_v57 = vld [vmem:[#allocation56_spill] sm:$0xff]  ;;  %v7195_v14 = vld [vmem:[#allocation47_spill] sm:$0xff] }
 0xa4f   :  { %2896 = vmatpush1.msra.mxu0 %v5689_v62  ;;  %2967 = vmatpush1.msra.mxu1 %v5691_v9  ;;  %v7196_v62 = vld [vmem:[#allocation48_spill] sm:$0xff]  ;;  %v7197_v9 = vld [vmem:[#allocation59_spill] sm:$0xff] }
 0xa50   :  { %2897 = vmatprep.subr.mxu0 %v5695_v52  ;;  %2968 = vmatprep.subr.mxu1 %v5697_v53 }
 0xa51   :  { %2898 = vmatpush1.msra.mxu0 %v5701_v51  ;;  %2969 = vmatpush1.msra.mxu1 %v5703_v59 }
 0xa52   :  { %2899 = vmatprep.subr.mxu0 %v5707_v4  ;;  %2970 = vmatprep.subr.mxu1 %v5709_v18 }
 0xa53   :  { %2900 = vmatpush1.msra.mxu0 %v5713_v20  ;;  %2971 = vmatpush1.msra.mxu1 %v5715_v42 }
 0xa54   :  { %2901 = vmatprep.subr.mxu0 %v5719_v6  ;;  %2972 = vmatprep.subr.mxu1 %v5721_v10 }
 0xa55   :  { %2902 = vmatpush1.msra.mxu0 %v5725_v13  ;;  %2973 = vmatpush1.msra.mxu1 %v5727_v17 }
 0xa56   :  { %2903 = vmatprep.subr.mxu0 %v5731_v21  ;;  %2974 = vmatprep.subr.mxu1 %v5733_v29 }
 0xa57   :  { %2904 = vmatpush1.msra.mxu0 %v5737_v33  ;;  %2975 = vmatpush1.msra.mxu1 %v5739_v37 }
 0xa58   :  { %2905 = vmatprep.subr.mxu0 %v5743_v41  ;;  %2976 = vmatprep.subr.mxu1 %v5745_v7 }
 0xa59   :  { %2906 = vmatpush1.msra.mxu0 %v5749_v15  ;;  %2977 = vmatpush1.msra.mxu1 %v5751_v45 }
 0xa5a   :  { %2907 = vmatprep.subr.mxu0 %v5755_v16  ;;  %2978 = vmatprep.subr.mxu1 %v5757_v49 }
 0xa5b   :  { %2908 = vmatpush1.msra.mxu0 %v5761_v26  ;;  %2979 = vmatpush1.msra.mxu1 %v5763_v47 }
 0xa5c   :  { %2909 = vmatprep.subr.mxu0 %v5767_v0  ;;  %2980 = vmatprep.subr.mxu1 %v5769_v63 }
 0xa5d   :  { %2910 = vmatpush1.msra.mxu0 %v5773_v39  ;;  %2981 = vmatpush1.msra.mxu1 %v5775_v35 }
 0xa5e   :  { %2911 = vmatprep.subr.mxu0 %v5779_v55  ;;  %2982 = vmatprep.subr.mxu1 %v5781_v5 }
 0xa5f   :  { %2912 = vmatpush1.msra.mxu0 %v5785_v43  ;;  %2983 = vmatpush1.msra.mxu1 %v7188_v46 }
 0xa60   :  { %2913 = vmatprep.subr.mxu0 %v7189_v48  ;;  %2984 = vmatprep.subr.mxu1 %v7190_v58 }
 0xa61   :  { %2914 = vmatpush1.msra.mxu0 %v7191_v22  ;;  %2985 = vmatpush1.msra.mxu1 %v7192_v60 }
 0xa62   :  { %2915 = vmatprep.subr.mxu0 %v7193_v3  ;;  %2986 = vmatprep.subr.mxu1 %v7194_v57 }
 0xa63   :  { %2916 = vmatpush1.msra.mxu0 %v7195_v14  ;;  %2987 = vmatpush1.msra.mxu1 %v7196_v62 }
 0xa64   :  { %2917 = vmatprep.subr.mxu0 %v7197_v9  ;;  %2988 = vmatprep.subr.mxu1 %v7198_v54 }
 0xa65   :  { %2918 = vmatpush1.msra.mxu0 %v7199_v61  ;;  %2989 = vmatpush1.msra.mxu1 %v7200_v40  ;;  %v7216_v40 = vld [vmem:[#allocation21_spill] sm:$0xff] }
 0xa66   :  { %2919 = vmatprep.subr.mxu0 %v7201_v28  ;;  %2990 = vmatprep.subr.mxu1 %v7202_v25  ;;  %v2292_v23 = vadd.f32 %v7216_v40, %v6004_v36 }
 0xa67   :  { %2920 = vmatpush1.msra.mxu0 %v7203_v34  ;;  %2991 = vmatpush1.msra.mxu1 %v7204_v19 }
 0xa68   :  { %2921 = vmatprep.subr.mxu0 %v7205_v56  ;;  %2992 = vmatprep.subr.mxu1 %v7206_v1  ;;  %v2181_v56 = vadd.f32 %v7214_v8, %v5987_v12 }
 0xa69   :  { %2922 = vmatpush1.msra.mxu0 %v7207_v44  ;;  %2955 = vmatprep.mubr.f32.mxu0 %v7208_v38 }
 0xa6a   :  { %2993 = vmatpush1.msra.mxu1 %v7209_v30  ;;  %3026 = vmatprep.mubr.f32.mxu1 %v7208_v38 }
 0xa6b   :  { %3066 = vmatprep.subr.mxu0 %v7210_v24  ;;  %3137 = vmatprep.subr.mxu1 %v7211_v32  ;;  %v7215_v24 = vld [vmem:[#allocation22_spill] sm:$0xff] }
 0xa6c   :  { %v2294_v28 = vadd.f32 %v7215_v24, %v7184_v50  ;;  %v6187_v24 = vld [vmem:[#allocation11 + $0x1d8] sm:$0xff] }
 0xb0a   :  { %v2782_v11 = vpop.f32.mrf.mxu0  ;;  %v2853_v25 = vpop.f32.mrf.mxu1 }
 0xb0b   :  { %v2858_v1 = vadd.f32 %v2782_v11, %v2179_v31  ;;  %v2860_v2 = vadd.f32 %v2853_v25, %v2292_v23  ;;  %v6193_v23 = vld [vmem:[#allocation11 + $0x1d0] sm:$0xff] }
 0xb0c   :  { %v2784_v19 = vpop.f32.mrf.mxu0  ;;  %v2855_v38 = vpop.f32.mrf.mxu1 }
 0xb0d   :  { %v3945_v44 = vmul.f32 -1.442695, %v2858_v1  ;;  %v2859_v34 = vadd.f32 %v2784_v19, %v2181_v56  ;;  %v2861_v32 = vadd.f32 %v2855_v38, %v2294_v28 }
 0xb0f   :  { %4202 = vpow2.f32 %v3945_v44  ;;  %v3946_v30 = vmul.f32 -1.442695, %v2859_v34  ;;  %v3947_v61 = vmul.f32 -1.442695, %v2861_v32  ;;  %v6190_v32 = vld [vmem:[#allocation11 + $0x1c0] sm:$0xff] }
 0xb11   :  { %4204 = vpow2.f32 %v3946_v30 }
 0xb12   :  { %4206 = vtanh.f32 %v2860_v2  ;;  %v6181_v2 = vld [vmem:[#allocation11 + $0x1f0] sm:$0xff] }
 0xb13   :  { %4208 = vpow2.f32 %v3947_v61  ;;  %v6178_v61 = vld [vmem:[#allocation11 + $0x1e0] sm:$0xff] }
 0xb1c   :  { %v4203_v54 = vpop.eup %4202 }
 0xb1d   :  { %v2865_v8 = vadd.f32 1.0, %v4203_v54 }
 0xb1e   :  { %v4205_v31 = vpop.eup %4204 }
 0xb1f   :  { %4210 = vrcp.f32 %v2865_v8  ;;  %v2871_v19 = vadd.f32 1.0, %v4205_v31  ;;  %v4207_v34 = vpop.eup %4206  ;;  %v6196_v8 = vld [vmem:[#allocation11 + $0x1a8] sm:$0xff]  ;;  %v6199_v31 = vld [vmem:[#allocation11 + $0x1b8] sm:$0xff] }
 0xb20   :  { %v4209_v56 = vpop.eup %4208 }
 0xb21   :  { %4212 = vrcp.f32 %v2871_v19  ;;  %v2878_v11 = vadd.f32 1.0, %v4209_v56  ;;  %v6202_v19 = vld [vmem:[#allocation11 + $0x1a0] sm:$0xff] }
 0xb23   :  { %4214 = vrcp.f32 %v2878_v11 }
 0xb2c   :  { %v4211_v1 = vpop.eup %4210 }
 0xb2d   :  { %v2882_v44 = vmul.f32 %v4211_v1, %v4207_v34  ;;  %v6205_v34 = vld [vmem:[#allocation11 + $0x1b0] sm:$0xff] }
 0xb2e   :  { %v4213_v30 = vpop.eup %4212 }
 0xb2f   :  { %v2881_v28 = vmul.f32 %v4213_v30, %v6089_v27  ;;  %v6184_v27 = vld [vmem:[#allocation11 + $0x1c8] sm:$0xff] }
 0xb30   :  { %v4215_v54 = vpop.eup %4214 }
 0xb31   :  { %v6171_v38 = vadd.f32 %v2882_v44, %v2881_v28 }
 0xb33   :  { %4216 = vtanh.f32 %v6171_v38 }
 0xb40   :  { %v4217_v40 = vpop.eup %4216 }
 0xb41   :  { %v6174_v25 = vmul.f32 %v4217_v40, %v4215_v54 }
 0xb43   :  { %7217 = vst [vmem:[#allocation43_spill] sm:$0xff] %v6174_v25  ;;  %2956 = vmatmul.mubr.f32.vlgmr.msra.gmra.mxu0 %v6174_v25  ;;  %3027 = vmatmul.mubr.f32.vlgmr.msra.gmra.mxu1 %v6174_v25  ;;  %v6429_v25 = vld [vmem:[#allocation11 + $0x38] sm:$0xff] }
 0xb44   :  { %3067 = vmatpush1.msra.mxu0 %v6178_v61  ;;  %3138 = vmatpush1.msra.mxu1 %v6181_v2  ;;  %7252 = vst [vmem:[#allocation22_spill] sm:$0xff] %v6429_v25 }
 0xb45   :  { %3068 = vmatprep.subr.mxu0 %v6184_v27  ;;  %3139 = vmatprep.subr.mxu1 %v6187_v24 }
 0xb46   :  { %3069 = vmatpush1.msra.mxu0 %v6190_v32  ;;  %3140 = vmatpush1.msra.mxu1 %v6193_v23 }
 0xb47   :  { %3070 = vmatprep.subr.mxu0 %v6196_v8  ;;  %3141 = vmatprep.subr.mxu1 %v6199_v31 }
 0xb48   :  { %3071 = vmatpush1.msra.mxu0 %v6202_v19  ;;  %3142 = vmatpush1.msra.mxu1 %v6205_v34 }
 0xb49   :  { %3072 = vmatprep.subr.mxu0 %v5695_v52  ;;  %3143 = vmatprep.subr.mxu1 %v5697_v53  ;;  %v7218_v52 = vld [vmem:[#allocation58_spill] sm:$0xff]  ;;  %v7219_v53 = vld [vmem:[#allocation17_spill] sm:$0xff] }
 0xb4a   :  { %3073 = vmatpush1.msra.mxu0 %v5701_v51  ;;  %3144 = vmatpush1.msra.mxu1 %v5703_v59  ;;  %v7220_v51 = vld [vmem:[#allocation26_spill] sm:$0xff]  ;;  %v7221_v59 = vld [vmem:[#allocation49_spill] sm:$0xff] }
 0xb4b   :  { %3074 = vmatprep.subr.mxu0 %v5707_v4  ;;  %3145 = vmatprep.subr.mxu1 %v5709_v18  ;;  %v7222_v4 = vld [vmem:[#allocation50_spill] sm:$0xff]  ;;  %v7223_v18 = vld [vmem:[#allocation61_spill] sm:$0xff] }
 0xb4c   :  { %3075 = vmatpush1.msra.mxu0 %v5713_v20  ;;  %3146 = vmatpush1.msra.mxu1 %v5715_v42  ;;  %v7224_v20 = vld [vmem:[#allocation60_spill] sm:$0xff] }
 0xb4d   :  { %3076 = vmatprep.subr.mxu0 %v5719_v6  ;;  %3147 = vmatprep.subr.mxu1 %v5721_v10  ;;  %v7225_v42 = vld [vmem:[#allocation28_spill] sm:$0xff]  ;;  %v7226_v6 = vld [vmem:[#allocation18_spill] sm:$0xff]  ;;  %v7227_v10 = vld [vmem:[#allocation41_spill] sm:$0xff] }
 0xb4e   :  { %3077 = vmatpush1.msra.mxu0 %v5725_v13  ;;  %3148 = vmatpush1.msra.mxu1 %v5727_v17  ;;  %v7228_v13 = vmov 0.0   ;;  %v7229_v17 = vld [vmem:[#allocation30_spill] sm:$0xff] }
 0xb4f   :  { %3078 = vmatprep.subr.mxu0 %v5731_v21  ;;  %3149 = vmatprep.subr.mxu1 %v5733_v29  ;;  %v6262_v21 = vld [vmem:[#allocation11 + $0x1e8] sm:$0xff]  ;;  %v6265_v29 = vld [vmem:[#allocation11 + $0x1f8] sm:$0xff] }
 0xb50   :  { %3079 = vmatpush1.msra.mxu0 %v5737_v33  ;;  %3150 = vmatpush1.msra.mxu1 %v5739_v37  ;;  %7230 = vst [vmem:[#allocation69_spill] sm:$0xff] %v6262_v21  ;;  %7231 = vst [vmem:[#allocation20_spill] sm:$0xff] %v6265_v29  ;;  %v7232_v33 = vld [vmem:[#allocation54_spill] sm:$0xff]  ;;  %v7233_v37 = vld [vmem:[#allocation31_spill] sm:$0xff] }
 0xb51   :  { %3080 = vmatprep.subr.mxu0 %v5743_v41  ;;  %3151 = vmatprep.subr.mxu1 %v5745_v7  ;;  %v2185_v41 = vadd.f32 %v7233_v37, %v7232_v33  ;;  %v6330_v37 = vld [vmem:[#allocation11 + $0x128] sm:$0xff] }
 0xb52   :  { %3081 = vmatpush1.msra.mxu0 %v5749_v15  ;;  %3152 = vmatpush1.msra.mxu1 %v5751_v45  ;;  %v7234_v15 = vld [vmem:[#allocation32_spill] sm:$0xff] }
 0xb53   :  { %3082 = vmatprep.subr.mxu0 %v5755_v16  ;;  %3153 = vmatprep.subr.mxu1 %v5757_v49  ;;  %v2187_v45 = vadd.f32 %v7234_v15, %v5987_v12  ;;  %v6339_v15 = vld [vmem:[#allocation11 + $0x130] sm:$0xff] }
 0xb54   :  { %3083 = vmatpush1.msra.mxu0 %v5761_v26  ;;  %3154 = vmatpush1.msra.mxu1 %v5763_v47 }
 0xb55   :  { %3084 = vmatprep.subr.mxu0 %v5767_v0  ;;  %3155 = vmatprep.subr.mxu1 %v5769_v63 }
 0xb56   :  { %3085 = vmatpush1.msra.mxu0 %v5773_v39  ;;  %3156 = vmatpush1.msra.mxu1 %v5775_v35  ;;  %v7235_v35 = vld [vmem:[#allocation24_spill] sm:$0xff] }
 0xb57   :  { %3086 = vmatprep.subr.mxu0 %v5779_v55  ;;  %3157 = vmatprep.subr.mxu1 %v5781_v5  ;;  %v2300_v55 = vadd.f32 %v7235_v35, %v7184_v50  ;;  %v6366_v35 = vld [vmem:[#allocation11 + $0xc8] sm:$0xff] }
 0xb58   :  { %3087 = vmatpush1.msra.mxu0 %v5785_v43  ;;  %3158 = vmatpush1.msra.mxu1 %v7188_v46  ;;  %v7236_v43 = vld [vmem:[#allocation23_spill] sm:$0xff] }
 0xb59   :  { %3088 = vmatprep.subr.mxu0 %v7189_v48  ;;  %3159 = vmatprep.subr.mxu1 %v7190_v58  ;;  %v2298_v46 = vadd.f32 %v7236_v43, %v6004_v36  ;;  %v6375_v43 = vld [vmem:[#allocation11 + $0xd0] sm:$0xff] }
 0xb5a   :  { %3089 = vmatpush1.msra.mxu0 %v7191_v22  ;;  %3160 = vmatpush1.msra.mxu1 %v7192_v60 }
 0xb5b   :  { %3090 = vmatprep.subr.mxu0 %v7193_v3  ;;  %3161 = vmatprep.subr.mxu1 %v7194_v57 }
 0xb5c   :  { %3091 = vmatpush1.msra.mxu0 %v7195_v14  ;;  %3162 = vmatpush1.msra.mxu1 %v7196_v62 }
 0xb5d   :  { %3092 = vmatprep.subr.mxu0 %v7197_v9  ;;  %3163 = vmatprep.subr.mxu1 %v7218_v52  ;;  %v6297_v52 = vld [vmem:[#allocation11 + $0x198] sm:$0xff] }
 0xb5e   :  { %3093 = vmatpush1.msra.mxu0 %v7219_v53  ;;  %3164 = vmatpush1.msra.mxu1 %v7220_v51  ;;  %v6300_v53 = vld [vmem:[#allocation11 + $0x180] sm:$0xff]  ;;  %v6303_v51 = vld [vmem:[#allocation11 + $0x190] sm:$0xff] }
 0xb5f   :  { %3094 = vmatprep.subr.mxu0 %v7221_v59  ;;  %3165 = vmatprep.subr.mxu1 %v7222_v4  ;;  %v6306_v59 = vld [vmem:[#allocation11 + $0x168] sm:$0xff]  ;;  %v6309_v4 = vld [vmem:[#allocation11 + $0x178] sm:$0xff] }
 0xb60   :  { %3095 = vmatpush1.msra.mxu0 %v7223_v18  ;;  %3166 = vmatpush1.msra.mxu1 %v7224_v20  ;;  %v6312_v18 = vld [vmem:[#allocation11 + $0x160] sm:$0xff]  ;;  %v6315_v20 = vld [vmem:[#allocation11 + $0x170] sm:$0xff] }
 0xb61   :  { %3096 = vmatprep.subr.mxu0 %v7225_v42  ;;  %3167 = vmatprep.subr.mxu1 %v7226_v6  ;;  %v6318_v42 = vld [vmem:[#allocation11 + $0x148] sm:$0xff]  ;;  %v6321_v6 = vld [vmem:[#allocation11 + $0x158] sm:$0xff] }
 0xb62   :  { %3097 = vmatpush1.msra.mxu0 %v7227_v10  ;;  %3130 = vmatprep.mubr.f32.mxu0 %v7228_v13  ;;  %v6324_v10 = vld [vmem:[#allocation11 + $0x140] sm:$0xff] }
 0xb63   :  { %3168 = vmatpush1.msra.mxu1 %v7229_v17  ;;  %3201 = vmatprep.mubr.f32.mxu1 %v7228_v13  ;;  %v6327_v17 = vld [vmem:[#allocation11 + $0x150] sm:$0xff] }
 0xb64   :  { %3241 = vmatprep.subr.mxu0 %v6262_v21  ;;  %3312 = vmatprep.subr.mxu1 %v6265_v29 }
 0xc03   :  { %v2957_v7 = vpop.f32.mrf.mxu0  ;;  %v3028_v0 = vpop.f32.mrf.mxu1 }
 0xc04   :  { %v3033_v16 = vadd.f32 %v2957_v7, %v2185_v41  ;;  %v3035_v48 = vadd.f32 %v3028_v0, %v2298_v46  ;;  %v6333_v41 = vld [vmem:[#allocation11 + $0x138] sm:$0xff]  ;;  %v6336_v7 = vld [vmem:[#allocation11 + $0x120] sm:$0xff]  ;;  %v6378_v46 = vld [vmem:[#allocation11 + $0xa8] sm:$0xff] }
 0xc05   :  { %v2959_v49 = vpop.f32.mrf.mxu0  ;;  %v3030_v39 = vpop.f32.mrf.mxu1  ;;  %v6357_v0 = vld [vmem:[#allocation11 + $0xf8] sm:$0xff] }
 0xc06   :  { %v3948_v26 = vmul.f32 -1.442695, %v3033_v16  ;;  %v3034_v47 = vadd.f32 %v2959_v49, %v2187_v45  ;;  %v3036_v5 = vadd.f32 %v3030_v39, %v2300_v55  ;;  %v6342_v45 = vld [vmem:[#allocation11 + $0x108] sm:$0xff]  ;;  %v6345_v16 = vld [vmem:[#allocation11 + $0x118] sm:$0xff]  ;;  %v6348_v49 = vld [vmem:[#allocation11 + $0x100] sm:$0xff] }
 0xc07   :  { %v6363_v39 = vld [vmem:[#allocation11 + $0xf0] sm:$0xff]  ;;  %v6369_v55 = vld [vmem:[#allocation11 + $0xd8] sm:$0xff] }
 0xc08   :  { %4218 = vpow2.f32 %v3948_v26  ;;  %v3949_v63 = vmul.f32 -1.442695, %v3034_v47  ;;  %v3950_v58 = vmul.f32 -1.442695, %v3036_v5  ;;  %v6351_v26 = vld [vmem:[#allocation11 + $0x110] sm:$0xff]  ;;  %v6354_v47 = vld [vmem:[#allocation11 + $0xe8] sm:$0xff] }
 0xc09   :  { %v6372_v5 = vld [vmem:[#allocation11 + $0xc0] sm:$0xff] }
 0xc0a   :  { %4220 = vpow2.f32 %v3949_v63  ;;  %v6360_v63 = vld [vmem:[#allocation11 + $0xe0] sm:$0xff] }
 0xc0b   :  { %4222 = vtanh.f32 %v3035_v48  ;;  %v6381_v48 = vld [vmem:[#allocation11 + $0xb8] sm:$0xff] }
 0xc0c   :  { %4224 = vpow2.f32 %v3950_v58  ;;  %v6384_v58 = vld [vmem:[#allocation11 + $0xa0] sm:$0xff] }
 0xc15   :  { %v4219_v22 = vpop.eup %4218 }
 0xc16   :  { %v3040_v60 = vadd.f32 1.0, %v4219_v22  ;;  %v6387_v22 = vld [vmem:[#allocation11 + $0xb0] sm:$0xff] }
 0xc17   :  { %v4221_v3 = vpop.eup %4220  ;;  %7238 = vst [vmem:[#allocation37_spill] sm:$0xff] %v6387_v22 }
 0xc18   :  { %4226 = vrcp.f32 %v3040_v60  ;;  %v3046_v57 = vadd.f32 1.0, %v4221_v3  ;;  %v4223_v14 = vpop.eup %4222  ;;  %v6390_v60 = vld [vmem:[#allocation11 + $0x88] sm:$0xff]  ;;  %v6393_v3 = vld [vmem:[#allocation11 + $0x98] sm:$0xff] }
 0xc19   :  { %v4225_v62 = vpop.eup %4224  ;;  %7239 = vst [vmem:[#allocation38_spill] sm:$0xff] %v6390_v60  ;;  %7240 = vst [vmem:[#allocation39_spill] sm:$0xff] %v6393_v3 }
 0xc1a   :  { %4228 = vrcp.f32 %v3046_v57  ;;  %v3053_v44 = vadd.f32 1.0, %v4225_v62  ;;  %v6396_v57 = vld [vmem:[#allocation11 + $0x80] sm:$0xff]  ;;  %v6402_v62 = vld [vmem:[#allocation11 + $0x68] sm:$0xff] }
 0xc1b   :  { %7241 = vst [vmem:[#allocation45_spill] sm:$0xff] %v6396_v57  ;;  %7243 = vst [vmem:[#allocation57_spill] sm:$0xff] %v6402_v62 }
 0xc1c   :  { %4230 = vrcp.f32 %v3053_v44  ;;  %v6414_v44 = vld [vmem:[#allocation11 + $0x48] sm:$0xff] }
 0xc1d   :  { %7247 = vst [vmem:[#allocation59_spill] sm:$0xff] %v6414_v44 }
 0xc25   :  { %v4227_v9 = vpop.eup %4226 }
 0xc26   :  { %v3057_v56 = vmul.f32 %v4227_v9, %v4223_v14  ;;  %v6399_v14 = vld [vmem:[#allocation11 + $0x90] sm:$0xff]  ;;  %v6405_v9 = vld [vmem:[#allocation11 + $0x78] sm:$0xff] }
 0xc27   :  { %v4229_v1 = vpop.eup %4228  ;;  %7242 = vst [vmem:[#allocation46_spill] sm:$0xff] %v6399_v14  ;;  %7244 = vst [vmem:[#allocation56_spill] sm:$0xff] %v6405_v9 }
 0xc28   :  { %v3056_v30 = vmul.f32 %v4229_v1, %v6171_v38  ;;  %v6294_v38 = vld [vmem:[#allocation11 + $0x188] sm:$0xff]  ;;  %v6411_v1 = vld [vmem:[#allocation11 + $0x70] sm:$0xff] }
 0xc29   :  { %v4231_v28 = vpop.eup %4230  ;;  %7246 = vst [vmem:[#allocation48_spill] sm:$0xff] %v6411_v1 }
 0xc2a   :  { %v6277_v11 = vadd.f32 %v3057_v56, %v3056_v30  ;;  %v6408_v56 = vld [vmem:[#allocation11 + $0x60] sm:$0xff]  ;;  %v6417_v30 = vld [vmem:[#allocation11 + $0x58] sm:$0xff] }
 0xc2b   :  { %7245 = vst [vmem:[#allocation47_spill] sm:$0xff] %v6408_v56  ;;  %7248 = vst [vmem:[#allocation35_spill] sm:$0xff] %v6417_v30 }
 0xc2c   :  { %4232 = vtanh.f32 %v6277_v11 }
 0xc39   :  { %v4233_v54 = vpop.eup %4232 }
 0xc3a   :  { %v6280_v40 = vmul.f32 %v4233_v54, %v4231_v28  ;;  %v6420_v28 = vld [vmem:[#allocation11 + $0x40] sm:$0xff]  ;;  %v6423_v54 = vld [vmem:[#allocation11 + $0x50] sm:$0xff] }
 0xc3b   :  { %7249 = vst [vmem:[#allocation36_spill] sm:$0xff] %v6420_v28  ;;  %7250 = vst [vmem:[#allocation44_spill] sm:$0xff] %v6423_v54 }
 0xc3c   :  { %7237 = vst [vmem:[#allocation19_spill] sm:$0xff] %v6280_v40  ;;  %3131 = vmatmul.mubr.f32.vlgmr.msra.gmra.mxu0 %v6280_v40  ;;  %3202 = vmatmul.mubr.f32.vlgmr.msra.gmra.mxu1 %v6280_v40  ;;  %v6426_v40 = vld [vmem:[#allocation11 + $0x28] sm:$0xff] }
 0xc3d   :  { %3242 = vmatpush1.msra.mxu0 %v6178_v61  ;;  %3313 = vmatpush1.msra.mxu1 %v6181_v2  ;;  %7251 = vst [vmem:[#allocation55_spill] sm:$0xff] %v6426_v40 }
 0xc3e   :  { %3243 = vmatprep.subr.mxu0 %v6184_v27  ;;  %3314 = vmatprep.subr.mxu1 %v6187_v24 }
 0xc3f   :  { %3244 = vmatpush1.msra.mxu0 %v6190_v32  ;;  %3315 = vmatpush1.msra.mxu1 %v6193_v23 }
 0xc40   :  { %3245 = vmatprep.subr.mxu0 %v6196_v8  ;;  %3316 = vmatprep.subr.mxu1 %v6199_v31 }
 0xc41   :  { %3246 = vmatpush1.msra.mxu0 %v6202_v19  ;;  %3317 = vmatpush1.msra.mxu1 %v6205_v34 }
 0xc42   :  { %3247 = vmatprep.subr.mxu0 %v6294_v38  ;;  %3318 = vmatprep.subr.mxu1 %v6297_v52 }
 0xc43   :  { %3248 = vmatpush1.msra.mxu0 %v6300_v53  ;;  %3319 = vmatpush1.msra.mxu1 %v6303_v51 }
 0xc44   :  { %3249 = vmatprep.subr.mxu0 %v6306_v59  ;;  %3320 = vmatprep.subr.mxu1 %v6309_v4 }
 0xc45   :  { %3250 = vmatpush1.msra.mxu0 %v6312_v18  ;;  %3321 = vmatpush1.msra.mxu1 %v6315_v20 }
 0xc46   :  { %3251 = vmatprep.subr.mxu0 %v6318_v42  ;;  %3322 = vmatprep.subr.mxu1 %v6321_v6 }
 0xc47   :  { %3252 = vmatpush1.msra.mxu0 %v6324_v10  ;;  %3323 = vmatpush1.msra.mxu1 %v6327_v17 }
 0xc48   :  { %3253 = vmatprep.subr.mxu0 %v6330_v37  ;;  %3324 = vmatprep.subr.mxu1 %v6333_v41 }
 0xc49   :  { %3254 = vmatpush1.msra.mxu0 %v6336_v7  ;;  %3325 = vmatpush1.msra.mxu1 %v6339_v15 }
 0xc4a   :  { %3255 = vmatprep.subr.mxu0 %v6342_v45  ;;  %3326 = vmatprep.subr.mxu1 %v6345_v16 }
 0xc4b   :  { %3256 = vmatpush1.msra.mxu0 %v6348_v49  ;;  %3327 = vmatpush1.msra.mxu1 %v6351_v26 }
 0xc4c   :  { %3257 = vmatprep.subr.mxu0 %v6354_v47  ;;  %3328 = vmatprep.subr.mxu1 %v6357_v0 }
 0xc4d   :  { %3258 = vmatpush1.msra.mxu0 %v6360_v63  ;;  %3329 = vmatpush1.msra.mxu1 %v6363_v39 }
 0xc4e   :  { %3259 = vmatprep.subr.mxu0 %v6366_v35  ;;  %3330 = vmatprep.subr.mxu1 %v6369_v55 }
 0xc4f   :  { %3260 = vmatpush1.msra.mxu0 %v6372_v5  ;;  %3331 = vmatpush1.msra.mxu1 %v6375_v43 }
 0xc50   :  { %3261 = vmatprep.subr.mxu0 %v6378_v46  ;;  %3332 = vmatprep.subr.mxu1 %v6381_v48 }
 0xc51   :  { %3262 = vmatpush1.msra.mxu0 %v6384_v58  ;;  %3333 = vmatpush1.msra.mxu1 %v6387_v22 }
 0xc52   :  { %3263 = vmatprep.subr.mxu0 %v6390_v60  ;;  %3334 = vmatprep.subr.mxu1 %v6393_v3  ;;  %v7262_v3 = vld [vmem:[#allocation51_spill] sm:$0xff] }
 0xc53   :  { %3264 = vmatpush1.msra.mxu0 %v6396_v57  ;;  %3335 = vmatpush1.msra.mxu1 %v6399_v14 }
 0xc54   :  { %3265 = vmatprep.subr.mxu0 %v6402_v62  ;;  %3336 = vmatprep.subr.mxu1 %v6405_v9 }
 0xc55   :  { %3266 = vmatpush1.msra.mxu0 %v6408_v56  ;;  %3337 = vmatpush1.msra.mxu1 %v6411_v1 }
 0xc56   :  { %3267 = vmatprep.subr.mxu0 %v6414_v44  ;;  %3338 = vmatprep.subr.mxu1 %v6417_v30  ;;  %v6432_v44 = vld [vmem:[#allocation11 + $0x20] sm:$0xff]  ;;  %v6435_v30 = vld [vmem:[#allocation11 + $0x30] sm:$0xff] }
 0xc57   :  { %3268 = vmatpush1.msra.mxu0 %v6420_v28  ;;  %3339 = vmatpush1.msra.mxu1 %v6423_v54  ;;  %7253 = vst [vmem:[#allocation21_spill] sm:$0xff] %v6432_v44  ;;  %7254 = vst [vmem:[#allocation58_spill] sm:$0xff] %v6435_v30  ;;  %v6438_v28 = vld [vmem:[#allocation11 + $0x8] sm:$0xff]  ;;  %v6441_v54 = vld [vmem:[#allocation11 + $0x18] sm:$0xff] }
 0xc58   :  { %3269 = vmatprep.subr.mxu0 %v6426_v40  ;;  %3340 = vmatprep.subr.mxu1 %v6429_v25  ;;  %7255 = vst [vmem:[#allocation17_spill] sm:$0xff] %v6438_v28  ;;  %7256 = vst [vmem:[#allocation26_spill] sm:$0xff] %v6441_v54  ;;  %v6444_v40 = vld [vmem:[#allocation11] sm:$0xff]  ;;  %v6448_v25 = vld [vmem:[#allocation11 + $0x10] sm:$0xff] }
 0xc59   :  { %3270 = vmatpush1.msra.mxu0 %v6432_v44  ;;  %3341 = vmatpush1.msra.mxu1 %v6435_v30  ;;  %7257 = vst [vmem:[#allocation49_spill] sm:$0xff] %v6444_v40  ;;  %7258 = vst [vmem:[#allocation50_spill] sm:$0xff] %v6448_v25  ;;  %v7260_v44 = vld [vmem:[#allocation52_spill] sm:$0xff] }
 0xc5a   :  { %3271 = vmatprep.subr.mxu0 %v6438_v28  ;;  %3342 = vmatprep.subr.mxu1 %v6441_v54  ;;  %v7259_v28 = vld [vmem:[#allocation33_spill] sm:$0xff]  ;;  %v2193_v1 = vadd.f32 %v7260_v44, %v5987_v12 }
 0xc5b   :  { %3272 = vmatpush1.msra.mxu0 %v6444_v40  ;;  %3305 = vmatprep.mubr.f32.mxu0 %v7228_v13  ;;  %v2191_v30 = vadd.f32 %v7259_v28, %v7232_v33  ;;  %v2304_v28 = vadd.f32 %v7262_v3, %v6004_v36  ;;  %v7266_v3 = vld [vmem:[#allocation39_spill] sm:$0xff] }
 0xc5c   :  { %3343 = vmatpush1.msra.mxu1 %v6448_v25  ;;  %3376 = vmatprep.mubr.f32.mxu1 %v7228_v13 }
 0xc5d   :  { %3416 = vmatprep.subr.mxu0 %v6262_v21  ;;  %3487 = vmatprep.subr.mxu1 %v6265_v29  ;;  %v7261_v21 = vld [vmem:[#allocation63_spill] sm:$0xff] }
 0xc5e   :  { %v2306_v57 = vadd.f32 %v7261_v21, %v7184_v50 }
 0xcfc   :  { %v3132_v54 = vpop.f32.mrf.mxu0  ;;  %v3203_v14 = vpop.f32.mrf.mxu1 }
 0xcfd   :  { %v3208_v40 = vadd.f32 %v3132_v54, %v2191_v30  ;;  %v3210_v33 = vadd.f32 %v3203_v14, %v2304_v28  ;;  %v7267_v14 = vld [vmem:[#allocation45_spill] sm:$0xff]  ;;  %v7268_v54 = vld [vmem:[#allocation46_spill] sm:$0xff] }
 0xcfe   :  { %v3134_v56 = vpop.f32.mrf.mxu0  ;;  %v3205_v13 = vpop.f32.mrf.mxu1  ;;  %v7269_v28 = vld [vmem:[#allocation57_spill] sm:$0xff] }
 0xcff   :  { %v3951_v9 = vmul.f32 -1.442695, %v3208_v40  ;;  %v3209_v62 = vadd.f32 %v3134_v56, %v2193_v1  ;;  %v3211_v29 = vadd.f32 %v3205_v13, %v2306_v57 }
 0xd01   :  { %4234 = vpow2.f32 %v3951_v9  ;;  %v3952_v25 = vmul.f32 -1.442695, %v3209_v62  ;;  %v3953_v60 = vmul.f32 -1.442695, %v3211_v29 }
 0xd03   :  { %4236 = vpow2.f32 %v3952_v25 }
 0xd04   :  { %4238 = vtanh.f32 %v3210_v33 }
 0xd05   :  { %4240 = vpow2.f32 %v3953_v60  ;;  %v7265_v60 = vld [vmem:[#allocation38_spill] sm:$0xff] }
 0xd0e   :  { %v4235_v22 = vpop.eup %4234 }
 0xd0f   :  { %v3215_v44 = vadd.f32 1.0, %v4235_v22 }
 0xd10   :  { %v4237_v30 = vpop.eup %4236 }
 0xd11   :  { %4242 = vrcp.f32 %v3215_v44  ;;  %v3221_v40 = vadd.f32 1.0, %v4237_v30  ;;  %v4239_v62 = vpop.eup %4238  ;;  %v7270_v44 = vld [vmem:[#allocation56_spill] sm:$0xff]  ;;  %v7271_v30 = vld [vmem:[#allocation47_spill] sm:$0xff] }
 0xd12   :  { %v4241_v25 = vpop.eup %4240 }
 0xd13   :  { %4244 = vrcp.f32 %v3221_v40  ;;  %v3228_v21 = vadd.f32 1.0, %v4241_v25  ;;  %v7272_v40 = vld [vmem:[#allocation48_spill] sm:$0xff]  ;;  %v7274_v25 = vld [vmem:[#allocation35_spill] sm:$0xff] }
 0xd15   :  { %4246 = vrcp.f32 %v3228_v21  ;;  %v7278_v21 = vld [vmem:[#allocation22_spill] sm:$0xff] }
 0xd1e   :  { %v4243_v9 = vpop.eup %4242 }
 0xd1f   :  { %v3232_v56 = vmul.f32 %v4243_v9, %v4239_v62  ;;  %v7273_v62 = vld [vmem:[#allocation59_spill] sm:$0xff]  ;;  %v7275_v9 = vld [vmem:[#allocation36_spill] sm:$0xff] }
 0xd20   :  { %v4245_v1 = vpop.eup %4244 }
 0xd21   :  { %v3231_v13 = vmul.f32 %v4245_v1, %v6277_v11  ;;  %v7264_v11 = vld [vmem:[#allocation37_spill] sm:$0xff]  ;;  %v7277_v1 = vld [vmem:[#allocation55_spill] sm:$0xff] }
 0xd22   :  { %v4247_v29 = vpop.eup %4246 }
 0xd23   :  { %v6463_v57 = vadd.f32 %v3232_v56, %v3231_v13  ;;  %v7276_v56 = vld [vmem:[#allocation44_spill] sm:$0xff]  ;;  %v7279_v13 = vld [vmem:[#allocation21_spill] sm:$0xff] }
 0xd25   :  { %4248 = vtanh.f32 %v6463_v57 }
 0xd32   :  { %v4249_v33 = vpop.eup %4248 }
 0xd33   :  { %v6466_v22 = vmul.f32 %v4249_v33, %v4247_v29  ;;  %v7280_v29 = vld [vmem:[#allocation58_spill] sm:$0xff]  ;;  %v7281_v33 = vld [vmem:[#allocation17_spill] sm:$0xff] }
 0xd35   :  { %7263 = vst [vmem:[#allocation61_spill] sm:$0xff] %v6466_v22  ;;  %3306 = vmatmul.mubr.f32.vlgmr.msra.gmra.mxu0 %v6466_v22  ;;  %3377 = vmatmul.mubr.f32.vlgmr.msra.gmra.mxu1 %v6466_v22  ;;  %v7282_v22 = vld [vmem:[#allocation26_spill] sm:$0xff] }
 0xd36   :  { %3417 = vmatpush1.msra.mxu0 %v6178_v61  ;;  %3488 = vmatpush1.msra.mxu1 %v6181_v2 }
 0xd37   :  { %3418 = vmatprep.subr.mxu0 %v6184_v27  ;;  %3489 = vmatprep.subr.mxu1 %v6187_v24 }
 0xd38   :  { %3419 = vmatpush1.msra.mxu0 %v6190_v32  ;;  %3490 = vmatpush1.msra.mxu1 %v6193_v23 }
 0xd39   :  { %3420 = vmatprep.subr.mxu0 %v6196_v8  ;;  %3491 = vmatprep.subr.mxu1 %v6199_v31 }
 0xd3a   :  { %3421 = vmatpush1.msra.mxu0 %v6202_v19  ;;  %3492 = vmatpush1.msra.mxu1 %v6205_v34 }
 0xd3b   :  { %3422 = vmatprep.subr.mxu0 %v6294_v38  ;;  %3493 = vmatprep.subr.mxu1 %v6297_v52 }
 0xd3c   :  { %3423 = vmatpush1.msra.mxu0 %v6300_v53  ;;  %3494 = vmatpush1.msra.mxu1 %v6303_v51 }
 0xd3d   :  { %3424 = vmatprep.subr.mxu0 %v6306_v59  ;;  %3495 = vmatprep.subr.mxu1 %v6309_v4 }
 0xd3e   :  { %3425 = vmatpush1.msra.mxu0 %v6312_v18  ;;  %3496 = vmatpush1.msra.mxu1 %v6315_v20 }
 0xd3f   :  { %3426 = vmatprep.subr.mxu0 %v6318_v42  ;;  %3497 = vmatprep.subr.mxu1 %v6321_v6 }
 0xd40   :  { %3427 = vmatpush1.msra.mxu0 %v6324_v10  ;;  %3498 = vmatpush1.msra.mxu1 %v6327_v17 }
 0xd41   :  { %3428 = vmatprep.subr.mxu0 %v6330_v37  ;;  %3499 = vmatprep.subr.mxu1 %v6333_v41 }
 0xd42   :  { %3429 = vmatpush1.msra.mxu0 %v6336_v7  ;;  %3500 = vmatpush1.msra.mxu1 %v6339_v15 }
 0xd43   :  { %3430 = vmatprep.subr.mxu0 %v6342_v45  ;;  %3501 = vmatprep.subr.mxu1 %v6345_v16 }
 0xd44   :  { %3431 = vmatpush1.msra.mxu0 %v6348_v49  ;;  %3502 = vmatpush1.msra.mxu1 %v6351_v26 }
 0xd45   :  { %3432 = vmatprep.subr.mxu0 %v6354_v47  ;;  %3503 = vmatprep.subr.mxu1 %v6357_v0 }
 0xd46   :  { %3433 = vmatpush1.msra.mxu0 %v6360_v63  ;;  %3504 = vmatpush1.msra.mxu1 %v6363_v39 }
 0xd47   :  { %3434 = vmatprep.subr.mxu0 %v6366_v35  ;;  %3505 = vmatprep.subr.mxu1 %v6369_v55 }
 0xd48   :  { %3435 = vmatpush1.msra.mxu0 %v6372_v5  ;;  %3506 = vmatpush1.msra.mxu1 %v6375_v43 }
 0xd49   :  { %3436 = vmatprep.subr.mxu0 %v6378_v46  ;;  %3507 = vmatprep.subr.mxu1 %v6381_v48 }
 0xd4a   :  { %3437 = vmatpush1.msra.mxu0 %v6384_v58  ;;  %3508 = vmatpush1.msra.mxu1 %v7264_v11 }
 0xd4b   :  { %3438 = vmatprep.subr.mxu0 %v7265_v60  ;;  %3509 = vmatprep.subr.mxu1 %v7266_v3  ;;  %v7292_v3 = vld [vmem:[#allocation66_spill] sm:$0xff] }
 0xd4c   :  { %3439 = vmatpush1.msra.mxu0 %v7267_v14  ;;  %3510 = vmatpush1.msra.mxu1 %v7268_v54 }
 0xd4d   :  { %3440 = vmatprep.subr.mxu0 %v7269_v28  ;;  %3511 = vmatprep.subr.mxu1 %v7270_v44 }
 0xd4e   :  { %3441 = vmatpush1.msra.mxu0 %v7271_v30  ;;  %3512 = vmatpush1.msra.mxu1 %v7272_v40  ;;  %v7283_v40 = vld [vmem:[#allocation49_spill] sm:$0xff] }
 0xd4f   :  { %3442 = vmatprep.subr.mxu0 %v7273_v62  ;;  %3513 = vmatprep.subr.mxu1 %v7274_v25  ;;  %v7284_v62 = vmov 0.0   ;;  %v7285_v25 = vld [vmem:[#allocation50_spill] sm:$0xff] }
 0xd50   :  { %3443 = vmatpush1.msra.mxu0 %v7275_v9  ;;  %3514 = vmatpush1.msra.mxu1 %v7276_v56  ;;  %v7286_v56 = vld [vmem:[#allocation69_spill] sm:$0xff] }
 0xd51   :  { %3444 = vmatprep.subr.mxu0 %v7277_v1  ;;  %3515 = vmatprep.subr.mxu1 %v7278_v21  ;;  %v7287_v1 = vld [vmem:[#allocation20_spill] sm:$0xff]  ;;  %v7288_v21 = vld [vmem:[#allocation54_spill] sm:$0xff] }
 0xd52   :  { %3445 = vmatpush1.msra.mxu0 %v7279_v13  ;;  %3516 = vmatpush1.msra.mxu1 %v7280_v29  ;;  %v7289_v13 = vld [vmem:[#allocation62_spill] sm:$0xff] }
 0xd53   :  { %3446 = vmatprep.subr.mxu0 %v7281_v33  ;;  %3517 = vmatprep.subr.mxu1 %v7282_v22  ;;  %v2197_v9 = vadd.f32 %v7289_v13, %v7288_v21  ;;  %v7290_v33 = vld [vmem:[#allocation29_spill] sm:$0xff]  ;;  %v2310_v13 = vadd.f32 %v7292_v3, %v6004_v36 }
 0xd54   :  { %3447 = vmatpush1.msra.mxu0 %v7283_v40  ;;  %3480 = vmatprep.mubr.f32.mxu0 %v7284_v62  ;;  %v2199_v30 = vadd.f32 %v7290_v33, %v5987_v12 }
 0xd55   :  { %3518 = vmatpush1.msra.mxu1 %v7285_v25  ;;  %3551 = vmatprep.mubr.f32.mxu1 %v7284_v62 }
 0xd56   :  { %3591 = vmatprep.subr.mxu0 %v7286_v56  ;;  %3662 = vmatprep.subr.mxu1 %v7287_v1  ;;  %v7291_v56 = vld [vmem:[#allocation25_spill] sm:$0xff] }
 0xd57   :  { %v2312_v14 = vadd.f32 %v7291_v56, %v7184_v50 }
 0xdf5   :  { %v3307_v29 = vpop.f32.mrf.mxu0  ;;  %v3378_v54 = vpop.f32.mrf.mxu1 }
 0xdf6   :  { %v3383_v22 = vadd.f32 %v3307_v29, %v2197_v9  ;;  %v3385_v21 = vadd.f32 %v3378_v54, %v2310_v13 }
 0xdf7   :  { %v3309_v44 = vpop.f32.mrf.mxu0  ;;  %v3380_v62 = vpop.f32.mrf.mxu1 }
 0xdf8   :  { %v3954_v40 = vmul.f32 -1.442695, %v3383_v22  ;;  %v3384_v28 = vadd.f32 %v3309_v44, %v2199_v30  ;;  %v3386_v1 = vadd.f32 %v3380_v62, %v2312_v14 }
 0xdfa   :  { %4250 = vpow2.f32 %v3954_v40  ;;  %v3955_v25 = vmul.f32 -1.442695, %v3384_v28  ;;  %v3956_v60 = vmul.f32 -1.442695, %v3386_v1 }
 0xdfc   :  { %4252 = vpow2.f32 %v3955_v25 }
 0xdfd   :  { %4254 = vtanh.f32 %v3385_v21 }
 0xdfe   :  { %4256 = vpow2.f32 %v3956_v60 }
 0xe07   :  { %v4251_v11 = vpop.eup %4250 }
 0xe08   :  { %v3390_v33 = vadd.f32 1.0, %v4251_v11 }
 0xe09   :  { %v4253_v9 = vpop.eup %4252 }
 0xe0a   :  { %4258 = vrcp.f32 %v3390_v33  ;;  %v3396_v22 = vadd.f32 1.0, %v4253_v9  ;;  %v4255_v28 = vpop.eup %4254 }
 0xe0b   :  { %v4257_v44 = vpop.eup %4256 }
 0xe0c   :  { %4260 = vrcp.f32 %v3396_v22  ;;  %v3403_v29 = vadd.f32 1.0, %v4257_v44 }
 0xe0e   :  { %4262 = vrcp.f32 %v3403_v29 }
 0xe17   :  { %v4259_v30 = vpop.eup %4258 }
 0xe18   :  { %v3407_v40 = vmul.f32 %v4259_v30, %v4255_v28 }
 0xe19   :  { %v4261_v25 = vpop.eup %4260 }
 0xe1a   :  { %v3406_v14 = vmul.f32 %v4261_v25, %v6463_v57 }
 0xe1b   :  { %v4263_v11 = vpop.eup %4262 }
 0xe1c   :  { %v6545_v62 = vadd.f32 %v3407_v40, %v3406_v14 }
 0xe1e   :  { %4264 = vtanh.f32 %v6545_v62 }
 0xe2b   :  { %v4265_v3 = vpop.eup %4264 }
 0xe2c   :  { %v6548_v54 = vmul.f32 %v4265_v3, %v4263_v11  ;;  %v3778_v3 = vld [vmem:[#allocation13 + $0x70] sm:$0xff] }
 0xe2e   :  { %3481 = vmatmul.mubr.f32.vlgmr.msra.gmra.mxu0 %v6548_v54  ;;  %3552 = vmatmul.mubr.f32.vlgmr.msra.gmra.mxu1 %v6548_v54 }
 0xe2f   :  { %3592 = vmatpush1.msra.mxu0 %v6178_v61  ;;  %3663 = vmatpush1.msra.mxu1 %v6181_v2  ;;  %v7293_v61 = vld [vmem:[#allocation37_spill] sm:$0xff]  ;;  %v7294_v2 = vld [vmem:[#allocation38_spill] sm:$0xff] }
 0xe30   :  { %3593 = vmatprep.subr.mxu0 %v6184_v27  ;;  %3664 = vmatprep.subr.mxu1 %v6187_v24  ;;  %v7295_v27 = vld [vmem:[#allocation39_spill] sm:$0xff]  ;;  %v7296_v24 = vld [vmem:[#allocation45_spill] sm:$0xff] }
 0xe31   :  { %3594 = vmatpush1.msra.mxu0 %v6190_v32  ;;  %3665 = vmatpush1.msra.mxu1 %v6193_v23  ;;  %v7297_v32 = vld [vmem:[#allocation46_spill] sm:$0xff]  ;;  %v7298_v23 = vld [vmem:[#allocation57_spill] sm:$0xff] }
 0xe32   :  { %3595 = vmatprep.subr.mxu0 %v6196_v8  ;;  %3666 = vmatprep.subr.mxu1 %v6199_v31  ;;  %v7299_v8 = vld [vmem:[#allocation56_spill] sm:$0xff]  ;;  %v7300_v31 = vld [vmem:[#allocation47_spill] sm:$0xff] }
 0xe33   :  { %3596 = vmatpush1.msra.mxu0 %v6202_v19  ;;  %3667 = vmatpush1.msra.mxu1 %v6205_v34  ;;  %v7301_v19 = vld [vmem:[#allocation48_spill] sm:$0xff]  ;;  %v7302_v34 = vld [vmem:[#allocation59_spill] sm:$0xff] }
 0xe34   :  { %3597 = vmatprep.subr.mxu0 %v6294_v38  ;;  %3668 = vmatprep.subr.mxu1 %v6297_v52  ;;  %v7303_v38 = vld [vmem:[#allocation35_spill] sm:$0xff]  ;;  %v7304_v52 = vld [vmem:[#allocation36_spill] sm:$0xff] }
 0xe35   :  { %3598 = vmatpush1.msra.mxu0 %v6300_v53  ;;  %3669 = vmatpush1.msra.mxu1 %v6303_v51  ;;  %v7305_v53 = vld [vmem:[#allocation44_spill] sm:$0xff]  ;;  %v7306_v51 = vld [vmem:[#allocation55_spill] sm:$0xff] }
 0xe36   :  { %3599 = vmatprep.subr.mxu0 %v6306_v59  ;;  %3670 = vmatprep.subr.mxu1 %v6309_v4  ;;  %v7307_v59 = vld [vmem:[#allocation22_spill] sm:$0xff]  ;;  %v7308_v4 = vld [vmem:[#allocation21_spill] sm:$0xff] }
 0xe37   :  { %3600 = vmatpush1.msra.mxu0 %v6312_v18  ;;  %3671 = vmatpush1.msra.mxu1 %v6315_v20  ;;  %v7309_v18 = vld [vmem:[#allocation58_spill] sm:$0xff]  ;;  %v7310_v20 = vld [vmem:[#allocation17_spill] sm:$0xff] }
 0xe38   :  { %3601 = vmatprep.subr.mxu0 %v6318_v42  ;;  %3672 = vmatprep.subr.mxu1 %v6321_v6  ;;  %v7311_v42 = vld [vmem:[#allocation26_spill] sm:$0xff]  ;;  %v7312_v6 = vld [vmem:[#allocation49_spill] sm:$0xff] }
 0xe39   :  { %3602 = vmatpush1.msra.mxu0 %v6324_v10  ;;  %3673 = vmatpush1.msra.mxu1 %v6327_v17  ;;  %v7313_v10 = vmov 0.0   ;;  %v7314_v17 = vld [vmem:[#allocation50_spill] sm:$0xff] }
 0xe3a   :  { %3603 = vmatprep.subr.mxu0 %v6330_v37  ;;  %3674 = vmatprep.subr.mxu1 %v6333_v41  ;;  %v3779_v37 = vld [vmem:[#allocation13 + $0x78] sm:$0xff]  ;;  %v7315_v41 = vld [vmem:[#allocation54_spill] sm:$0xff] }
 0xe3b   :  { %3604 = vmatpush1.msra.mxu0 %v6336_v7  ;;  %3675 = vmatpush1.msra.mxu1 %v6339_v15  ;;  %v7316_v7 = vld [vmem:[#allocation27_spill] sm:$0xff] }
 0xe3c   :  { %3605 = vmatprep.subr.mxu0 %v6342_v45  ;;  %3676 = vmatprep.subr.mxu1 %v6345_v16  ;;  %v2203_v15 = vadd.f32 %v7316_v7, %v7315_v41  ;;  %v7317_v16 = vld [vmem:[#allocation53_spill] sm:$0xff] }
 0xe3d   :  { %3606 = vmatpush1.msra.mxu0 %v6348_v49  ;;  %3677 = vmatpush1.msra.mxu1 %v6351_v26  ;;  %v2205_v49 = vadd.f32 %v7317_v16, %v5987_v12 }
 0xe3e   :  { %3607 = vmatprep.subr.mxu0 %v6354_v47  ;;  %3678 = vmatprep.subr.mxu1 %v6357_v0 }
 0xe3f   :  { %3608 = vmatpush1.msra.mxu0 %v6360_v63  ;;  %3679 = vmatpush1.msra.mxu1 %v6363_v39 }
 0xe40   :  { %3609 = vmatprep.subr.mxu0 %v6366_v35  ;;  %3680 = vmatprep.subr.mxu1 %v6369_v55 }
 0xe41   :  { %3610 = vmatpush1.msra.mxu0 %v6372_v5  ;;  %3681 = vmatpush1.msra.mxu1 %v6375_v43  ;;  %v7318_v5 = vld [vmem:[#allocation65_spill] sm:$0xff] }
 0xe42   :  { %3611 = vmatprep.subr.mxu0 %v6378_v46  ;;  %3682 = vmatprep.subr.mxu1 %v6381_v48  ;;  %v2318_v43 = vadd.f32 %v7318_v5, %v7184_v50  ;;  %v7319_v48 = vld [vmem:[#allocation34_spill] sm:$0xff] }
 0xe43   :  { %3612 = vmatpush1.msra.mxu0 %v6384_v58  ;;  %3683 = vmatpush1.msra.mxu1 %v7293_v61  ;;  %v2316_v58 = vadd.f32 %v7319_v48, %v6004_v36  ;;  %v7320_v61 = vld [vmem:[#allocation70_spill] sm:$0xff]  ;;  %v3963_v48 = vld [vmem:[%s6678_s8] ss:$0 sm:$0xff] }
 0xe44   :  { %3613 = vmatprep.subr.mxu0 %v7294_v2  ;;  %3684 = vmatprep.subr.mxu1 %v7295_v27  ;;  %v3777_v2 = vld [vmem:[#allocation13 + $0x68] sm:$0xff]  ;;  %v3776_v27 = vld [vmem:[#allocation13 + $0x60] sm:$0xff] }
 0xe45   :  { %3614 = vmatpush1.msra.mxu0 %v7296_v24  ;;  %3685 = vmatpush1.msra.mxu1 %v7297_v32  ;;  %v3774_v24 = vld [vmem:[#allocation13 + $0x50] sm:$0xff]  ;;  %v3773_v32 = vld [vmem:[#allocation13 + $0x48] sm:$0xff] }
 0xe46   :  { %3615 = vmatprep.subr.mxu0 %v7298_v23  ;;  %3686 = vmatprep.subr.mxu1 %v7299_v8  ;;  %v3772_v23 = vld [vmem:[#allocation13 + $0x40] sm:$0xff]  ;;  %v3771_v8 = vld [vmem:[#allocation13 + $0x38] sm:$0xff] }
 0xe47   :  { %3616 = vmatpush1.msra.mxu0 %v7300_v31  ;;  %3687 = vmatpush1.msra.mxu1 %v7301_v19  ;;  %v3770_v31 = vld [vmem:[#allocation13 + $0x30] sm:$0xff]  ;;  %v3769_v19 = vld [vmem:[#allocation13 + $0x28] sm:$0xff] }
 0xe48   :  { %3617 = vmatprep.subr.mxu0 %v7302_v34  ;;  %3688 = vmatprep.subr.mxu1 %v7303_v38  ;;  %v3768_v34 = vld [vmem:[#allocation13 + $0x20] sm:$0xff]  ;;  %v3767_v38 = vld [vmem:[#allocation13 + $0x18] sm:$0xff] }
 0xe49   :  { %3618 = vmatpush1.msra.mxu0 %v7304_v52  ;;  %3689 = vmatpush1.msra.mxu1 %v7305_v53  ;;  %v3766_v52 = vld [vmem:[#allocation13 + $0x10] sm:$0xff]  ;;  %v3765_v53 = vld [vmem:[#allocation13 + $0x8] sm:$0xff] }
 0xe4a   :  { %3619 = vmatprep.subr.mxu0 %v7306_v51  ;;  %3690 = vmatprep.subr.mxu1 %v7307_v59  ;;  %v3764_v51 = vld [vmem:[#allocation13] sm:$0xff]  ;;  %v7321_v59 = vld [vmem:[#allocation42_spill] sm:$0xff] }
 0xe4b   :  { %3620 = vmatpush1.msra.mxu0 %v7308_v4  ;;  %3691 = vmatpush1.msra.mxu1 %v7309_v18  ;;  %v7322_v4 = vld [vmem:[#allocation43_spill] sm:$0xff] }
 0xe4c   :  { %3621 = vmatprep.subr.mxu0 %v7310_v20  ;;  %3692 = vmatprep.subr.mxu1 %v7311_v42  ;;  %v7323_v18 = vld [vmem:[#allocation19_spill] sm:$0xff]  ;;  %v7324_v20 = vld [vmem:[#allocation61_spill] sm:$0xff]  ;;  %v7325_v42 = vld [vmem:[#allocation64_spill] sm:$0xff] }
 0xe4d   :  { %3622 = vmatpush1.msra.mxu0 %v7312_v6  ;;  %3655 = vmatprep.mubr.f32.mxu0 %v7313_v10  ;;  %v2209_v6 = vadd.f32 %v7325_v42, %v7315_v41 }
 0xe4e   :  { %3693 = vmatpush1.msra.mxu1 %v7314_v17  ;;  %3726 = vmatprep.mubr.f32.mxu1 %v7313_v10  ;;  %v7326_v17 = vld [vmem:[#allocation67_spill] sm:$0xff] }
 0xe4f   :  { %3988 = vmatprep.subr.mxu0 %v3779_v37 }
 0xeee   :  { %v3482_v45 = vpop.f32.mrf.mxu0  ;;  %v3553_v39 = vpop.f32.mrf.mxu1 }
 0xeef   :  { %v3558_v26 = vadd.f32 %v3482_v45, %v2203_v15  ;;  %v3560_v57 = vadd.f32 %v3553_v39, %v2316_v58  ;;  %v7328_v39 = vld [vmem:[#allocation40_spill] sm:$0xff] }
 0xef0   :  { %v3484_v47 = vpop.f32.mrf.mxu0  ;;  %v3555_v55 = vpop.f32.mrf.mxu1  ;;  %v2322_v41 = vadd.f32 %v7328_v39, %v6004_v36 }
 0xef1   :  { %v3957_v0 = vmul.f32 -1.442695, %v3558_v26  ;;  %v3559_v63 = vadd.f32 %v3484_v47, %v2205_v49  ;;  %v3561_v46 = vadd.f32 %v3555_v55, %v2318_v43 }
 0xef3   :  { %4266 = vpow2.f32 %v3957_v0  ;;  %v3958_v35 = vmul.f32 -1.442695, %v3559_v63  ;;  %v3959_v60 = vmul.f32 -1.442695, %v3561_v46  ;;  %v7327_v0 = vld [vmem:[#allocation68_spill] sm:$0xff] }
 0xef5   :  { %4268 = vpow2.f32 %v3958_v35 }
 0xef6   :  { %4270 = vtanh.f32 %v3560_v57 }
 0xef7   :  { %4272 = vpow2.f32 %v3959_v60 }
 0xf00   :  { %v4267_v21 = vpop.eup %4266 }
 0xf01   :  { %v3565_v56 = vadd.f32 1.0, %v4267_v21 }
 0xf02   :  { %v4269_v1 = vpop.eup %4268 }
 0xf03   :  { %4274 = vrcp.f32 %v3565_v56  ;;  %v3571_v13 = vadd.f32 1.0, %v4269_v1  ;;  %v4271_v33 = vpop.eup %4270 }
 0xf04   :  { %v4273_v9 = vpop.eup %4272 }
 0xf05   :  { %4276 = vrcp.f32 %v3571_v13  ;;  %v3578_v30 = vadd.f32 1.0, %v4273_v9 }
 0xf07   :  { %4278 = vrcp.f32 %v3578_v30 }
 0xf10   :  { %v4275_v22 = vpop.eup %4274 }
 0xf11   :  { %v3582_v28 = vmul.f32 %v4275_v22, %v4271_v33 }
 0xf12   :  { %v4277_v44 = vpop.eup %4276 }
 0xf13   :  { %v3581_v40 = vmul.f32 %v4277_v44, %v6545_v62  ;;  %v3775_v62 = vld [vmem:[#allocation13 + $0x58] sm:$0xff] }
 0xf14   :  { %v4279_v29 = vpop.eup %4278 }
 0xf15   :  { %v6625_v25 = vadd.f32 %v3582_v28, %v3581_v40 }
 0xf17   :  { %4280 = vtanh.f32 %v6625_v25 }
 0xf24   :  { %v4281_v14 = vpop.eup %4280 }
 0xf25   :  { %v3585_v11 = vmul.f32 %v4281_v14, %v4279_v29 }
 0xf27   :  { %3656 = vmatmul.mubr.f32.vlgmr.msra.gmra.mxu0 %v3585_v11  ;;  %3727 = vmatmul.mubr.f32.vlgmr.msra.gmra.mxu1 %v3585_v11 }
 0xf28   :  { %3989 = vmatpush3.msra.mxu0 %v3779_v37  ;;  %4020 = vmatprep.mubr.f32.mxu0 %v7320_v61  ;;  %v2211_v37 = vadd.f32 %v7326_v17, %v5987_v12 }
 0xf29   :  { %3990 = vmatprep.subr.mxu0 %v3778_v3 }
 0xf2a   :  { %3991 = vmatpush3.msra.mxu0 %v3778_v3 }
 0xf2b   :  { %3992 = vmatprep.subr.mxu0 %v3777_v2 }
 0xf2c   :  { %3993 = vmatpush3.msra.mxu0 %v3777_v2 }
 0xf2d   :  { %3994 = vmatprep.subr.mxu0 %v3776_v27 }
 0xf2e   :  { %3995 = vmatpush3.msra.mxu0 %v3776_v27 }
 0xf2f   :  { %3996 = vmatprep.subr.mxu0 %v3775_v62 }
 0xf30   :  { %3997 = vmatpush3.msra.mxu0 %v3775_v62 }
 0xf31   :  { %3998 = vmatprep.subr.mxu0 %v3774_v24 }
 0xf32   :  { %3999 = vmatpush3.msra.mxu0 %v3774_v24 }
 0xf33   :  { %4000 = vmatprep.subr.mxu0 %v3773_v32 }
 0xf34   :  { %4001 = vmatpush3.msra.mxu0 %v3773_v32 }
 0xf35   :  { %4002 = vmatprep.subr.mxu0 %v3772_v23 }
 0xf36   :  { %4003 = vmatpush3.msra.mxu0 %v3772_v23 }
 0xf37   :  { %4004 = vmatprep.subr.mxu0 %v3771_v8 }
 0xf38   :  { %4005 = vmatpush3.msra.mxu0 %v3771_v8 }
 0xf39   :  { %4006 = vmatprep.subr.mxu0 %v3770_v31 }
 0xf3a   :  { %4007 = vmatpush3.msra.mxu0 %v3770_v31 }
 0xf3b   :  { %4008 = vmatprep.subr.mxu0 %v3769_v19 }
 0xf3c   :  { %4009 = vmatpush3.msra.mxu0 %v3769_v19 }
 0xf3d   :  { %4010 = vmatprep.subr.mxu0 %v3768_v34 }
 0xf3e   :  { %4011 = vmatpush3.msra.mxu0 %v3768_v34 }
 0xf3f   :  { %4012 = vmatprep.subr.mxu0 %v3767_v38 }
 0xf40   :  { %4013 = vmatpush3.msra.mxu0 %v3767_v38 }
 0xf41   :  { %4014 = vmatprep.subr.mxu0 %v3766_v52 }
 0xf42   :  { %4015 = vmatpush3.msra.mxu0 %v3766_v52 }
 0xf43   :  { %4016 = vmatprep.subr.mxu0 %v3765_v53 }
 0xf44   :  { %4017 = vmatpush3.msra.mxu0 %v3765_v53 }
 0xf45   :  { %4018 = vmatprep.subr.mxu0 %v3764_v51 }
 0xf46   :  { %4019 = vmatpush3.msra.mxu0 %v3764_v51 }
 0xf47   :  { %4021 = vmatmul.mubr.f32.vlgmr.msra.gmra.mxu0 %v7321_v59 }
 0xf48   :  { %4023 = vmatprep.mubr.f32.mxu0 %v7322_v4 }
 0xf4b   :  { %4024 = vmatmul.mubr.f32.gmra.mxu0 %v7323_v18 }
 0xf4c   :  { %4026 = vmatprep.mubr.f32.mxu0 %v7324_v20 }
 0xf4f   :  { %4027 = vmatmul.mubr.f32.gmra.mxu0 %v6548_v54  ;;  %v2324_v54 = vadd.f32 %v7327_v0, %v7184_v50 }
 0xf50   :  { %4029 = vmatprep.mubr.f32.mxu0 %v3585_v11 }
 0xfe7   :  { %v3657_v10 = vpop.f32.mrf.mxu0  ;;  %v3728_v49 = vpop.f32.mrf.mxu1 }
 0xfe8   :  { %v3733_v7 = vadd.f32 %v3657_v10, %v2209_v6  ;;  %v3735_v35 = vadd.f32 %v3728_v49, %v2322_v41 }
 0xfe9   :  { %v3659_v15 = vpop.f32.mrf.mxu0  ;;  %v3730_v47 = vpop.f32.mrf.mxu1 }
 0xfea   :  { %v3960_v45 = vmul.f32 -1.442695, %v3733_v7  ;;  %v3734_v16 = vadd.f32 %v3659_v15, %v2211_v37  ;;  %v3736_v63 = vadd.f32 %v3730_v47, %v2324_v54 }
 0xfec   :  { %4282 = vpow2.f32 %v3960_v45  ;;  %v3961_v26 = vmul.f32 -1.442695, %v3734_v16  ;;  %v3962_v55 = vmul.f32 -1.442695, %v3736_v63 }
 0xfee   :  { %4284 = vpow2.f32 %v3961_v26 }
 0xfef   :  { %4286 = vtanh.f32 %v3735_v35 }
 0xff0   :  { %4288 = vpow2.f32 %v3962_v55 }
 0xff9   :  { %v4283_v5 = vpop.eup %4282 }
 0xffa   :  { %v3740_v12 = vadd.f32 1.0, %v4283_v5 }
 0xffb   :  { %v4285_v43 = vpop.eup %4284 }
 0xffc   :  { %4290 = vrcp.f32 %v3740_v12  ;;  %v3746_v46 = vadd.f32 1.0, %v4285_v43  ;;  %v4287_v58 = vpop.eup %4286 }
 0xffd   :  { %v4289_v57 = vpop.eup %4288 }
 0xffe   :  { %4292 = vrcp.f32 %v3746_v46  ;;  %v3753_v33 = vadd.f32 1.0, %v4289_v57 }
0x1000   :  { %4294 = vrcp.f32 %v3753_v33 }
0x1007   :  { %v4022_v50 = vpop.f32.mrf.mxu0 }
0x1008   :  { %v3867_v60 = vadd.f32 %v4022_v50, %v3963_v48 }
0x1009   :  { %v4291_v21 = vpop.eup %4290  ;;  %v3861_v36 = vpop.f32.mrf.mxu0 }
0x100a   :  { %v3757_v56 = vmul.f32 %v4291_v21, %v4287_v58  ;;  %3901 = vst [vmem:[%s6679_s9 + $0x8] sm:$0xff] %v3867_v60  ;;  %v3862_v1 = vadd.f32 %v3963_v48, %v3861_v36 }
0x100b   :  { %v4293_v13 = vpop.eup %4292  ;;  %v4025_v9 = vpop.f32.mrf.mxu0 }
0x100c   :  { %v3756_v22 = vmul.f32 %v4293_v13, %v6625_v25  ;;  %3900 = vst [vmem:[%s6679_s9] sm:$0xff] %v3862_v1  ;;  %v3877_v28 = vadd.f32 %v4025_v9, %v3963_v48 }
0x100d   :  { %v3871_v44 = vpop.f32.mrf.mxu0  ;;  %v4295_v3 = vpop.eup %4294 }
0x100e   :  { %3903 = vst [vmem:[%s6679_s9 + $0x18] sm:$0xff] %v3877_v28  ;;  %v3872_v30 = vadd.f32 %v3963_v48, %v3871_v44  ;;  %v3758_v40 = vadd.f32 %v3757_v56, %v3756_v22 }
0x100f   :  { %v4028_v29 = vpop.f32.mrf.mxu0 }
0x1010   :  { %3902 = vst [vmem:[%s6679_s9 + $0x10] sm:$0xff] %v3872_v30  ;;  %v3887_v14 = vadd.f32 %v4028_v29, %v3963_v48  ;;  %4296 = vtanh.f32 %v3758_v40 }
0x1011   :  { %v3881_v25 = vpop.f32.mrf.mxu0 }
0x1012   :  { %3905 = vst [vmem:[%s6679_s9 + $0x28] sm:$0xff] %v3887_v14  ;;  %v3882_v11 = vadd.f32 %v3963_v48, %v3881_v25 }
0x1014   :  { %3904 = vst [vmem:[%s6679_s9 + $0x20] sm:$0xff] %v3882_v11 }
0x101d   :  { %v4297_v61 = vpop.eup %4296 }
0x101e   :  { %v3760_v2 = vmul.f32 %v4297_v61, %v4295_v3 }
0x1020   :  { %4030 = vmatmul.mubr.f32.gmra.mxu0 %v3760_v2 }
0x10e0   :  { %v4031_v27 = vpop.f32.mrf.mxu0 }
0x10e1   :  { %v3897_v62 = vadd.f32 %v4031_v27, %v3963_v48 }
0x10e2   :  { %v3891_v24 = vpop.f32.mrf.mxu0 }
0x10e3   :  { %3907 = vst [vmem:[%s6679_s9 + $0x38] sm:$0xff] %v3897_v62  ;;  %v3892_v32 = vadd.f32 %v3963_v48, %v3891_v24 }
0x10e5   :  { %3906 = vst [vmem:[%s6679_s9 + $0x30] sm:$0xff] %v3892_v32 }
0x10e6   :  { %3912 = vsyncpa [#allocation7], 1 }
0x10e7   :  { %3913 = vsyncpa [#allocation9], 1 }
0x10e8   :  { %3914 = vsyncpa [#allocation12], 1 }

</bundles_post_ra>
